<compile_context>
chip_gen: v5e
topology: v5e:2x2
jax: 0.10.0
libtpu: 0.0.40
codegen_flags: <defaults>
</compile_context>

<pallas_src>
import functools

import jax
import jax.numpy as jnp
from jax.experimental import pallas as pl
from jax.experimental.pallas import tpu as pltpu

IN_FEATURES = 87 * 20          # 1740
K_PAD = 14 * 128               # 1792: lane-aligned padding of the fc1 reduction dim
HIDDEN = 512
OUT = 8
OUT_PAD = 128                  # lane-dense logits / output width
BN_EPS = 1e-5
NEG_BIAS = -1e30               # bias of padded logit columns -> exp() == 0 in softmax
FUSED_MAX_BATCH = 512          # padded batches up to this size use the fused kernel
VMEM_LIMIT = 32 * 1024 * 1024


def _round_up(n, m):
    return (n + m - 1) // m * m


# ---------------------------------------------------------------------------
# Fused single-tile kernel (whole batch resident): fc1 -> BN(batch stats) ->
# ReLU -> fc4 -> softmax. Zero-padded batch rows / K columns contribute exactly
# 0 to the BN sums (no fc1 bias), and we divide by the true B, so stats are exact.
# ---------------------------------------------------------------------------
def _fused_kernel(x_ref, w1_ref, gamma_ref, beta_ref, w2_ref, b2_ref, o_ref, *, inv_b):
    h = jnp.dot(x_ref[...], w1_ref[...], preferred_element_type=jnp.float32)  # (B8, 512)
    mean = jnp.sum(h, axis=0, keepdims=True) * inv_b                          # (1, 512)
    # NOTE: single-pass E[h^2]-mean^2 variance; fine for these scales/init.
    var = jnp.sum(h * h, axis=0, keepdims=True) * inv_b - mean * mean
    scale = gamma_ref[...] * jax.lax.rsqrt(var + BN_EPS)
    shift = beta_ref[...] - mean * scale
    hn = jnp.maximum(h * scale + shift, 0.0)                                  # BN + ReLU
    logits = jnp.dot(hn.astype(jnp.bfloat16), w2_ref[...],
                     preferred_element_type=jnp.float32) + b2_ref[...]        # (B8, 128)
    m = jnp.max(logits, axis=1, keepdims=True)
    e = jnp.exp(logits - m)                                                   # pad cols -> 0
    o_ref[...] = e / jnp.sum(e, axis=1, keepdims=True)


# ---------------------------------------------------------------------------
# Two-pass path, pass 1: fc1 matmul (bf16 in, f32 acc) + per-tile BN partials.
# Partial sums are computed in f32 *before* h is cast to bf16 for writeback.
# ---------------------------------------------------------------------------
def _fc1_stats_kernel(x_ref, w1_ref, h_ref, stats_ref):
    h = jnp.dot(x_ref[...], w1_ref[...], preferred_element_type=jnp.float32)
    stats_ref[:, 0:1, :] = jnp.sum(h, axis=0, keepdims=True)[None]        # sum
    stats_ref[:, 1:2, :] = jnp.sum(h * h, axis=0, keepdims=True)[None]    # sum of squares
    h_ref[...] = h.astype(jnp.bfloat16)   # bf16 intermediate: halves h HBM traffic


# ---------------------------------------------------------------------------
# Two-pass path, pass 2: precomputed BN scale/shift -> ReLU -> fc4 -> softmax.
# Output is lane-dense (TB, 128); real logits live in the first 8 columns.
# ---------------------------------------------------------------------------
def _bn_fc2_softmax_kernel(h_ref, scale_ref, shift_ref, w2_ref, b2_ref, o_ref):
    hn = jnp.maximum(h_ref[...].astype(jnp.float32) * scale_ref[...] + shift_ref[...], 0.0)
    logits = jnp.dot(hn.astype(jnp.bfloat16), w2_ref[...],
                     preferred_element_type=jnp.float32) + b2_ref[...]
    m = jnp.max(logits, axis=1, keepdims=True)
    e = jnp.exp(logits - m)
    o_ref[...] = e / jnp.sum(e, axis=1, keepdims=True)


def prepare_params(w1, gamma, beta, w2, b2):
    """One-time weight prep (hoisted out of the forward): pad + bf16-cast for kernels."""
    w1p = jnp.pad(w1, ((0, K_PAD - IN_FEATURES), (0, 0))).astype(jnp.bfloat16)
    w2p = jnp.pad(w2, ((0, 0), (0, OUT_PAD - OUT))).astype(jnp.bfloat16)
    # Padded logit columns get a huge negative bias so exp() == 0 in the softmax denom.
    b2p = jnp.pad(b2, ((0, 0), (0, OUT_PAD - OUT)), constant_values=NEG_BIAS)
    return w1p, gamma.reshape(1, HIDDEN), beta.reshape(1, HIDDEN), w2p, b2p


@jax.jit
def mlp_forward(x, w1p, gamma, beta, w2p, b2p):
    B = x.shape[0]
    B8 = _round_up(B, 8)
    x2d = x.reshape(B, -1)                 # nn.Flatten

    cp_par = pltpu.CompilerParams(dimension_semantics=("parallel",),
                                  vmem_limit_bytes=VMEM_LIMIT)
    cp_arb = pltpu.CompilerParams(dimension_semantics=("arbitrary",),
                                  vmem_limit_bytes=VMEM_LIMIT)

    if B8 <= FUSED_MAX_BATCH:
        # Fused single-kernel fast path (common inference case): no h HBM round trip,
        # no stats reduce, no second launch. Pad + bf16-cast x in one tiny XLA op.
        xp = jnp.pad(x2d, ((0, B8 - B), (0, K_PAD - IN_FEATURES))).astype(jnp.bfloat16)
        out = pl.pallas_call(
            functools.partial(_fused_kernel, inv_b=1.0 / B),
            grid=(1,),
            out_shape=jax.ShapeDtypeStruct((B8, OUT_PAD), jnp.float32),
            in_specs=[pl.BlockSpec((B8, K_PAD), lambda i: (0, 0)),
                      pl.BlockSpec((K_PAD, HIDDEN), lambda i: (0, 0)),
                      pl.BlockSpec((1, HIDDEN), lambda i: (0, 0)),
                      pl.BlockSpec((1, HIDDEN), lambda i: (0, 0)),
                      pl.BlockSpec((HIDDEN, OUT_PAD), lambda i: (0, 0)),
                      pl.BlockSpec((1, OUT_PAD), lambda i: (0, 0))],
            out_specs=pl.BlockSpec((B8, OUT_PAD), lambda i: (0, 0)),
            compiler_params=cp_arb,
        )(xp, w1p, gamma, beta, w2p, b2p)
        return out[:B, :OUT]

    # -------- large batch: two-pass, batch-gridded, >= 2 tiles (uses both v7x TCs) ----
    # TB <= 512, multiple of 16 (bf16 sublane packing), chosen so num_tiles >= 2.
    TB = min(512, _round_up((B8 + 1) // 2, 16))
    B_pad = _round_up(B8, TB)
    num_tiles = B_pad // TB

    # In a real pipeline x would be produced pre-padded / pre-cast by the upstream op;
    # here the pad + bf16 cast is a single fused XLA op per call.
    xp = jnp.pad(x2d, ((0, B_pad - B), (0, K_PAD - IN_FEATURES))).astype(jnp.bfloat16)

    h, stats = pl.pallas_call(
        _fc1_stats_kernel,
        grid=(num_tiles,),
        out_shape=(jax.ShapeDtypeStruct((B_pad, HIDDEN), jnp.bfloat16),
                   jax.ShapeDtypeStruct((num_tiles, 2, HIDDEN), jnp.float32)),
        in_specs=[pl.BlockSpec((TB, K_PAD), lambda i: (i, 0)),
                  pl.BlockSpec((K_PAD, HIDDEN), lambda i: (0, 0))],     # resident weights
        out_specs=(pl.BlockSpec((TB, HIDDEN), lambda i: (i, 0)),
                   pl.BlockSpec((1, 2, HIDDEN), lambda i: (i, 0, 0))),
        compiler_params=cp_par,
    )(xp, w1p)

    # Tiny XLA reduce of per-tile partials + BN scale/shift precompute (one (2,512) op).
    stats_tot = jnp.sum(stats, axis=0)                       # (2, HIDDEN)
    mean = stats_tot[0:1, :] * (1.0 / B)
    var = stats_tot[1:2, :] * (1.0 / B) - mean * mean        # biased (train-mode) var
    scale = gamma * jax.lax.rsqrt(var + BN_EPS)
    shift = beta - mean * scale

    out = pl.pallas_call(
        _bn_fc2_softmax_kernel,
        grid=(num_tiles,),
        out_shape=jax.ShapeDtypeStruct((B_pad, OUT_PAD), jnp.float32),
        in_specs=[pl.BlockSpec((TB, HIDDEN), lambda i: (i, 0)),
                  pl.BlockSpec((1, HIDDEN), lambda i: (0, 0)),
                  pl.BlockSpec((1, HIDDEN), lambda i: (0, 0)),
                  pl.BlockSpec((HIDDEN, OUT_PAD), lambda i: (0, 0)),
                  pl.BlockSpec((1, OUT_PAD), lambda i: (0, 0))],
        out_specs=pl.BlockSpec((TB, OUT_PAD), lambda i: (i, 0)),
        compiler_params=cp_par,
    )(h, scale, shift, w2p, b2p)

    return out[:B, :OUT]


def init_params(key):
    k1, k2, k3 = jax.random.split(key, 3)
    # PyTorch nn.Linear init: U(-1/sqrt(fan_in), 1/sqrt(fan_in)).
    bound1 = 1.0 / jnp.sqrt(jnp.float32(IN_FEATURES))
    w1 = jax.random.uniform(k1, (IN_FEATURES, HIDDEN), jnp.float32, -bound1, bound1)
    # fc1 bias intentionally omitted: under train-mode BatchNorm1d it is exactly
    # cancelled by the mean subtraction, so it never affects the forward output.
    bound2 = 1.0 / jnp.sqrt(jnp.float32(HIDDEN))
    w2 = jax.random.uniform(k2, (HIDDEN, OUT), jnp.float32, -bound2, bound2)
    b2 = jax.random.uniform(k3, (1, OUT), jnp.float32, -bound2, bound2)
    # BatchNorm1d affine init: gamma=1, beta=0.
    gamma = jnp.ones((1, HIDDEN), jnp.float32)
    beta = jnp.zeros((1, HIDDEN), jnp.float32)
    return w1, gamma, beta, w2, b2


def reference_forward(x, w1, gamma, beta, w2, b2):
    # Pure-JAX fp32 reference matching the PyTorch module in training mode.
    B = x.shape[0]
    h = x.reshape(B, -1) @ w1
    mean = jnp.mean(h, axis=0, keepdims=True)
    var = jnp.mean((h - mean) ** 2, axis=0, keepdims=True)       # biased variance
    hn = (h - mean) * jax.lax.rsqrt(var + BN_EPS) * gamma + beta
    hn = jnp.maximum(hn, 0.0)
    logits = hn @ w2 + b2
    return jax.nn.softmax(logits, axis=1)


if __name__ == "__main__":
    key = jax.random.PRNGKey(0)
    kx, kp = jax.random.split(key)
    raw_params = init_params(kp)
    kernel_params = prepare_params(*raw_params)

    # --- small batch: fused single-kernel path ---
    B = 8
    x = jax.random.normal(kx, (B, 87, 20), jnp.float32)
    out = jax.block_until_ready(mlp_forward(x, *kernel_params))
    assert out.shape == (B, OUT)
    assert bool(jnp.all(jnp.abs(jnp.sum(out, axis=1) - 1.0) < 1e-3))
    ref = reference_forward(x, *raw_params)
    assert bool(jnp.allclose(out, ref, atol=5e-2))

    # --- large batch: two-pass multi-tile path (exercises tiled BN stats reduce) ---
    B2 = 600
    x2 = jax.random.normal(jax.random.PRNGKey(1), (B2, 87, 20), jnp.float32)
    out2 = jax.block_until_ready(mlp_forward(x2, *kernel_params))
    assert out2.shape == (B2, OUT)
    assert bool(jnp.all(jnp.abs(jnp.sum(out2, axis=1) - 1.0) < 1e-3))
    ref2 = reference_forward(x2, *raw_params)
    assert bool(jnp.allclose(out2, ref2, atol=5e-2))

    print("KERNEL_OK")
</pallas_src>

<mosaic_0001>
module attributes {stable_mosaic.version = 11 : i64} {
  func.func @_fused_kernel(%arg0: i32, %arg1: memref<8x1792xbf16, #tpu.memory_space<vmem>>, %arg2: memref<1792x512xbf16, #tpu.memory_space<vmem>>, %arg3: memref<1x512xf32, #tpu.memory_space<vmem>>, %arg4: memref<1x512xf32, #tpu.memory_space<vmem>>, %arg5: memref<512x128xbf16, #tpu.memory_space<vmem>>, %arg6: memref<1x128xf32, #tpu.memory_space<vmem>>, %arg7: memref<8x128xf32, #tpu.memory_space<vmem>>) attributes {dimension_semantics = [#tpu.dimension_semantics<arbitrary>], iteration_bounds = array<i64: 1>, scalar_prefetch = 0 : i64, scratch_operands = 0 : i64, tpu.core_type = #tpu.core_type<tc>, window_params = [{pipeline_mode = #tpu.pipeline_mode<synchronous>, transform_indices = @transform_0, window_bounds = array<i64: 8, 1792>}, {pipeline_mode = #tpu.pipeline_mode<synchronous>, transform_indices = @transform_1, window_bounds = array<i64: 1792, 512>}, {pipeline_mode = #tpu.pipeline_mode<synchronous>, transform_indices = @transform_2, window_bounds = array<i64: 1, 512>}, {pipeline_mode = #tpu.pipeline_mode<synchronous>, transform_indices = @transform_3, window_bounds = array<i64: 1, 512>}, {pipeline_mode = #tpu.pipeline_mode<synchronous>, transform_indices = @transform_4, window_bounds = array<i64: 512, 128>}, {pipeline_mode = #tpu.pipeline_mode<synchronous>, transform_indices = @transform_5, window_bounds = array<i64: 1, 128>}, {pipeline_mode = #tpu.pipeline_mode<synchronous>, transform_indices = @transform_6, window_bounds = array<i64: 8, 128>}]} {
    %c0 = arith.constant 0 : index
    %c0_0 = arith.constant 0 : index
    %0 = vector.load %arg1[%c0, %c0_0] : memref<8x1792xbf16, #tpu.memory_space<vmem>>, vector<8x1792xbf16>
    %c0_1 = arith.constant 0 : index
    %c0_2 = arith.constant 0 : index
    %1 = vector.load %arg2[%c0_1, %c0_2] : memref<1792x512xbf16, #tpu.memory_space<vmem>>, vector<1792x512xbf16>
    %cst = arith.constant dense<0.000000e+00> : vector<8x512xf32>
    %2 = tpu.matmul %0, %1, %cst {dimension_numbers = #tpu.dot_dimension_numbers<[1], [0], [0], [1], [0, 0, 1, 1], [], []>} : vector<8x1792xbf16>, vector<1792x512xbf16>, vector<8x512xf32> -> vector<8x512xf32>
    %cst_3 = arith.constant dense<0.000000e+00> : vector<512xf32>
    %3 = vector.multi_reduction <add>, %2, %cst_3 [0] : vector<8x512xf32> to vector<512xf32>
    %4 = vector.shape_cast %3 : vector<512xf32> to vector<1x512xf32>
    %cst_4 = arith.constant 1.250000e-01 : f32
    %5 = vector.broadcast %cst_4 : f32 to vector<1x512xf32>
    %6 = arith.mulf %4, %5 : vector<1x512xf32>
    %7 = arith.mulf %2, %2 : vector<8x512xf32>
    %cst_5 = arith.constant dense<0.000000e+00> : vector<512xf32>
    %8 = vector.multi_reduction <add>, %7, %cst_5 [0] : vector<8x512xf32> to vector<512xf32>
    %9 = vector.shape_cast %8 : vector<512xf32> to vector<1x512xf32>
    %cst_6 = arith.constant 1.250000e-01 : f32
    %10 = vector.broadcast %cst_6 : f32 to vector<1x512xf32>
    %11 = arith.mulf %9, %10 : vector<1x512xf32>
    %12 = arith.mulf %6, %6 : vector<1x512xf32>
    %13 = arith.subf %11, %12 : vector<1x512xf32>
    %c0_7 = arith.constant 0 : index
    %c0_8 = arith.constant 0 : index
    %14 = vector.load %arg3[%c0_7, %c0_8] : memref<1x512xf32, #tpu.memory_space<vmem>>, vector<1x512xf32>
    %cst_9 = arith.constant 9.99999974E-6 : f32
    %15 = vector.broadcast %cst_9 : f32 to vector<1x512xf32>
    %16 = arith.addf %13, %15 : vector<1x512xf32>
    %17 = math.rsqrt %16 : vector<1x512xf32>
    %18 = arith.mulf %14, %17 : vector<1x512xf32>
    %c0_10 = arith.constant 0 : index
    %c0_11 = arith.constant 0 : index
    %19 = vector.load %arg4[%c0_10, %c0_11] : memref<1x512xf32, #tpu.memory_space<vmem>>, vector<1x512xf32>
    %20 = arith.mulf %6, %18 : vector<1x512xf32>
    %21 = arith.subf %19, %20 : vector<1x512xf32>
    %22 = vector.broadcast %18 : vector<1x512xf32> to vector<8x512xf32>
    %23 = arith.mulf %2, %22 : vector<8x512xf32>
    %24 = vector.broadcast %21 : vector<1x512xf32> to vector<8x512xf32>
    %25 = arith.addf %23, %24 : vector<8x512xf32>
    %cst_12 = arith.constant 0.000000e+00 : f32
    %26 = vector.broadcast %cst_12 : f32 to vector<8x512xf32>
    %27 = arith.maximumf %25, %26 : vector<8x512xf32>
    %28 = arith.truncf %27 : vector<8x512xf32> to vector<8x512xbf16>
    %c0_13 = arith.constant 0 : index
    %c0_14 = arith.constant 0 : index
    %29 = vector.load %arg5[%c0_13, %c0_14] : memref<512x128xbf16, #tpu.memory_space<vmem>>, vector<512x128xbf16>
    %cst_15 = arith.constant dense<0.000000e+00> : vector<8x128xf32>
    %30 = tpu.matmul %28, %29, %cst_15 {dimension_numbers = #tpu.dot_dimension_numbers<[1], [0], [0], [1], [0, 0, 1, 1], [], []>} : vector<8x512xbf16>, vector<512x128xbf16>, vector<8x128xf32> -> vector<8x128xf32>
    %c0_16 = arith.constant 0 : index
    %c0_17 = arith.constant 0 : index
    %31 = vector.load %arg6[%c0_16, %c0_17] : memref<1x128xf32, #tpu.memory_space<vmem>>, vector<1x128xf32>
    %32 = vector.broadcast %31 : vector<1x128xf32> to vector<8x128xf32>
    %33 = arith.addf %30, %32 : vector<8x128xf32>
    %cst_18 = arith.constant dense<0xFF800000> : vector<8xf32>
    %34 = vector.multi_reduction <maximumf>, %33, %cst_18 [1] : vector<8x128xf32> to vector<8xf32>
    %35 = vector.shape_cast %34 : vector<8xf32> to vector<8x1xf32>
    %36 = vector.broadcast %35 : vector<8x1xf32> to vector<8x128xf32>
    %37 = arith.subf %33, %36 : vector<8x128xf32>
    %38 = math.exp %37 : vector<8x128xf32>
    %cst_19 = arith.constant dense<0.000000e+00> : vector<8xf32>
    %39 = vector.multi_reduction <add>, %38, %cst_19 [1] : vector<8x128xf32> to vector<8xf32>
    %40 = vector.shape_cast %39 : vector<8xf32> to vector<8x1xf32>
    %41 = vector.broadcast %40 : vector<8x1xf32> to vector<8x128xf32>
    %42 = arith.divf %38, %41 : vector<8x128xf32>
    %c0_20 = arith.constant 0 : index
    %c0_21 = arith.constant 0 : index
    %43 = vector.load %arg7[%c0_20, %c0_21] : memref<8x128xf32, #tpu.memory_space<vmem>>, vector<8x128xf32>
    tpu.vector_store %arg7[%c0_20, %c0_21], %42 {strides = array<i32>} : memref<8x128xf32, #tpu.memory_space<vmem>>, vector<8x128xf32>,
    return
  }
  func.func @transform_0(%arg0: i32) -> (i32, i32) {
    %c0_i32 = arith.constant 0 : i32
    %c0_i32_0 = arith.constant 0 : i32
    %c0_i32_1 = arith.constant 0 : i32
    return %c0_i32, %c0_i32_0 : i32, i32
  }
  func.func @transform_1(%arg0: i32) -> (i32, i32) {
    %c0_i32 = arith.constant 0 : i32
    %c0_i32_0 = arith.constant 0 : i32
    %c0_i32_1 = arith.constant 0 : i32
    return %c0_i32, %c0_i32_0 : i32, i32
  }
  func.func @transform_2(%arg0: i32) -> (i32, i32) {
    %c0_i32 = arith.constant 0 : i32
    %c0_i32_0 = arith.constant 0 : i32
    %c0_i32_1 = arith.constant 0 : i32
    return %c0_i32, %c0_i32_0 : i32, i32
  }
  func.func @transform_3(%arg0: i32) -> (i32, i32) {
    %c0_i32 = arith.constant 0 : i32
    %c0_i32_0 = arith.constant 0 : i32
    %c0_i32_1 = arith.constant 0 : i32
    return %c0_i32, %c0_i32_0 : i32, i32
  }
  func.func @transform_4(%arg0: i32) -> (i32, i32) {
    %c0_i32 = arith.constant 0 : i32
    %c0_i32_0 = arith.constant 0 : i32
    %c0_i32_1 = arith.constant 0 : i32
    return %c0_i32, %c0_i32_0 : i32, i32
  }
  func.func @transform_5(%arg0: i32) -> (i32, i32) {
    %c0_i32 = arith.constant 0 : i32
    %c0_i32_0 = arith.constant 0 : i32
    %c0_i32_1 = arith.constant 0 : i32
    return %c0_i32, %c0_i32_0 : i32, i32
  }
  func.func @transform_6(%arg0: i32) -> (i32, i32) {
    %c0_i32 = arith.constant 0 : i32
    %c0_i32_0 = arith.constant 0 : i32
    %c0_i32_1 = arith.constant 0 : i32
    return %c0_i32, %c0_i32_0 : i32, i32
  }
}

</mosaic_0001>

<bundles_post_ra>
// kernel: mlp_forward.1
= control target key start
LH: loop header
LB: loop body
LE: loop exit
PB: predicated region body
PF: predicated region fallthrough
CT: control target
= control target key end

     0   :  { %11 = vsyncpa [#allocation3], 0  ;;  %s6968_s0 = inlined_call_operand.vmem [shape: bf16[8,1792], index: 0, kind: input, shape index: {}]   ;;  %s6969_s1 = inlined_call_operand.hbm [shape: bf16[1792,512], index: 1, kind: input, shape index: {}]   ;;  %s6970_s2 = inlined_call_operand.hbm [shape: f32[1,512], index: 2, kind: input, shape index: {}]   ;;  %s6971_s3 = inlined_call_operand.hbm [shape: f32[1,512], index: 3, kind: input, shape index: {}]   ;;  %s6972_s4 = inlined_call_operand.hbm [shape: bf16[512,128], index: 4, kind: input, shape index: {}]   ;;  %s6973_s5 = inlined_call_operand.hbm [shape: f32[1,128], index: 5, kind: input, shape index: {}]   ;;  %s6974_s6 = inlined_call_operand.hbm [shape: f32[8,128], index: 6, kind: output, shape index: {}]  }
   0x1   :  { %12 = vsyncpa [#allocation6], 0 }
   0x2   :  { %13 = vsyncpa [#allocation9], 0  ;;  %s35_s23 = sshll.u32 %s6970_s2, 4  ;;  %s36_s23 = int_to_ptr.hbm [resolvable:$true] %s35_s23 }
   0x3   :  { %14 = vsyncpa [#allocation4], 0  ;;  %s6676_s24 = smov [#allocation5]   ;;  %s56_s28 = sshll.u32 %s6972_s4, 4  ;;  %s57_s28 = int_to_ptr.hbm [resolvable:$true] %s56_s28 }
   0x4   :  { %s37_s25 = sshll.u32 %s6676_s24, 4  ;;  %s6677_s29 = smov [#allocation8]   ;;  %s38_s25 = int_to_ptr.vmem [resolvable:$true] %s37_s25 }
   0x5   :  { %40 = dma.hbm_to_vmem [thread:$0]  %s36_s23, 64, %s38_s25, [#allocation6]  }
   0x6   :  { %s58_s30 = sshll.u32 %s6677_s29, 4  ;;  %s6678_s7 = smov 64   ;;  %s59_s30 = int_to_ptr.vmem [resolvable:$true] %s58_s30 }
   0x7   :  { %s6679_s8 = smov 4   ;;  %s21_s2 = sshll.u32 %s6969_s1, 4  ;;  %s22_s2 = int_to_ptr.hbm [resolvable:$true] %s21_s2 }
   0x8   :  { %64 = dma.hbm_to_vmem [thread:$0]  %s57_s28, 4096, %s59_s30, [#allocation9], %s6678_s7, %s6678_s7, %s6679_s8  }
   0x9   :  { %s6680_s11 = smov [#allocation2]   ;;  %s46_s4 = sshll.u32 %s6971_s3, 4  ;;  %s47_s4 = int_to_ptr.hbm [resolvable:$true] %s46_s4 }
   0xa   :  { %s23_s12 = sshll.u32 %s6680_s11, 4  ;;  %s6681_s15 = smov 256   ;;  %s24_s12 = int_to_ptr.vmem [resolvable:$true] %s23_s12 }
   0xb   :  { %s6682_s16 = smov 16   ;;  %s6683_s17 = smov [#allocation7]  }
   0xc   :  { %29 = dma.hbm_to_vmem [thread:$0]  %s22_s2, 57344, %s24_s12, [#allocation3], %s6681_s15, %s6681_s15, %s6682_s16  }
   0xd   :  { %s48_s18 = sshll.u32 %s6683_s17, 4  ;;  %s70_s21 = sshll.u32 %s6973_s5, 4  ;;  %s49_s18 = int_to_ptr.vmem [resolvable:$true] %s48_s18  ;;  %s71_s21 = int_to_ptr.hbm [resolvable:$true] %s70_s21 }
   0xe   :  { %51 = dma.hbm_to_vmem [thread:$0]  %s47_s4, 64, %s49_s18, [#allocation6]  }
   0xf   :  { %s6684_s1 = smov [#allocation10]  }
  0x10   :  { %s72_s22 = sshll.u32 %s6684_s1, 4  ;;  %s73_s22 = int_to_ptr.vmem [resolvable:$true] %s72_s22 }
  0x11   :  { %75 = dma.hbm_to_vmem [thread:$0]  %s71_s21, 16, %s73_s22, [#allocation9]  }
  0x12   :  { %6668 = dma.done.wait [#allocation3], 57344  }
  0x13   :  { %6669 = vsyncadd [#allocation3], 4294909952 }
  0x14   :  { %6670 = dma.done.wait [#allocation6], 128  }
  0x15   :  { %6671 = vsyncadd [#allocation6], 4294967168 }
  0x16   :  { %6672 = dma.done.wait [#allocation9], 4112  }
  0x17   :  { %6673 = vsyncadd [#allocation9], 4294963184  ;;  %v4215_v0 = vld [vmem:[#allocation2 + $0xe0] sm:$0xf]  ;;  %v6051_v1 = vld [vmem:[#allocation2 + $0xec] sm:$0xf0] }
  0x18   :  { %v4343_v2 = vld [vmem:[#allocation2 + $0x1e0] sm:$0xf]  ;;  %v4216_v3 = vor.u32 %v6051_v1, %v4215_v0  ;;  %v6083_v4 = vld [vmem:[#allocation2 + $0x1ec] sm:$0xf0]  ;;  %vm3688_vm5 = vcmask 1040384   ;;  %vm3690_vm13 = vcmask 1042434  }
  0x19   :  { %v4471_v5 = vld [vmem:[#allocation2 + $0x2e0] sm:$0xf]  ;;  %v6115_v6 = vld [vmem:[#allocation2 + $0x2ec] sm:$0xf0]  ;;  %v4344_v7 = vor.u32 %v6083_v4, %v4343_v2  ;;  %vm3692_vm14 = vcmask 1041408   ;;  %s4089_s13 = sshll.u32 %s6974_s6, 4  ;;  %s4090_s13 = int_to_ptr.hbm [resolvable:$true] %s4089_s13 }
  0x1a   :  { %v4472_v8 = vor.u32 %v6115_v6, %v4471_v5  ;;  %v4599_v9 = vld [vmem:[#allocation2 + $0x3e0] sm:$0xf]  ;;  %v6147_v10 = vld [vmem:[#allocation2 + $0x3ec] sm:$0xf0]  ;;  %2840 = vmatpush.bf16.msra.mxu0 %v4216_v3 }
  0x1b   :  { %v4199_v11 = vld [vmem:[#allocation2 + $0xc0] sm:$0xf]  ;;  %v4600_v12 = vor.u32 %v6147_v10, %v4599_v9  ;;  %v6047_v13 = vld [vmem:[#allocation2 + $0xcc] sm:$0xf0]  ;;  %2853 = vmatpush.bf16.msra.mxu1 %v4344_v7 }
  0x1c   :  { %v4327_v14 = vld [vmem:[#allocation2 + $0x1c0] sm:$0xf]  ;;  %v6079_v15 = vld [vmem:[#allocation2 + $0x1cc] sm:$0xf0]  ;;  %2866 = vmatpush.bf16.msra.mxu2 %v4472_v8  ;;  %v4200_v16 = vor.u32 %v6047_v13, %v4199_v11 }
  0x1d   :  { %v4328_v17 = vor.u32 %v6079_v15, %v4327_v14  ;;  %v4455_v18 = vld [vmem:[#allocation2 + $0x2c0] sm:$0xf]  ;;  %v6111_v19 = vld [vmem:[#allocation2 + $0x2cc] sm:$0xf0]  ;;  %2879 = vmatpush.bf16.msra.mxu3 %v4600_v12 }
  0x1e   :  { %v4583_v20 = vld [vmem:[#allocation2 + $0x3c0] sm:$0xf]  ;;  %v4456_v21 = vor.u32 %v6111_v19, %v4455_v18  ;;  %v6143_v22 = vld [vmem:[#allocation2 + $0x3cc] sm:$0xf0]  ;;  %2841 = vmatpush.bf16.msra.mxu0 %v4200_v16 }
  0x1f   :  { %v4183_v23 = vld [vmem:[#allocation2 + $0xa0] sm:$0xf]  ;;  %v6043_v24 = vld [vmem:[#allocation2 + $0xac] sm:$0xf0]  ;;  %v4584_v25 = vor.u32 %v6143_v22, %v4583_v20  ;;  %2854 = vmatpush.bf16.msra.mxu1 %v4328_v17 }
  0x20   :  { %v4311_v26 = vld [vmem:[#allocation2 + $0x1a0] sm:$0xf]  ;;  %v6075_v27 = vld [vmem:[#allocation2 + $0x1ac] sm:$0xf0]  ;;  %v4184_v29 = vor.u32 %v6043_v24, %v4183_v23  ;;  %2867 = vmatpush.bf16.msra.mxu2 %v4456_v21 }
  0x21   :  { %v4439_v28 = vld [vmem:[#allocation2 + $0x2a0] sm:$0xf]  ;;  %v6107_v30 = vld [vmem:[#allocation2 + $0x2ac] sm:$0xf0]  ;;  %v4312_v33 = vor.u32 %v6075_v27, %v4311_v26  ;;  %2880 = vmatpush.bf16.msra.mxu3 %v4584_v25 }
  0x22   :  { %v4567_v31 = vld [vmem:[#allocation2 + $0x3a0] sm:$0xf]  ;;  %v6139_v32 = vld [vmem:[#allocation2 + $0x3ac] sm:$0xf0]  ;;  %v4440_v34 = vor.u32 %v6107_v30, %v4439_v28  ;;  %2842 = vmatpush.bf16.msra.mxu0 %v4184_v29 }
  0x23   :  { %v4167_v35 = vld [vmem:[#allocation2 + $0x80] sm:$0xf]  ;;  %v6039_v36 = vld [vmem:[#allocation2 + $0x8c] sm:$0xf0]  ;;  %v4568_v38 = vor.u32 %v6139_v32, %v4567_v31  ;;  %2855 = vmatpush.bf16.msra.mxu1 %v4312_v33 }
  0x24   :  { %v4295_v37 = vld [vmem:[#allocation2 + $0x180] sm:$0xf]  ;;  %v6071_v39 = vld [vmem:[#allocation2 + $0x18c] sm:$0xf0]  ;;  %v4168_v44 = vor.u32 %v6039_v36, %v4167_v35  ;;  %2868 = vmatpush.bf16.msra.mxu2 %v4440_v34 }
  0x25   :  { %v4423_v40 = vld [vmem:[#allocation2 + $0x280] sm:$0xf]  ;;  %v6103_v41 = vld [vmem:[#allocation2 + $0x28c] sm:$0xf0]  ;;  %v4296_v45 = vor.u32 %v6071_v39, %v4295_v37  ;;  %2881 = vmatpush.bf16.msra.mxu3 %v4568_v38 }
  0x26   :  { %v4551_v42 = vld [vmem:[#allocation2 + $0x380] sm:$0xf]  ;;  %v6135_v43 = vld [vmem:[#allocation2 + $0x38c] sm:$0xf0]  ;;  %v4424_v46 = vor.u32 %v6103_v41, %v4423_v40  ;;  %2843 = vmatpush.bf16.msra.mxu0 %v4168_v44 }
  0x27   :  { %v4151_v47 = vld [vmem:[#allocation2 + $0x60] sm:$0xf]  ;;  %v6035_v48 = vld [vmem:[#allocation2 + $0x6c] sm:$0xf0]  ;;  %v4552_v50 = vor.u32 %v6135_v43, %v4551_v42  ;;  %2856 = vmatpush.bf16.msra.mxu1 %v4296_v45 }
  0x28   :  { %v4279_v49 = vld [vmem:[#allocation2 + $0x160] sm:$0xf]  ;;  %v6067_v51 = vld [vmem:[#allocation2 + $0x16c] sm:$0xf0]  ;;  %v4152_v56 = vor.u32 %v6035_v48, %v4151_v47  ;;  %2869 = vmatpush.bf16.msra.mxu2 %v4424_v46 }
  0x29   :  { %v4407_v52 = vld [vmem:[#allocation2 + $0x260] sm:$0xf]  ;;  %v6099_v53 = vld [vmem:[#allocation2 + $0x26c] sm:$0xf0]  ;;  %v4280_v57 = vor.u32 %v6067_v51, %v4279_v49  ;;  %2882 = vmatpush.bf16.msra.mxu3 %v4552_v50 }
  0x2a   :  { %v4535_v54 = vld [vmem:[#allocation2 + $0x360] sm:$0xf]  ;;  %v6131_v55 = vld [vmem:[#allocation2 + $0x36c] sm:$0xf0]  ;;  %v4408_v58 = vor.u32 %v6099_v53, %v4407_v52  ;;  %2844 = vmatpush.bf16.msra.mxu0 %v4152_v56 }
  0x2b   :  { %v4135_v59 = vld [vmem:[#allocation2 + $0x40] sm:$0xf]  ;;  %v6031_v60 = vld [vmem:[#allocation2 + $0x4c] sm:$0xf0]  ;;  %v4536_v62 = vor.u32 %v6131_v55, %v4535_v54  ;;  %2857 = vmatpush.bf16.msra.mxu1 %v4280_v57 }
  0x2c   :  { %v4263_v61 = vld [vmem:[#allocation2 + $0x140] sm:$0xf]  ;;  %v6063_v63 = vld [vmem:[#allocation2 + $0x14c] sm:$0xf0]  ;;  %v4136_v4 = vor.u32 %v6031_v60, %v4135_v59  ;;  %2870 = vmatpush.bf16.msra.mxu2 %v4408_v58  ;;  %v97_v58 = vld [vmem:[%s6968_s0 + $0x8] sm:$0xff] }
  0x2d   :  { %v4391_v0 = vld [vmem:[#allocation2 + $0x240] sm:$0xf]  ;;  %v6095_v1 = vld [vmem:[#allocation2 + $0x24c] sm:$0xf0]  ;;  %v4264_v5 = vor.u32 %v6063_v63, %v4263_v61  ;;  %2883 = vmatpush.bf16.msra.mxu3 %v4536_v62  ;;  %v560_v63 = vunpack.c.l.b16 %v97_v58 }
  0x2e   :  { %v4519_v2 = vld [vmem:[#allocation2 + $0x340] sm:$0xf]  ;;  %v6127_v3 = vld [vmem:[#allocation2 + $0x34c] sm:$0xf0]  ;;  %v4392_v6 = vor.u32 %v6095_v1, %v4391_v0  ;;  %2845 = vmatpush.bf16.msra.mxu0 %v4136_v4  ;;  %v561_v0 = vunpack.c.h.b16 %v97_v58 }
  0x2f   :  { %v4119_v7 = vld [vmem:[#allocation2 + $0x20] sm:$0xf]  ;;  %v6027_v8 = vld [vmem:[#allocation2 + $0x2c] sm:$0xf0]  ;;  %v4520_v10 = vor.u32 %v6127_v3, %v4519_v2  ;;  %2858 = vmatpush.bf16.msra.mxu1 %v4264_v5  ;;  %v6739_v4 = vpack.c.b16 %v560_v63, %v560_v63 }
  0x30   :  { %v4247_v9 = vld [vmem:[#allocation2 + $0x120] sm:$0xf]  ;;  %v6059_v11 = vld [vmem:[#allocation2 + $0x12c] sm:$0xf0]  ;;  %v4120_v16 = vor.u32 %v6027_v8, %v4119_v7  ;;  %2871 = vmatpush.bf16.msra.mxu2 %v4392_v6  ;;  %v6744_v6 = vpack.c.b16 %v561_v0, %v561_v0 }
  0x31   :  { %v4375_v12 = vld [vmem:[#allocation2 + $0x220] sm:$0xf]  ;;  %v6091_v13 = vld [vmem:[#allocation2 + $0x22c] sm:$0xf0]  ;;  %v4248_v19 = vor.u32 %v6059_v11, %v4247_v9  ;;  %2884 = vmatpush.bf16.msra.mxu3 %v4520_v10 }
  0x32   :  { %v4503_v14 = vld [vmem:[#allocation2 + $0x320] sm:$0xf]  ;;  %v6123_v15 = vld [vmem:[#allocation2 + $0x32c] sm:$0xf0]  ;;  %v4376_v20 = vor.u32 %v6091_v13, %v4375_v12  ;;  %2846 = vmatpush.bf16.msra.mxu0 %v4120_v16 }
  0x33   :  { %v4103_v17 = vld [vmem:[#allocation2] sm:$0xf]  ;;  %v6023_v18 = vld [vmem:[#allocation2 + $0xc] sm:$0xf0]  ;;  %v4504_v24 = vor.u32 %v6123_v15, %v4503_v14  ;;  %2859 = vmatpush.bf16.msra.mxu1 %v4248_v19 }
  0x34   :  { %v4231_v21 = vld [vmem:[#allocation2 + $0x100] sm:$0xf]  ;;  %v6055_v22 = vld [vmem:[#allocation2 + $0x10c] sm:$0xf0]  ;;  %v4104_v31 = vor.u32 %v6023_v18, %v4103_v17  ;;  %2872 = vmatpush.bf16.msra.mxu2 %v4376_v20 }
  0x35   :  { %v4359_v23 = vld [vmem:[#allocation2 + $0x200] sm:$0xf]  ;;  %v6087_v25 = vld [vmem:[#allocation2 + $0x20c] sm:$0xf0]  ;;  %v4232_v35 = vor.u32 %v6055_v22, %v4231_v21  ;;  %2885 = vmatpush.bf16.msra.mxu3 %v4504_v24 }
  0x36   :  { %v4487_v26 = vld [vmem:[#allocation2 + $0x300] sm:$0xf]  ;;  %v6119_v27 = vld [vmem:[#allocation2 + $0x30c] sm:$0xf0]  ;;  %v4360_v36 = vor.u32 %v6087_v25, %v4359_v23  ;;  %2847 = vmatpush.bf16.msra.mxu0 %v4104_v31 }
  0x37   :  { %v4727_v28 = vld [vmem:[#allocation2 + $0x4e0] sm:$0xf]  ;;  %v6179_v29 = vld [vmem:[#allocation2 + $0x4ec] sm:$0xf0]  ;;  %v4488_v39 = vor.u32 %v6119_v27, %v4487_v26  ;;  %2860 = vmatpush.bf16.msra.mxu1 %v4232_v35 }
  0x38   :  { %v4855_v30 = vld [vmem:[#allocation2 + $0x5e0] sm:$0xf]  ;;  %v6211_v32 = vld [vmem:[#allocation2 + $0x5ec] sm:$0xf0]  ;;  %v4728_v40 = vor.u32 %v6179_v29, %v4727_v28  ;;  %2873 = vmatpush.bf16.msra.mxu2 %v4360_v36 }
  0x39   :  { %v4983_v33 = vld [vmem:[#allocation2 + $0x6e0] sm:$0xf]  ;;  %v6243_v34 = vld [vmem:[#allocation2 + $0x6ec] sm:$0xf0]  ;;  %v4856_v41 = vor.u32 %v6211_v32, %v4855_v30  ;;  %2886 = vmatpush.bf16.msra.mxu3 %v4488_v39 }
  0x3a   :  { %v5111_v37 = vld [vmem:[#allocation2 + $0x7e0] sm:$0xf]  ;;  %v6275_v38 = vld [vmem:[#allocation2 + $0x7ec] sm:$0xf0]  ;;  %v4984_v42 = vor.u32 %v6243_v34, %v4983_v33  ;;  %2892 = vmatpush.bf16.msrb.mxu0 %v4728_v40 }
  0x3b   :  { %v4711_v43 = vld [vmem:[#allocation2 + $0x4c0] sm:$0xf]  ;;  %v6175_v44 = vld [vmem:[#allocation2 + $0x4cc] sm:$0xf0]  ;;  %v5112_v46 = vor.u32 %v6275_v38, %v5111_v37  ;;  %2905 = vmatpush.bf16.msrb.mxu1 %v4856_v41  ;;  %2874 = vmatmul.bf16.vlgmr.msra.gmra.mxu2 %v6739_v4 }
  0x3c   :  { %v4839_v45 = vld [vmem:[#allocation2 + $0x5c0] sm:$0xf]  ;;  %v6207_v47 = vld [vmem:[#allocation2 + $0x5cc] sm:$0xf0]  ;;  %v4712_v52 = vor.u32 %v6175_v44, %v4711_v43  ;;  %2918 = vmatpush.bf16.msrb.mxu2 %v4984_v42  ;;  %2887 = vmatmul.bf16.vlgmr.msra.gmra.mxu3 %v6744_v6 }
  0x3d   :  { %v4967_v48 = vld [vmem:[#allocation2 + $0x6c0] sm:$0xf]  ;;  %v6239_v49 = vld [vmem:[#allocation2 + $0x6cc] sm:$0xf0]  ;;  %v4840_v54 = vor.u32 %v6207_v47, %v4839_v45  ;;  %2931 = vmatpush.bf16.msrb.mxu3 %v5112_v46 }
  0x3e   :  { %v5095_v50 = vld [vmem:[#allocation2 + $0x7c0] sm:$0xf]  ;;  %v6271_v51 = vld [vmem:[#allocation2 + $0x7cc] sm:$0xf0]  ;;  %v4968_v55 = vor.u32 %v6239_v49, %v4967_v48  ;;  %2893 = vmatpush.bf16.msrb.mxu0 %v4712_v52 }
  0x3f   :  { %v4695_v53 = vld [vmem:[#allocation2 + $0x4a0] sm:$0xf]  ;;  %v6171_v56 = vld [vmem:[#allocation2 + $0x4ac] sm:$0xf0]  ;;  %v5096_v59 = vor.u32 %v6271_v51, %v5095_v50  ;;  %2906 = vmatpush.bf16.msrb.mxu1 %v4840_v54 }
  0x40   :  { %v4823_v57 = vld [vmem:[#allocation2 + $0x5a0] sm:$0xf]  ;;  %v6203_v60 = vld [vmem:[#allocation2 + $0x5ac] sm:$0xf0]  ;;  %v4696_v3 = vor.u32 %v6171_v56, %v4695_v53  ;;  %2919 = vmatpush.bf16.msrb.mxu2 %v4968_v55 }
  0x41   :  { %v4951_v61 = vld [vmem:[#allocation2 + $0x6a0] sm:$0xf]  ;;  %v6235_v62 = vld [vmem:[#allocation2 + $0x6ac] sm:$0xf0]  ;;  %v4824_v7 = vor.u32 %v6203_v60, %v4823_v57  ;;  %2932 = vmatpush.bf16.msrb.mxu3 %v5096_v59 }
  0x42   :  { %v5079_v1 = vld [vmem:[#allocation2 + $0x7a0] sm:$0xf]  ;;  %v6267_v2 = vld [vmem:[#allocation2 + $0x7ac] sm:$0xf0]  ;;  %v4952_v8 = vor.u32 %v6235_v62, %v4951_v61  ;;  %2894 = vmatpush.bf16.msrb.mxu0 %v4696_v3  ;;  %v99_v3 = vld [vmem:[%s6968_s0 + $0x18] sm:$0xff] }
  0x43   :  { %v96_v5 = vld [vmem:[%s6968_s0] sm:$0xff]  ;;  %v6167_v10 = vld [vmem:[#allocation2 + $0x48c] sm:$0xf0]  ;;  %v5080_v14 = vor.u32 %v6267_v2, %v5079_v1  ;;  %2907 = vmatpush.bf16.msrb.mxu1 %v4824_v7 }
  0x44   :  { %v4679_v9 = vld [vmem:[#allocation2 + $0x480] sm:$0xf]  ;;  %v558_v12 = vunpack.c.l.b16 %v96_v5  ;;  %v559_v13 = vunpack.c.h.b16 %v96_v5  ;;  %v6199_v15 = vld [vmem:[#allocation2 + $0x58c] sm:$0xf0]  ;;  %2920 = vmatpush.bf16.msrb.mxu2 %v4952_v8 }
  0x45   :  { %v4807_v11 = vld [vmem:[#allocation2 + $0x580] sm:$0xf]  ;;  %v6231_v17 = vld [vmem:[#allocation2 + $0x68c] sm:$0xf0]  ;;  %v4680_v22 = vor.u32 %v6167_v10, %v4679_v9  ;;  %2933 = vmatpush.bf16.msrb.mxu3 %v5080_v14 }
  0x46   :  { %v4935_v16 = vld [vmem:[#allocation2 + $0x680] sm:$0xf]  ;;  %v6263_v19 = vld [vmem:[#allocation2 + $0x78c] sm:$0xf0]  ;;  %v6747_v20 = vpack.c.b16 %v558_v12, %v558_v12  ;;  %v6750_v21 = vpack.c.b16 %v559_v13, %v559_v13  ;;  %v4808_v23 = vor.u32 %v6199_v15, %v4807_v11 }
  0x47   :  { %v5063_v18 = vld [vmem:[#allocation2 + $0x780] sm:$0xf]  ;;  %v4936_v24 = vor.u32 %v6231_v17, %v4935_v16  ;;  %v6163_v26 = vld [vmem:[#allocation2 + $0x46c] sm:$0xf0]  ;;  %2895 = vmatpush.bf16.msrb.mxu0 %v4680_v22  ;;  %v564_v17 = vunpack.c.l.b16 %v99_v3 }
  0x48   :  { %v4663_v25 = vld [vmem:[#allocation2 + $0x460] sm:$0xf]  ;;  %v5064_v28 = vor.u32 %v6263_v19, %v5063_v18  ;;  %v6195_v29 = vld [vmem:[#allocation2 + $0x56c] sm:$0xf0]  ;;  %2848 = vmatmul.bf16.vlgmr.msra.gmra.mxu0 %v6747_v20  ;;  %2861 = vmatmul.bf16.vlgmr.msra.gmra.mxu1 %v6750_v21 }
  0x49   :  { %v4791_v27 = vld [vmem:[#allocation2 + $0x560] sm:$0xf]  ;;  %v6227_v31 = vld [vmem:[#allocation2 + $0x66c] sm:$0xf0]  ;;  %v4664_v34 = vor.u32 %v6163_v26, %v4663_v25  ;;  %2908 = vmatpush.bf16.msrb.mxu1 %v4808_v23  ;;  %2921 = vmatpush.bf16.msrb.mxu2 %v4936_v24  ;;  %v565_v25 = vunpack.c.h.b16 %v99_v3 }
  0x4a   :  { %v4919_v30 = vld [vmem:[#allocation2 + $0x660] sm:$0xf]  ;;  %v6259_v33 = vld [vmem:[#allocation2 + $0x76c] sm:$0xf0]  ;;  %v4792_v35 = vor.u32 %v6195_v29, %v4791_v27  ;;  %2934 = vmatpush.bf16.msrb.mxu3 %v5064_v28 }
  0x4b   :  { %v5047_v32 = vld [vmem:[#allocation2 + $0x760] sm:$0xf]  ;;  %v4920_v36 = vor.u32 %v6227_v31, %v4919_v30  ;;  %v6159_v38 = vld [vmem:[#allocation2 + $0x44c] sm:$0xf0]  ;;  %2896 = vmatpush.bf16.msrb.mxu0 %v4664_v34 }
  0x4c   :  { %v4647_v37 = vld [vmem:[#allocation2 + $0x440] sm:$0xf]  ;;  %v5048_v40 = vor.u32 %v6259_v33, %v5047_v32  ;;  %v6191_v41 = vld [vmem:[#allocation2 + $0x54c] sm:$0xf0] }
  0x4d   :  { %v4775_v39 = vld [vmem:[#allocation2 + $0x540] sm:$0xf]  ;;  %v6223_v43 = vld [vmem:[#allocation2 + $0x64c] sm:$0xf0]  ;;  %v4648_v46 = vor.u32 %v6159_v38, %v4647_v37  ;;  %2909 = vmatpush.bf16.msrb.mxu1 %v4792_v35  ;;  %2922 = vmatpush.bf16.msrb.mxu2 %v4920_v36  ;;  %v6760_v38 = vpack.c.b16 %v564_v17, %v564_v17 }
  0x4e   :  { %v4903_v42 = vld [vmem:[#allocation2 + $0x640] sm:$0xf]  ;;  %v6255_v45 = vld [vmem:[#allocation2 + $0x74c] sm:$0xf0]  ;;  %v4776_v47 = vor.u32 %v6191_v41, %v4775_v39  ;;  %2935 = vmatpush.bf16.msrb.mxu3 %v5048_v40 }
  0x4f   :  { %v5031_v44 = vld [vmem:[#allocation2 + $0x740] sm:$0xf]  ;;  %v4904_v48 = vor.u32 %v6223_v43, %v4903_v42  ;;  %v6155_v50 = vld [vmem:[#allocation2 + $0x42c] sm:$0xf0]  ;;  %2897 = vmatpush.bf16.msrb.mxu0 %v4648_v46  ;;  %v6764_v42 = vpack.c.b16 %v565_v25, %v565_v25 }
  0x50   :  { %v4631_v49 = vld [vmem:[#allocation2 + $0x420] sm:$0xf]  ;;  %v5032_v52 = vor.u32 %v6255_v45, %v5031_v44  ;;  %v6187_v53 = vld [vmem:[#allocation2 + $0x52c] sm:$0xf0] }
  0x51   :  { %v4759_v51 = vld [vmem:[#allocation2 + $0x520] sm:$0xf]  ;;  %v6219_v55 = vld [vmem:[#allocation2 + $0x62c] sm:$0xf0]  ;;  %v4632_v59 = vor.u32 %v6155_v50, %v4631_v49  ;;  %2910 = vmatpush.bf16.msrb.mxu1 %v4776_v47  ;;  %2923 = vmatpush.bf16.msrb.mxu2 %v4904_v48 }
  0x52   :  { %v4887_v54 = vld [vmem:[#allocation2 + $0x620] sm:$0xf]  ;;  %v6251_v57 = vld [vmem:[#allocation2 + $0x72c] sm:$0xf0]  ;;  %v4760_v63 = vor.u32 %v6187_v53, %v4759_v51  ;;  %2936 = vmatpush.bf16.msrb.mxu3 %v5032_v52 }
  0x53   :  { %v5015_v56 = vld [vmem:[#allocation2 + $0x720] sm:$0xf]  ;;  %v6151_v60 = vld [vmem:[#allocation2 + $0x40c] sm:$0xf0]  ;;  %v4888_v0 = vor.u32 %v6219_v55, %v4887_v54  ;;  %2898 = vmatpush.bf16.msrb.mxu0 %v4632_v59 }
  0x54   :  { %v4615_v58 = vld [vmem:[#allocation2 + $0x400] sm:$0xf]  ;;  %v6183_v62 = vld [vmem:[#allocation2 + $0x50c] sm:$0xf0]  ;;  %v5016_v5 = vor.u32 %v6251_v57, %v5015_v56 }
  0x55   :  { %v4743_v61 = vld [vmem:[#allocation2 + $0x500] sm:$0xf]  ;;  %v6215_v2 = vld [vmem:[#allocation2 + $0x60c] sm:$0xf0]  ;;  %v4616_v13 = vor.u32 %v6151_v60, %v4615_v58  ;;  %2911 = vmatpush.bf16.msrb.mxu1 %v4760_v63  ;;  %2924 = vmatpush.bf16.msrb.mxu2 %v4888_v0 }
  0x56   :  { %v4871_v1 = vld [vmem:[#allocation2 + $0x600] sm:$0xf]  ;;  %v6247_v8 = vld [vmem:[#allocation2 + $0x70c] sm:$0xf0]  ;;  %v4744_v18 = vor.u32 %v6183_v62, %v4743_v61  ;;  %2937 = vmatpush.bf16.msrb.mxu3 %v5016_v5 }
  0x57   :  { %v4999_v7 = vld [vmem:[#allocation2 + $0x700] sm:$0xf]  ;;  %v98_v9 = vld [vmem:[%s6968_s0 + $0x10] sm:$0xff]  ;;  %v4872_v19 = vor.u32 %v6215_v2, %v4871_v1  ;;  %2899 = vmatpush.bf16.msrb.mxu0 %v4616_v13 }
  0x58   :  { %v5239_v10 = vld [vmem:[#allocation2 + $0x8e0] sm:$0xf]  ;;  %v6307_v11 = vld [vmem:[#allocation2 + $0x8ec] sm:$0xf0]  ;;  %v562_v24 = vunpack.c.l.b16 %v98_v9  ;;  %v5000_v26 = vor.u32 %v6247_v8, %v4999_v7  ;;  %v563_v28 = vunpack.c.h.b16 %v98_v9 }
  0x59   :  { %v5367_v12 = vld [vmem:[#allocation2 + $0x9e0] sm:$0xf]  ;;  %v6339_v14 = vld [vmem:[#allocation2 + $0x9ec] sm:$0xf0]  ;;  %v5240_v27 = vor.u32 %v6307_v11, %v5239_v10  ;;  %2912 = vmatpush.bf16.msrb.mxu1 %v4744_v18  ;;  %2925 = vmatpush.bf16.msrb.mxu2 %v4872_v19 }
  0x5a   :  { %v5495_v15 = vld [vmem:[#allocation2 + $0xae0] sm:$0xf]  ;;  %v6371_v16 = vld [vmem:[#allocation2 + $0xaec] sm:$0xf0]  ;;  %v5368_v29 = vor.u32 %v6339_v14, %v5367_v12  ;;  %v6762_v41 = vpack.c.b16 %v562_v24, %v562_v24  ;;  %2938 = vmatpush.bf16.msrb.mxu3 %v5000_v26  ;;  %v6766_v44 = vpack.c.b16 %v563_v28, %v563_v28 }
  0x5b   :  { %v5623_v22 = vld [vmem:[#allocation2 + $0xbe0] sm:$0xf]  ;;  %v6403_v23 = vld [vmem:[#allocation2 + $0xbec] sm:$0xf0]  ;;  %v5496_v30 = vor.u32 %v6371_v16, %v5495_v15  ;;  %2944 = vmatpush.bf16.msra.mxu0 %v5240_v27 }
  0x5c   :  { %v5223_v31 = vld [vmem:[#allocation2 + $0x8c0] sm:$0xf]  ;;  %v6303_v32 = vld [vmem:[#allocation2 + $0x8cc] sm:$0xf0]  ;;  %v5624_v34 = vor.u32 %v6403_v23, %v5623_v22  ;;  %2926 = vmatmul.bf16.vlgmr.msrb.gmra.mxu2 %v6760_v38  ;;  %2900 = vmatmul.bf16.vlgmr.msrb.gmra.mxu0 %v6762_v41 }
  0x5d   :  { %v5351_v33 = vld [vmem:[#allocation2 + $0x9c0] sm:$0xf]  ;;  %v6335_v35 = vld [vmem:[#allocation2 + $0x9cc] sm:$0xf0]  ;;  %v5224_v43 = vor.u32 %v6303_v32, %v5223_v31  ;;  %2957 = vmatpush.bf16.msra.mxu1 %v5368_v29  ;;  %2970 = vmatpush.bf16.msra.mxu2 %v5496_v30 }
  0x5e   :  { %v5479_v36 = vld [vmem:[#allocation2 + $0xac0] sm:$0xf]  ;;  %v6367_v37 = vld [vmem:[#allocation2 + $0xacc] sm:$0xf0]  ;;  %v5352_v45 = vor.u32 %v6335_v35, %v5351_v33  ;;  %2983 = vmatpush.bf16.msra.mxu3 %v5624_v34  ;;  %2913 = vmatmul.bf16.vlgmr.msrb.gmra.mxu1 %v6766_v44 }
  0x5f   :  { %v5607_v39 = vld [vmem:[#allocation2 + $0xbc0] sm:$0xf]  ;;  %v6399_v40 = vld [vmem:[#allocation2 + $0xbcc] sm:$0xf0]  ;;  %v5480_v46 = vor.u32 %v6367_v37, %v5479_v36  ;;  %2939 = vmatmul.bf16.vlgmr.msrb.gmra.mxu3 %v6764_v42  ;;  %2945 = vmatpush.bf16.msra.mxu0 %v5224_v43 }
  0x60   :  { %v5207_v47 = vld [vmem:[#allocation2 + $0x8a0] sm:$0xf]  ;;  %v6299_v48 = vld [vmem:[#allocation2 + $0x8ac] sm:$0xf0]  ;;  %v5608_v50 = vor.u32 %v6399_v40, %v5607_v39 }
  0x61   :  { %v5335_v49 = vld [vmem:[#allocation2 + $0x9a0] sm:$0xf]  ;;  %v6331_v51 = vld [vmem:[#allocation2 + $0x9ac] sm:$0xf0]  ;;  %v5208_v56 = vor.u32 %v6299_v48, %v5207_v47  ;;  %2958 = vmatpush.bf16.msra.mxu1 %v5352_v45  ;;  %2971 = vmatpush.bf16.msra.mxu2 %v5480_v46 }
  0x62   :  { %v5463_v52 = vld [vmem:[#allocation2 + $0xaa0] sm:$0xf]  ;;  %v6363_v53 = vld [vmem:[#allocation2 + $0xaac] sm:$0xf0]  ;;  %v5336_v57 = vor.u32 %v6331_v51, %v5335_v49  ;;  %2984 = vmatpush.bf16.msra.mxu3 %v5608_v50 }
  0x63   :  { %v5591_v54 = vld [vmem:[#allocation2 + $0xba0] sm:$0xf]  ;;  %v6395_v55 = vld [vmem:[#allocation2 + $0xbac] sm:$0xf0]  ;;  %v5464_v58 = vor.u32 %v6363_v53, %v5463_v52  ;;  %2946 = vmatpush.bf16.msra.mxu0 %v5208_v56 }
  0x64   :  { %v5191_v59 = vld [vmem:[#allocation2 + $0x880] sm:$0xf]  ;;  %v6295_v60 = vld [vmem:[#allocation2 + $0x88c] sm:$0xf0]  ;;  %v5592_v62 = vor.u32 %v6395_v55, %v5591_v54 }
  0x65   :  { %v5319_v61 = vld [vmem:[#allocation2 + $0x980] sm:$0xf]  ;;  %v6327_v63 = vld [vmem:[#allocation2 + $0x98c] sm:$0xf0]  ;;  %v5192_v5 = vor.u32 %v6295_v60, %v5191_v59  ;;  %2959 = vmatpush.bf16.msra.mxu1 %v5336_v57  ;;  %2972 = vmatpush.bf16.msra.mxu2 %v5464_v58 }
  0x66   :  { %v5447_v0 = vld [vmem:[#allocation2 + $0xa80] sm:$0xf]  ;;  %v6359_v1 = vld [vmem:[#allocation2 + $0xa8c] sm:$0xf0]  ;;  %v5320_v7 = vor.u32 %v6327_v63, %v5319_v61  ;;  %2985 = vmatpush.bf16.msra.mxu3 %v5592_v62  ;;  %v101_v61 = vld [vmem:[%s6968_s0 + $0x28] sm:$0xff] }
  0x67   :  { %v5575_v2 = vld [vmem:[#allocation2 + $0xb80] sm:$0xf]  ;;  %v6391_v3 = vld [vmem:[#allocation2 + $0xb8c] sm:$0xf0]  ;;  %v5448_v8 = vor.u32 %v6359_v1, %v5447_v0  ;;  %2947 = vmatpush.bf16.msra.mxu0 %v5192_v5  ;;  %v4217_v5 = vld [vmem:[#allocation2 + $0xf0] sm:$0xf0] }
  0x68   :  { %v5175_v9 = vld [vmem:[#allocation2 + $0x860] sm:$0xf]  ;;  %v6291_v10 = vld [vmem:[#allocation2 + $0x86c] sm:$0xf0]  ;;  %v5576_v12 = vor.u32 %v6391_v3, %v5575_v2  ;;  %v6049_v3 = vld [vmem:[#allocation2 + $0xe4] sm:$0xf] }
  0x69   :  { %v5303_v11 = vld [vmem:[#allocation2 + $0x960] sm:$0xf]  ;;  %v6323_v13 = vld [vmem:[#allocation2 + $0x96c] sm:$0xf0]  ;;  %v5176_v18 = vor.u32 %v6291_v10, %v5175_v9  ;;  %2960 = vmatpush.bf16.msra.mxu1 %v5320_v7  ;;  %2973 = vmatpush.bf16.msra.mxu2 %v5448_v8  ;;  %v6081_v10 = vld [vmem:[#allocation2 + $0x1e4] sm:$0xf] }
  0x6a   :  { %v5431_v14 = vld [vmem:[#allocation2 + $0xa60] sm:$0xf]  ;;  %v6355_v15 = vld [vmem:[#allocation2 + $0xa6c] sm:$0xf0]  ;;  %v5304_v19 = vor.u32 %v6323_v13, %v5303_v11  ;;  %2986 = vmatpush.bf16.msra.mxu3 %v5576_v12  ;;  %v4345_v11 = vld [vmem:[#allocation2 + $0x1f0] sm:$0xf0]  ;;  %v568_v12 = vunpack.c.l.b16 %v101_v61 }
  0x6b   :  { %v5559_v16 = vld [vmem:[#allocation2 + $0xb60] sm:$0xf]  ;;  %v6387_v17 = vld [vmem:[#allocation2 + $0xb6c] sm:$0xf0]  ;;  %v5432_v22 = vor.u32 %v6355_v15, %v5431_v14  ;;  %2948 = vmatpush.bf16.msra.mxu0 %v5176_v18  ;;  %v4220_v18 = vor.u32 %v6049_v3, %v4217_v5 }
  0x6c   :  { %v5159_v23 = vld [vmem:[#allocation2 + $0x840] sm:$0xf]  ;;  %v6287_v24 = vld [vmem:[#allocation2 + $0x84c] sm:$0xf0]  ;;  %v5560_v26 = vor.u32 %v6387_v17, %v5559_v16  ;;  %v569_v16 = vunpack.c.h.b16 %v101_v61  ;;  %v4297_v61 = vld [vmem:[#allocation2 + $0x190] sm:$0xf0] }
  0x6d   :  { %v5287_v25 = vld [vmem:[#allocation2 + $0x940] sm:$0xf]  ;;  %v6319_v27 = vld [vmem:[#allocation2 + $0x94c] sm:$0xf0]  ;;  %v5160_v32 = vor.u32 %v6287_v24, %v5159_v23  ;;  %2961 = vmatpush.bf16.msra.mxu1 %v5304_v19  ;;  %2974 = vmatpush.bf16.msra.mxu2 %v5432_v22  ;;  %v4348_v24 = vor.u32 %v6081_v10, %v4345_v11  ;;  %v6065_v10 = vld [vmem:[#allocation2 + $0x164] sm:$0xf] }
  0x6e   :  { %v5415_v28 = vld [vmem:[#allocation2 + $0xa40] sm:$0xf]  ;;  %v6351_v29 = vld [vmem:[#allocation2 + $0xa4c] sm:$0xf0]  ;;  %v5288_v34 = vor.u32 %v6319_v27, %v5287_v25  ;;  %2987 = vmatpush.bf16.msra.mxu3 %v5560_v26  ;;  %v6045_v27 = vld [vmem:[#allocation2 + $0xc4] sm:$0xf] }
  0x6f   :  { %v5543_v30 = vld [vmem:[#allocation2 + $0xb40] sm:$0xf]  ;;  %v6383_v31 = vld [vmem:[#allocation2 + $0xb4c] sm:$0xf0]  ;;  %v5416_v35 = vor.u32 %v6351_v29, %v5415_v28  ;;  %2949 = vmatpush.bf16.msra.mxu0 %v5160_v32  ;;  %v4201_v28 = vld [vmem:[#allocation2 + $0xd0] sm:$0xf0]  ;;  %v6780_v29 = vpack.c.b16 %v568_v12, %v568_v12 }
  0x70   :  { %v5143_v33 = vld [vmem:[#allocation2 + $0x820] sm:$0xf]  ;;  %v6283_v36 = vld [vmem:[#allocation2 + $0x82c] sm:$0xf0]  ;;  %v5544_v40 = vor.u32 %v6383_v31, %v5543_v30  ;;  %v6077_v31 = vld [vmem:[#allocation2 + $0x1c4] sm:$0xf] }
  0x71   :  { %v5271_v37 = vld [vmem:[#allocation2 + $0x920] sm:$0xf]  ;;  %v6315_v39 = vld [vmem:[#allocation2 + $0x92c] sm:$0xf0]  ;;  %v5144_v49 = vor.u32 %v6283_v36, %v5143_v33  ;;  %2962 = vmatpush.bf16.msra.mxu1 %v5288_v34  ;;  %2975 = vmatpush.bf16.msra.mxu2 %v5416_v35  ;;  %v4329_v32 = vld [vmem:[#allocation2 + $0x1d0] sm:$0xf0]  ;;  %v6784_v33 = vpack.c.b16 %v569_v16, %v569_v16  ;;  %v4204_v36 = vor.u32 %v6045_v27, %v4201_v28 }
  0x72   :  { %v5399_v43 = vld [vmem:[#allocation2 + $0xa20] sm:$0xf]  ;;  %v6347_v45 = vld [vmem:[#allocation2 + $0xa2c] sm:$0xf0]  ;;  %v5272_v53 = vor.u32 %v6315_v39, %v5271_v37  ;;  %2988 = vmatpush.bf16.msra.mxu3 %v5544_v40  ;;  %v4281_v11 = vld [vmem:[#allocation2 + $0x170] sm:$0xf0] }
  0x73   :  { %v5527_v46 = vld [vmem:[#allocation2 + $0xb20] sm:$0xf]  ;;  %v6379_v47 = vld [vmem:[#allocation2 + $0xb2c] sm:$0xf0]  ;;  %v5400_v54 = vor.u32 %v6347_v45, %v5399_v43  ;;  %2950 = vmatpush.bf16.msra.mxu0 %v5144_v49  ;;  %v4332_v43 = vor.u32 %v6077_v31, %v4329_v32  ;;  %v4313_v49 = vld [vmem:[#allocation2 + $0x1b0] sm:$0xf0] }
  0x74   :  { %v5127_v48 = vld [vmem:[#allocation2 + $0x800] sm:$0xf]  ;;  %v6279_v50 = vld [vmem:[#allocation2 + $0x80c] sm:$0xf0]  ;;  %v5528_v58 = vor.u32 %v6379_v47, %v5527_v46  ;;  %v6041_v46 = vld [vmem:[#allocation2 + $0xa4] sm:$0xf] }
  0x75   :  { %v5255_v51 = vld [vmem:[#allocation2 + $0x900] sm:$0xf]  ;;  %v6311_v52 = vld [vmem:[#allocation2 + $0x90c] sm:$0xf0]  ;;  %v5128_v1 = vor.u32 %v6279_v50, %v5127_v48  ;;  %2963 = vmatpush.bf16.msra.mxu1 %v5272_v53  ;;  %2976 = vmatpush.bf16.msra.mxu2 %v5400_v54  ;;  %v4185_v47 = vld [vmem:[#allocation2 + $0xb0] sm:$0xf0] }
  0x76   :  { %v5383_v55 = vld [vmem:[#allocation2 + $0xa00] sm:$0xf]  ;;  %v6343_v56 = vld [vmem:[#allocation2 + $0xa0c] sm:$0xf0]  ;;  %v5256_v8 = vor.u32 %v6311_v52, %v5255_v51  ;;  %2989 = vmatpush.bf16.msra.mxu3 %v5528_v58  ;;  %v6073_v48 = vld [vmem:[#allocation2 + $0x1a4] sm:$0xf]  ;;  %v4188_v52 = vor.u32 %v6041_v46, %v4185_v47 }
  0x77   :  { %v100_v57 = vld [vmem:[%s6968_s0 + $0x20] sm:$0xff]  ;;  %v6375_v60 = vld [vmem:[#allocation2 + $0xb0c] sm:$0xf0]  ;;  %v5384_v9 = vor.u32 %v6343_v56, %v5383_v55  ;;  %2951 = vmatpush.bf16.msra.mxu0 %v5128_v1  ;;  %v4316_v56 = vor.u32 %v6073_v48, %v4313_v49 }
  0x78   :  { %v5511_v59 = vld [vmem:[#allocation2 + $0xb00] sm:$0xf]  ;;  %v6435_v63 = vld [vmem:[#allocation2 + $0xcec] sm:$0xf0]  ;;  %v566_v7 = vunpack.c.l.b16 %v100_v57  ;;  %v567_v13 = vunpack.c.h.b16 %v100_v57  ;;  %v6037_v58 = vld [vmem:[#allocation2 + $0x84] sm:$0xf] }
  0x79   :  { %v5751_v62 = vld [vmem:[#allocation2 + $0xce0] sm:$0xf]  ;;  %v6467_v2 = vld [vmem:[#allocation2 + $0xdec] sm:$0xf0]  ;;  %v5512_v14 = vor.u32 %v6375_v60, %v5511_v59  ;;  %2964 = vmatpush.bf16.msra.mxu1 %v5256_v8  ;;  %2977 = vmatpush.bf16.msra.mxu2 %v5384_v9  ;;  %v4169_v59 = vld [vmem:[#allocation2 + $0x90] sm:$0xf0] }
  0x7a   :  { %v5879_v0 = vld [vmem:[#allocation2 + $0xde0] sm:$0xf]  ;;  %v5752_v15 = vor.u32 %v6435_v63, %v5751_v62  ;;  %v6431_v22 = vld [vmem:[#allocation2 + $0xccc] sm:$0xf0]  ;;  %v6778_v25 = vpack.c.b16 %v566_v7, %v566_v7  ;;  %v6782_v30 = vpack.c.b16 %v567_v13, %v567_v13  ;;  %v6069_v60 = vld [vmem:[#allocation2 + $0x184] sm:$0xf] }
  0x7b   :  { %v5880_v17 = vor.u32 %v6467_v2, %v5879_v0  ;;  %v5735_v19 = vld [vmem:[#allocation2 + $0xcc0] sm:$0xf]  ;;  %v6463_v26 = vld [vmem:[#allocation2 + $0xdcc] sm:$0xf0]  ;;  %2990 = vmatpush.bf16.msra.mxu3 %v5512_v14  ;;  %v4172_v0 = vor.u32 %v6037_v58, %v4169_v59  ;;  %v4300_v5 = vor.u32 %v6069_v60, %v4297_v61  ;;  %v6033_v8 = vld [vmem:[#allocation2 + $0x64] sm:$0xf] }
  0x7c   :  { %v5863_v23 = vld [vmem:[#allocation2 + $0xdc0] sm:$0xf]  ;;  %2996 = vmatpush.bf16.msrb.mxu0 %v5752_v15  ;;  %v5736_v34 = vor.u32 %v6431_v22, %v5735_v19  ;;  %v6427_v39 = vld [vmem:[#allocation2 + $0xcac] sm:$0xf0]  ;;  %2978 = vmatmul.bf16.vlgmr.msra.gmra.mxu2 %v6780_v29  ;;  %v4153_v9 = vld [vmem:[#allocation2 + $0x70] sm:$0xf0] }
  0x7d   :  { %3009 = vmatpush.bf16.msrb.mxu1 %v5880_v17  ;;  %3022 = vmatpush.bf16.msrb.mxu2 %v4220_v18  ;;  %v5864_v35 = vor.u32 %v6463_v26, %v5863_v23  ;;  %v5719_v37 = vld [vmem:[#allocation2 + $0xca0] sm:$0xf]  ;;  %v6459_v45 = vld [vmem:[#allocation2 + $0xdac] sm:$0xf0]  ;;  %v4156_v14 = vor.u32 %v6033_v8, %v4153_v9  ;;  %v4284_v18 = vor.u32 %v6065_v10, %v4281_v11  ;;  %v6029_v22 = vld [vmem:[#allocation2 + $0x44] sm:$0xf] }
  0x7e   :  { %v5847_v40 = vld [vmem:[#allocation2 + $0xda0] sm:$0xf]  ;;  %2952 = vmatmul.bf16.vlgmr.msra.gmra.mxu0 %v6778_v25  ;;  %2965 = vmatmul.bf16.vlgmr.msra.gmra.mxu1 %v6782_v30  ;;  %v5720_v50 = vor.u32 %v6427_v39, %v5719_v37  ;;  %v6423_v54 = vld [vmem:[#allocation2 + $0xc8c] sm:$0xf0]  ;;  %v4137_v23 = vld [vmem:[#allocation2 + $0x50] sm:$0xf0] }
  0x7f   :  { %3035 = vmatpush.bf16.msrb.mxu3 %v4348_v24  ;;  %v5848_v51 = vor.u32 %v6459_v45, %v5847_v40  ;;  %v5703_v53 = vld [vmem:[#allocation2 + $0xc80] sm:$0xf]  ;;  %v6455_v57 = vld [vmem:[#allocation2 + $0xd8c] sm:$0xf0]  ;;  %v6061_v24 = vld [vmem:[#allocation2 + $0x144] sm:$0xf]  ;;  %v4140_v31 = vor.u32 %v6029_v22, %v4137_v23 }
  0x80   :  { %2991 = vmatmul.bf16.vlgmr.msra.gmra.mxu3 %v6784_v33  ;;  %2997 = vmatpush.bf16.msrb.mxu0 %v5736_v34  ;;  %v5831_v55 = vld [vmem:[#allocation2 + $0xd80] sm:$0xf]  ;;  %v5704_v62 = vor.u32 %v6423_v54, %v5703_v53  ;;  %v6419_v2 = vld [vmem:[#allocation2 + $0xc6c] sm:$0xf0]  ;;  %v4265_v26 = vld [vmem:[#allocation2 + $0x150] sm:$0xf0] }
  0x81   :  { %3010 = vmatpush.bf16.msrb.mxu1 %v5864_v35  ;;  %3023 = vmatpush.bf16.msrb.mxu2 %v4204_v36  ;;  %v5832_v63 = vor.u32 %v6455_v57, %v5831_v55  ;;  %v5687_v1 = vld [vmem:[#allocation2 + $0xc60] sm:$0xf]  ;;  %v6451_v7 = vld [vmem:[#allocation2 + $0xd6c] sm:$0xf0]  ;;  %v4268_v36 = vor.u32 %v6061_v24, %v4265_v26  ;;  %v6025_v39 = vld [vmem:[#allocation2 + $0x24] sm:$0xf] }
  0x82   :  { %v5815_v3 = vld [vmem:[#allocation2 + $0xd60] sm:$0xf]  ;;  %v5688_v12 = vor.u32 %v6419_v2, %v5687_v1  ;;  %v6415_v16 = vld [vmem:[#allocation2 + $0xc4c] sm:$0xf0]  ;;  %v4121_v40 = vld [vmem:[#allocation2 + $0x30] sm:$0xf0] }
  0x83   :  { %3036 = vmatpush.bf16.msrb.mxu3 %v4332_v43  ;;  %v5816_v13 = vor.u32 %v6451_v7, %v5815_v3  ;;  %v5671_v15 = vld [vmem:[#allocation2 + $0xc40] sm:$0xf]  ;;  %v6447_v19 = vld [vmem:[#allocation2 + $0xd4c] sm:$0xf0]  ;;  %v6057_v43 = vld [vmem:[#allocation2 + $0x124] sm:$0xf] }
  0x84   :  { %2998 = vmatpush.bf16.msrb.mxu0 %v5720_v50  ;;  %v5799_v17 = vld [vmem:[#allocation2 + $0xd40] sm:$0xf]  ;;  %v5672_v27 = vor.u32 %v6415_v16, %v5671_v15  ;;  %v6411_v34 = vld [vmem:[#allocation2 + $0xc2c] sm:$0xf0]  ;;  %v4249_v45 = vld [vmem:[#allocation2 + $0x130] sm:$0xf0] }
  0x85   :  { %3011 = vmatpush.bf16.msrb.mxu1 %v5848_v51  ;;  %3024 = vmatpush.bf16.msrb.mxu2 %v4188_v52  ;;  %v5800_v28 = vor.u32 %v6447_v19, %v5799_v17  ;;  %v5655_v32 = vld [vmem:[#allocation2 + $0xc20] sm:$0xf]  ;;  %v6443_v37 = vld [vmem:[#allocation2 + $0xd2c] sm:$0xf0]  ;;  %v4124_v51 = vor.u32 %v6025_v39, %v4121_v40  ;;  %v6021_v53 = vld [vmem:[#allocation2 + $0x4] sm:$0xf]  ;;  %v4252_v55 = vor.u32 %v6057_v43, %v4249_v45 }
  0x86   :  { %v5783_v35 = vld [vmem:[#allocation2 + $0xd20] sm:$0xf]  ;;  %v5656_v46 = vor.u32 %v6411_v34, %v5655_v32  ;;  %v6407_v48 = vld [vmem:[#allocation2 + $0xc0c] sm:$0xf0]  ;;  %v6053_v57 = vld [vmem:[#allocation2 + $0x104] sm:$0xf] }
  0x87   :  { %3037 = vmatpush.bf16.msrb.mxu3 %v4316_v56  ;;  %v5639_v47 = vld [vmem:[#allocation2 + $0xc00] sm:$0xf]  ;;  %v5784_v50 = vor.u32 %v6443_v37, %v5783_v35  ;;  %v6439_v52 = vld [vmem:[#allocation2 + $0xd0c] sm:$0xf0]  ;;  %v4105_v56 = vld [vmem:[#allocation2 + $0x10] sm:$0xf0] }
  0x88   :  { %2999 = vmatpush.bf16.msrb.mxu0 %v5704_v62  ;;  %v5767_v49 = vld [vmem:[#allocation2 + $0xd00] sm:$0xf]  ;;  %v102_v54 = vld [vmem:[%s6968_s0 + $0x30] sm:$0xff]  ;;  %v6113_v59 = vld [vmem:[#allocation2 + $0x2e4] sm:$0xf]  ;;  %v5640_v62 = vor.u32 %v6407_v48, %v5639_v47  ;;  %s6685_s0 = smov [#allocation11]  }
  0x89   :  { %3012 = vmatpush.bf16.msrb.mxu1 %v5832_v63  ;;  %3025 = vmatpush.bf16.msrb.mxu2 %v4172_v0  ;;  %v4233_v58 = vld [vmem:[#allocation2 + $0x110] sm:$0xf0]  ;;  %v6145_v61 = vld [vmem:[#allocation2 + $0x3e4] sm:$0xf]  ;;  %v570_v2 = vunpack.c.l.b16 %v102_v54  ;;  %v5768_v3 = vor.u32 %v6439_v52, %v5767_v49  ;;  %v571_v9 = vunpack.c.h.b16 %v102_v54  ;;  %s4087_s2 = sshll.u32 %s6685_s0, 4  ;;  %s4088_s2 = int_to_ptr.vmem [resolvable:$true] %s4087_s2 }
  0x8a   :  { %v4473_v60 = vld [vmem:[#allocation2 + $0x2f0] sm:$0xf0]  ;;  %v6177_v0 = vld [vmem:[#allocation2 + $0x4e4] sm:$0xf]  ;;  %v4236_v10 = vor.u32 %v6053_v57, %v4233_v58 }
  0x8b   :  { %3038 = vmatpush.bf16.msrb.mxu3 %v4300_v5  ;;  %v4601_v63 = vld [vmem:[#allocation2 + $0x3f0] sm:$0xf0]  ;;  %v4108_v5 = vor.u32 %v6021_v53, %v4105_v56  ;;  %v6209_v7 = vld [vmem:[#allocation2 + $0x5e4] sm:$0xf]  ;;  %v4476_v11 = vor.u32 %v6113_v59, %v4473_v60  ;;  %v6795_v24 = vpack.c.b16 %v571_v9, %v571_v9 }
  0x8c   :  { %3000 = vmatpush.bf16.msrb.mxu0 %v5688_v12  ;;  %v4729_v1 = vld [vmem:[#allocation2 + $0x4f0] sm:$0xf0]  ;;  %v4604_v12 = vor.u32 %v6145_v61, %v4601_v63  ;;  %v6141_v16 = vld [vmem:[#allocation2 + $0x3c4] sm:$0xf] }
  0x8d   :  { %3013 = vmatpush.bf16.msrb.mxu1 %v5816_v13  ;;  %3026 = vmatpush.bf16.msrb.mxu2 %v4156_v14  ;;  %v4857_v8 = vld [vmem:[#allocation2 + $0x5f0] sm:$0xf0]  ;;  %v4732_v13 = vor.u32 %v6177_v0, %v4729_v1  ;;  %v6109_v14 = vld [vmem:[#allocation2 + $0x2c4] sm:$0xf] }
  0x8e   :  { %v4457_v15 = vld [vmem:[#allocation2 + $0x2d0] sm:$0xf0]  ;;  %v4860_v17 = vor.u32 %v6209_v7, %v4857_v8  ;;  %v6173_v22 = vld [vmem:[#allocation2 + $0x4c4] sm:$0xf] }
  0x8f   :  { %3039 = vmatpush.bf16.msrb.mxu3 %v4284_v18  ;;  %v6793_v18 = vpack.c.b16 %v570_v2, %v570_v2  ;;  %v4585_v19 = vld [vmem:[#allocation2 + $0x3d0] sm:$0xf0]  ;;  %v6205_v26 = vld [vmem:[#allocation2 + $0x5c4] sm:$0xf] }
  0x90   :  { %3001 = vmatpush.bf16.msrb.mxu0 %v5672_v27  ;;  %v4713_v23 = vld [vmem:[#allocation2 + $0x4d0] sm:$0xf0]  ;;  %v6105_v34 = vld [vmem:[#allocation2 + $0x2a4] sm:$0xf] }
  0x91   :  { %3014 = vmatpush.bf16.msrb.mxu1 %v5800_v28  ;;  %3027 = vmatpush.bf16.msrb.mxu2 %v4140_v31  ;;  %v4841_v27 = vld [vmem:[#allocation2 + $0x5d0] sm:$0xf0]  ;;  %v4460_v28 = vor.u32 %v6109_v14, %v4457_v15  ;;  %v4588_v31 = vor.u32 %v6141_v16, %v4585_v19  ;;  %v4716_v32 = vor.u32 %v6173_v22, %v4713_v23  ;;  %v6169_v40 = vld [vmem:[#allocation2 + $0x4a4] sm:$0xf] }
  0x92   :  { %v4441_v35 = vld [vmem:[#allocation2 + $0x2b0] sm:$0xf0]  ;;  %v4844_v37 = vor.u32 %v6205_v26, %v4841_v27  ;;  %v6201_v45 = vld [vmem:[#allocation2 + $0x5a4] sm:$0xf] }
  0x93   :  { %3040 = vmatpush.bf16.msrb.mxu3 %v4268_v36  ;;  %v6137_v36 = vld [vmem:[#allocation2 + $0x3a4] sm:$0xf]  ;;  %v4569_v39 = vld [vmem:[#allocation2 + $0x3b0] sm:$0xf0]  ;;  %v4444_v47 = vor.u32 %v6105_v34, %v4441_v35 }
  0x94   :  { %3002 = vmatpush.bf16.msrb.mxu0 %v5656_v46  ;;  %v4697_v43 = vld [vmem:[#allocation2 + $0x4b0] sm:$0xf0]  ;;  %v4572_v48 = vor.u32 %v6137_v36, %v4569_v39  ;;  %v6133_v52 = vld [vmem:[#allocation2 + $0x384] sm:$0xf] }
  0x95   :  { %3015 = vmatpush.bf16.msrb.mxu1 %v5784_v50  ;;  %3028 = vmatpush.bf16.msrb.mxu2 %v4124_v51  ;;  %v4825_v46 = vld [vmem:[#allocation2 + $0x5b0] sm:$0xf0]  ;;  %v4700_v49 = vor.u32 %v6169_v40, %v4697_v43  ;;  %v6101_v50 = vld [vmem:[#allocation2 + $0x284] sm:$0xf] }
  0x96   :  { %v4425_v51 = vld [vmem:[#allocation2 + $0x290] sm:$0xf0]  ;;  %v4828_v53 = vor.u32 %v6201_v45, %v4825_v46  ;;  %v6197_v57 = vld [vmem:[#allocation2 + $0x584] sm:$0xf] }
  0x97   :  { %3041 = vmatpush.bf16.msrb.mxu3 %v4252_v55  ;;  %v4553_v54 = vld [vmem:[#allocation2 + $0x390] sm:$0xf0]  ;;  %v6165_v55 = vld [vmem:[#allocation2 + $0x484] sm:$0xf]  ;;  %v4428_v59 = vor.u32 %v6101_v50, %v4425_v51 }
  0x98   :  { %3003 = vmatpush.bf16.msrb.mxu0 %v5640_v62  ;;  %v4681_v56 = vld [vmem:[#allocation2 + $0x490] sm:$0xf0]  ;;  %v4556_v60 = vor.u32 %v6133_v52, %v4553_v54  ;;  %v6097_v62 = vld [vmem:[#allocation2 + $0x264] sm:$0xf] }
  0x99   :  { %3016 = vmatpush.bf16.msrb.mxu1 %v5768_v3  ;;  %3029 = vmatpush.bf16.msrb.mxu2 %v4108_v5  ;;  %v4809_v58 = vld [vmem:[#allocation2 + $0x590] sm:$0xf0]  ;;  %v4684_v61 = vor.u32 %v6165_v55, %v4681_v56  ;;  %v6129_v0 = vld [vmem:[#allocation2 + $0x364] sm:$0xf] }
  0x9a   :  { %v4409_v63 = vld [vmem:[#allocation2 + $0x270] sm:$0xf0]  ;;  %v4812_v1 = vor.u32 %v6197_v57, %v4809_v58  ;;  %v6161_v3 = vld [vmem:[#allocation2 + $0x464] sm:$0xf] }
  0x9b   :  { %3042 = vmatpush.bf16.msrb.mxu3 %v4236_v10  ;;  %3004 = vmatmul.bf16.vlgmr.msrb.gmra.mxu0 %v6793_v18  ;;  %v4537_v2 = vld [vmem:[#allocation2 + $0x370] sm:$0xf0]  ;;  %v6193_v7 = vld [vmem:[#allocation2 + $0x564] sm:$0xf]  ;;  %v4412_v9 = vor.u32 %v6097_v62, %v4409_v63 }
  0x9c   :  { %3048 = vmatpush.bf16.msra.mxu0 %v4476_v11  ;;  %3017 = vmatmul.bf16.vlgmr.msrb.gmra.mxu1 %v6795_v24  ;;  %v4665_v5 = vld [vmem:[#allocation2 + $0x470] sm:$0xf0]  ;;  %v4540_v10 = vor.u32 %v6129_v0, %v4537_v2  ;;  %v6125_v14 = vld [vmem:[#allocation2 + $0x344] sm:$0xf] }
  0x9d   :  { %3061 = vmatpush.bf16.msra.mxu1 %v4604_v12  ;;  %3074 = vmatpush.bf16.msra.mxu2 %v4732_v13  ;;  %v4793_v8 = vld [vmem:[#allocation2 + $0x570] sm:$0xf0]  ;;  %v4668_v11 = vor.u32 %v6161_v3, %v4665_v5  ;;  %v6093_v12 = vld [vmem:[#allocation2 + $0x244] sm:$0xf] }
  0x9e   :  { %3030 = vmatmul.bf16.vlgmr.msrb.gmra.mxu2 %v6747_v20  ;;  %3043 = vmatmul.bf16.vlgmr.msrb.gmra.mxu3 %v6750_v21  ;;  %v4393_v13 = vld [vmem:[#allocation2 + $0x250] sm:$0xf0]  ;;  %v4796_v15 = vor.u32 %v6193_v7, %v4793_v8  ;;  %v6189_v22 = vld [vmem:[#allocation2 + $0x544] sm:$0xf] }
  0x9f   :  { %3087 = vmatpush.bf16.msra.mxu3 %v4860_v17  ;;  %v4521_v16 = vld [vmem:[#allocation2 + $0x350] sm:$0xf0]  ;;  %v6157_v17 = vld [vmem:[#allocation2 + $0x444] sm:$0xf]  ;;  %v4396_v26 = vor.u32 %v6093_v12, %v4393_v13 }
  0xa0   :  { %3049 = vmatpush.bf16.msra.mxu0 %v4460_v28  ;;  %v4649_v19 = vld [vmem:[#allocation2 + $0x450] sm:$0xf0]  ;;  %v4524_v27 = vor.u32 %v6125_v14, %v4521_v16  ;;  %v6121_v34 = vld [vmem:[#allocation2 + $0x324] sm:$0xf] }
  0xa1   :  { %3062 = vmatpush.bf16.msra.mxu1 %v4588_v31  ;;  %3075 = vmatpush.bf16.msra.mxu2 %v4716_v32  ;;  %v4777_v23 = vld [vmem:[#allocation2 + $0x550] sm:$0xf0]  ;;  %v4652_v28 = vor.u32 %v6157_v17, %v4649_v19  ;;  %v6089_v31 = vld [vmem:[#allocation2 + $0x224] sm:$0xf] }
  0xa2   :  { %v4377_v32 = vld [vmem:[#allocation2 + $0x230] sm:$0xf0]  ;;  %v4780_v35 = vor.u32 %v6189_v22, %v4777_v23  ;;  %v6185_v40 = vld [vmem:[#allocation2 + $0x524] sm:$0xf] }
  0xa3   :  { %3088 = vmatpush.bf16.msra.mxu3 %v4844_v37  ;;  %v4505_v36 = vld [vmem:[#allocation2 + $0x330] sm:$0xf0]  ;;  %v6153_v37 = vld [vmem:[#allocation2 + $0x424] sm:$0xf]  ;;  %v4380_v45 = vor.u32 %v6089_v31, %v4377_v32 }
  0xa4   :  { %3050 = vmatpush.bf16.msra.mxu0 %v4444_v47  ;;  %v4633_v39 = vld [vmem:[#allocation2 + $0x430] sm:$0xf0]  ;;  %v6085_v46 = vld [vmem:[#allocation2 + $0x204] sm:$0xf] }
  0xa5   :  { %3063 = vmatpush.bf16.msra.mxu1 %v4572_v48  ;;  %3076 = vmatpush.bf16.msra.mxu2 %v4700_v49  ;;  %v4761_v43 = vld [vmem:[#allocation2 + $0x530] sm:$0xf0]  ;;  %v4508_v48 = vor.u32 %v6121_v34, %v4505_v36  ;;  %v4636_v49 = vor.u32 %v6153_v37, %v4633_v39  ;;  %v6117_v50 = vld [vmem:[#allocation2 + $0x304] sm:$0xf] }
  0xa6   :  { %v4361_v47 = vld [vmem:[#allocation2 + $0x210] sm:$0xf0]  ;;  %v6149_v52 = vld [vmem:[#allocation2 + $0x404] sm:$0xf] }
  0xa7   :  { %3089 = vmatpush.bf16.msra.mxu3 %v4828_v53  ;;  %v4489_v51 = vld [vmem:[#allocation2 + $0x310] sm:$0xf0]  ;;  %v4764_v53 = vor.u32 %v6185_v40, %v4761_v43  ;;  %v6181_v55 = vld [vmem:[#allocation2 + $0x504] sm:$0xf] }
  0xa8   :  { %3051 = vmatpush.bf16.msra.mxu0 %v4428_v59  ;;  %v4617_v54 = vld [vmem:[#allocation2 + $0x410] sm:$0xf0]  ;;  %v6241_v57 = vld [vmem:[#allocation2 + $0x6e4] sm:$0xf]  ;;  %v4492_v0 = vor.u32 %v6117_v50, %v4489_v51 }
  0xa9   :  { %3064 = vmatpush.bf16.msra.mxu1 %v4556_v60  ;;  %3077 = vmatpush.bf16.msra.mxu2 %v4684_v61  ;;  %v4745_v56 = vld [vmem:[#allocation2 + $0x510] sm:$0xf0]  ;;  %v6273_v59 = vld [vmem:[#allocation2 + $0x7e4] sm:$0xf]  ;;  %v4364_v60 = vor.u32 %v6085_v46, %v4361_v47 }
  0xaa   :  { %v4985_v58 = vld [vmem:[#allocation2 + $0x6f0] sm:$0xf0]  ;;  %v6305_v62 = vld [vmem:[#allocation2 + $0x8e4] sm:$0xf]  ;;  %v4748_v5 = vor.u32 %v6181_v55, %v4745_v56 }
  0xab   :  { %3090 = vmatpush.bf16.msra.mxu3 %v4812_v1  ;;  %v5113_v61 = vld [vmem:[#allocation2 + $0x7f0] sm:$0xf0]  ;;  %v4620_v1 = vor.u32 %v6149_v52, %v4617_v54  ;;  %v6337_v2 = vld [vmem:[#allocation2 + $0x9e4] sm:$0xf]  ;;  %v4988_v7 = vor.u32 %v6241_v57, %v4985_v58 }
  0xac   :  { %3052 = vmatpush.bf16.msra.mxu0 %v4412_v9  ;;  %v5241_v63 = vld [vmem:[#allocation2 + $0x8f0] sm:$0xf0]  ;;  %v5116_v8 = vor.u32 %v6273_v59, %v5113_v61  ;;  %v6269_v12 = vld [vmem:[#allocation2 + $0x7c4] sm:$0xf] }
  0xad   :  { %3065 = vmatpush.bf16.msra.mxu1 %v4540_v10  ;;  %3078 = vmatpush.bf16.msra.mxu2 %v4668_v11  ;;  %v5369_v3 = vld [vmem:[#allocation2 + $0x9f0] sm:$0xf0]  ;;  %v5244_v9 = vor.u32 %v6305_v62, %v5241_v63  ;;  %v6237_v10 = vld [vmem:[#allocation2 + $0x6c4] sm:$0xf] }
  0xae   :  { %v4969_v11 = vld [vmem:[#allocation2 + $0x6d0] sm:$0xf0]  ;;  %v5372_v13 = vor.u32 %v6337_v2, %v5369_v3  ;;  %v6333_v17 = vld [vmem:[#allocation2 + $0x9c4] sm:$0xf] }
  0xaf   :  { %3091 = vmatpush.bf16.msra.mxu3 %v4796_v15  ;;  %v5097_v14 = vld [vmem:[#allocation2 + $0x7d0] sm:$0xf0]  ;;  %v6301_v15 = vld [vmem:[#allocation2 + $0x8c4] sm:$0xf]  ;;  %v4972_v22 = vor.u32 %v6237_v10, %v4969_v11 }
  0xb0   :  { %3053 = vmatpush.bf16.msra.mxu0 %v4396_v26  ;;  %v5225_v16 = vld [vmem:[#allocation2 + $0x8d0] sm:$0xf0]  ;;  %v5100_v23 = vor.u32 %v6269_v12, %v5097_v14  ;;  %v6265_v31 = vld [vmem:[#allocation2 + $0x7a4] sm:$0xf] }
  0xb1   :  { %3066 = vmatpush.bf16.msra.mxu1 %v4524_v27  ;;  %3079 = vmatpush.bf16.msra.mxu2 %v4652_v28  ;;  %v5353_v19 = vld [vmem:[#allocation2 + $0x9d0] sm:$0xf0]  ;;  %v5228_v26 = vor.u32 %v6301_v15, %v5225_v16  ;;  %v6233_v27 = vld [vmem:[#allocation2 + $0x6a4] sm:$0xf] }
  0xb2   :  { %v4953_v28 = vld [vmem:[#allocation2 + $0x6b0] sm:$0xf0]  ;;  %v5356_v32 = vor.u32 %v6333_v17, %v5353_v19  ;;  %v6329_v37 = vld [vmem:[#allocation2 + $0x9a4] sm:$0xf] }
  0xb3   :  { %3092 = vmatpush.bf16.msra.mxu3 %v4780_v35  ;;  %v5081_v34 = vld [vmem:[#allocation2 + $0x7b0] sm:$0xf0]  ;;  %v6297_v35 = vld [vmem:[#allocation2 + $0x8a4] sm:$0xf]  ;;  %v4956_v40 = vor.u32 %v6233_v27, %v4953_v28 }
  0xb4   :  { %3054 = vmatpush.bf16.msra.mxu0 %v4380_v45  ;;  %v5209_v36 = vld [vmem:[#allocation2 + $0x8b0] sm:$0xf0]  ;;  %v5084_v43 = vor.u32 %v6265_v31, %v5081_v34  ;;  %v6229_v46 = vld [vmem:[#allocation2 + $0x684] sm:$0xf] }
  0xb5   :  { %3067 = vmatpush.bf16.msra.mxu1 %v4508_v48  ;;  %3080 = vmatpush.bf16.msra.mxu2 %v4636_v49  ;;  %v5337_v39 = vld [vmem:[#allocation2 + $0x9b0] sm:$0xf0]  ;;  %v5212_v45 = vor.u32 %v6297_v35, %v5209_v36  ;;  %v6261_v48 = vld [vmem:[#allocation2 + $0x784] sm:$0xf] }
  0xb6   :  { %v4937_v47 = vld [vmem:[#allocation2 + $0x690] sm:$0xf0]  ;;  %v5340_v49 = vor.u32 %v6329_v37, %v5337_v39  ;;  %v6293_v51 = vld [vmem:[#allocation2 + $0x884] sm:$0xf] }
  0xb7   :  { %3093 = vmatpush.bf16.msra.mxu3 %v4764_v53  ;;  %v5065_v50 = vld [vmem:[#allocation2 + $0x790] sm:$0xf0]  ;;  %v6325_v53 = vld [vmem:[#allocation2 + $0x984] sm:$0xf]  ;;  %v4940_v55 = vor.u32 %v6229_v46, %v4937_v47 }
  0xb8   :  { %3055 = vmatpush.bf16.msra.mxu0 %v4364_v60  ;;  %v5193_v52 = vld [vmem:[#allocation2 + $0x890] sm:$0xf0]  ;;  %v5068_v56 = vor.u32 %v6261_v48, %v5065_v50  ;;  %v6225_v58 = vld [vmem:[#allocation2 + $0x664] sm:$0xf] }
  0xb9   :  { %3068 = vmatpush.bf16.msra.mxu1 %v4492_v0  ;;  %3081 = vmatpush.bf16.msra.mxu2 %v4620_v1  ;;  %v5321_v54 = vld [vmem:[#allocation2 + $0x990] sm:$0xf0]  ;;  %v5196_v57 = vor.u32 %v6293_v51, %v5193_v52  ;;  %v6257_v60 = vld [vmem:[#allocation2 + $0x764] sm:$0xf] }
  0xba   :  { %v4921_v59 = vld [vmem:[#allocation2 + $0x670] sm:$0xf0]  ;;  %v5324_v61 = vor.u32 %v6325_v53, %v5321_v54  ;;  %v6289_v63 = vld [vmem:[#allocation2 + $0x864] sm:$0xf] }
  0xbb   :  { %3094 = vmatpush.bf16.msra.mxu3 %v4748_v5  ;;  %3056 = vmatmul.bf16.vlgmr.msra.gmra.mxu0 %v6739_v4  ;;  %v5049_v62 = vld [vmem:[#allocation2 + $0x770] sm:$0xf0]  ;;  %v6321_v1 = vld [vmem:[#allocation2 + $0x964] sm:$0xf]  ;;  %v4924_v3 = vor.u32 %v6225_v58, %v4921_v59 }
  0xbc   :  { %3100 = vmatpush.bf16.msrb.mxu0 %v4988_v7  ;;  %3082 = vmatmul.bf16.vlgmr.msra.gmra.mxu2 %v6762_v41  ;;  %v5177_v0 = vld [vmem:[#allocation2 + $0x870] sm:$0xf0]  ;;  %v5052_v5 = vor.u32 %v6257_v60, %v5049_v62  ;;  %v6253_v10 = vld [vmem:[#allocation2 + $0x744] sm:$0xf] }
  0xbd   :  { %3113 = vmatpush.bf16.msrb.mxu1 %v5116_v8  ;;  %3126 = vmatpush.bf16.msrb.mxu2 %v5244_v9  ;;  %v5305_v2 = vld [vmem:[#allocation2 + $0x970] sm:$0xf0]  ;;  %v5180_v7 = vor.u32 %v6289_v63, %v5177_v0  ;;  %v6221_v8 = vld [vmem:[#allocation2 + $0x644] sm:$0xf] }
  0xbe   :  { %3095 = vmatmul.bf16.vlgmr.msra.gmra.mxu3 %v6766_v44  ;;  %3069 = vmatmul.bf16.vlgmr.msra.gmra.mxu1 %v6744_v6  ;;  %v4905_v9 = vld [vmem:[#allocation2 + $0x650] sm:$0xf0]  ;;  %v5308_v11 = vor.u32 %v6321_v1, %v5305_v2  ;;  %v6317_v15 = vld [vmem:[#allocation2 + $0x944] sm:$0xf]  ;;  %v2875_v34 = vpop.f32.mrf.mxu2 }
  0xbf   :  { %3139 = vmatpush.bf16.msrb.mxu3 %v5372_v13  ;;  %v5033_v12 = vld [vmem:[#allocation2 + $0x750] sm:$0xf0]  ;;  %v6285_v13 = vld [vmem:[#allocation2 + $0x844] sm:$0xf]  ;;  %v4908_v19 = vor.u32 %v6221_v8, %v4905_v9 }
  0xc0   :  { %3101 = vmatpush.bf16.msrb.mxu0 %v4972_v22  ;;  %v5161_v14 = vld [vmem:[#allocation2 + $0x850] sm:$0xf0]  ;;  %v6217_v27 = vld [vmem:[#allocation2 + $0x624] sm:$0xf] }
  0xc1   :  { %3114 = vmatpush.bf16.msrb.mxu1 %v5100_v23  ;;  %3127 = vmatpush.bf16.msrb.mxu2 %v5228_v26  ;;  %v5289_v16 = vld [vmem:[#allocation2 + $0x950] sm:$0xf0]  ;;  %v5036_v23 = vor.u32 %v6253_v10, %v5033_v12  ;;  %v5164_v26 = vor.u32 %v6285_v13, %v5161_v14  ;;  %v6249_v31 = vld [vmem:[#allocation2 + $0x724] sm:$0xf] }
  0xc2   :  { %v4889_v28 = vld [vmem:[#allocation2 + $0x630] sm:$0xf0]  ;;  %v5292_v35 = vor.u32 %v6317_v15, %v5289_v16  ;;  %v6281_v37 = vld [vmem:[#allocation2 + $0x824] sm:$0xf] }
  0xc3   :  { %3140 = vmatpush.bf16.msrb.mxu3 %v5356_v32  ;;  %v5017_v36 = vld [vmem:[#allocation2 + $0x730] sm:$0xf0]  ;;  %v4892_v47 = vor.u32 %v6217_v27, %v4889_v28  ;;  %v6213_v48 = vld [vmem:[#allocation2 + $0x604] sm:$0xf] }
  0xc4   :  { %3102 = vmatpush.bf16.msrb.mxu0 %v4956_v40  ;;  %v5145_v39 = vld [vmem:[#allocation2 + $0x830] sm:$0xf0]  ;;  %v2888_v40 = vpop.f32.mrf.mxu3  ;;  %v5020_v50 = vor.u32 %v6249_v31, %v5017_v36  ;;  %v6245_v52 = vld [vmem:[#allocation2 + $0x704] sm:$0xf] }
  0xc5   :  { %3115 = vmatpush.bf16.msrb.mxu1 %v5084_v43  ;;  %3128 = vmatpush.bf16.msrb.mxu2 %v5212_v45  ;;  %v2849_v17 = vpop.f32.mrf.mxu0  ;;  %v2862_v22 = vpop.f32.mrf.mxu1  ;;  %v6313_v43 = vld [vmem:[#allocation2 + $0x924] sm:$0xf]  ;;  %v5273_v45 = vld [vmem:[#allocation2 + $0x930] sm:$0xf0]  ;;  %v5148_v51 = vor.u32 %v6281_v37, %v5145_v39 }
  0xc6   :  { %v2863_v32 = vadd.f32 %v2862_v22, %v2849_v17  ;;  %v5001_v53 = vld [vmem:[#allocation2 + $0x710] sm:$0xf0]  ;;  %v6277_v54 = vld [vmem:[#allocation2 + $0x804] sm:$0xf] }
  0xc7   :  { %3141 = vmatpush.bf16.msrb.mxu3 %v5340_v49  ;;  %v4873_v49 = vld [vmem:[#allocation2 + $0x610] sm:$0xf0]  ;;  %v6309_v58 = vld [vmem:[#allocation2 + $0x904] sm:$0xf] }
  0xc8   :  { %3103 = vmatpush.bf16.msrb.mxu0 %v4940_v55  ;;  %v2876_v46 = vadd.f32 %v2875_v34, %v2863_v32  ;;  %v5257_v59 = vld [vmem:[#allocation2 + $0x910] sm:$0xf0]  ;;  %v6369_v60 = vld [vmem:[#allocation2 + $0xae4] sm:$0xf]  ;;  %v4876_v0 = vor.u32 %v6213_v48, %v4873_v49 }
  0xc9   :  { %3116 = vmatpush.bf16.msrb.mxu1 %v5068_v56  ;;  %3129 = vmatpush.bf16.msrb.mxu2 %v5196_v57  ;;  %v5276_v56 = vor.u32 %v6313_v43, %v5273_v45  ;;  %v5129_v57 = vld [vmem:[#allocation2 + $0x810] sm:$0xf0]  ;;  %v6401_v62 = vld [vmem:[#allocation2 + $0xbe4] sm:$0xf]  ;;  %v5260_v12 = vor.u32 %v6309_v58, %v5257_v59 }
  0xca   :  { %v6805_v55 = vadd.f32 %v2888_v40, %v2876_v46  ;;  %v5625_v1 = vld [vmem:[#allocation2 + $0xbf0] sm:$0xf0]  ;;  %v6433_v2 = vld [vmem:[#allocation2 + $0xce4] sm:$0xf]  ;;  %v5132_v8 = vor.u32 %v6277_v54, %v5129_v57 }
  0xcb   :  { %3142 = vmatpush.bf16.msrb.mxu3 %v5324_v61  ;;  %v5497_v61 = vld [vmem:[#allocation2 + $0xaf0] sm:$0xf0]  ;;  %v6465_v9 = vld [vmem:[#allocation2 + $0xde4] sm:$0xf]  ;;  %v5628_v15 = vor.u32 %v6401_v62, %v5625_v1 }
  0xcc   :  { %3104 = vmatpush.bf16.msrb.mxu0 %v4924_v3  ;;  %v5753_v3 = vld [vmem:[#allocation2 + $0xcf0] sm:$0xf0]  ;;  %v5500_v13 = vor.u32 %v6369_v60, %v5497_v61  ;;  %v2890_v14 = vpop.f32.mrf.mxu3  ;;  %v6365_v17 = vld [vmem:[#allocation2 + $0xac4] sm:$0xf] }
  0xcd   :  { %3117 = vmatpush.bf16.msrb.mxu1 %v5052_v5  ;;  %3130 = vmatpush.bf16.msrb.mxu2 %v5180_v7  ;;  %v2851_v63 = vpop.f32.mrf.mxu0  ;;  %v2864_v5 = vpop.f32.mrf.mxu1  ;;  %v5004_v7 = vor.u32 %v6245_v52, %v5001_v53  ;;  %v5881_v10 = vld [vmem:[#allocation2 + $0xdf0] sm:$0xf0]  ;;  %v5756_v16 = vor.u32 %v6433_v2, %v5753_v3  ;;  %v6397_v22 = vld [vmem:[#allocation2 + $0xbc4] sm:$0xf] }
  0xce   :  { %v6429_v27 = vld [vmem:[#allocation2 + $0xcc4] sm:$0xf]  ;;  %v5737_v28 = vld [vmem:[#allocation2 + $0xcd0] sm:$0xf0] }
  0xcf   :  { %3143 = vmatpush.bf16.msrb.mxu3 %v5308_v11  ;;  %v2877_v11 = vpop.f32.mrf.mxu2  ;;  %v6461_v31 = vld [vmem:[#allocation2 + $0xdc4] sm:$0xf]  ;;  %v5865_v32 = vld [vmem:[#allocation2 + $0xdd0] sm:$0xf0]  ;;  %v5740_v36 = vor.u32 %v6429_v27, %v5737_v28 }
  0xd0   :  { %3105 = vmatpush.bf16.msrb.mxu0 %v4908_v19  ;;  %v5481_v19 = vld [vmem:[#allocation2 + $0xad0] sm:$0xf0]  ;;  %v6361_v37 = vld [vmem:[#allocation2 + $0xaa4] sm:$0xf]  ;;  %v5868_v43 = vor.u32 %v6461_v31, %v5865_v32 }
  0xd1   :  { %3118 = vmatpush.bf16.msrb.mxu1 %v5036_v23  ;;  %3131 = vmatpush.bf16.msrb.mxu2 %v5164_v26  ;;  %v5884_v23 = vor.u32 %v6465_v9, %v5881_v10  ;;  %v5609_v26 = vld [vmem:[#allocation2 + $0xbd0] sm:$0xf0]  ;;  %v5484_v34 = vor.u32 %v6365_v17, %v5481_v19  ;;  %v6393_v40 = vld [vmem:[#allocation2 + $0xba4] sm:$0xf] }
  0xd2   :  { %v5465_v39 = vld [vmem:[#allocation2 + $0xab0] sm:$0xf0]  ;;  %v6425_v46 = vld [vmem:[#allocation2 + $0xca4] sm:$0xf] }
  0xd3   :  { %3144 = vmatpush.bf16.msrb.mxu3 %v5292_v35  ;;  %v5612_v35 = vor.u32 %v6397_v22, %v5609_v26  ;;  %v5593_v45 = vld [vmem:[#allocation2 + $0xbb0] sm:$0xf0]  ;;  %v6457_v48 = vld [vmem:[#allocation2 + $0xda4] sm:$0xf] }
  0xd4   :  { %3106 = vmatpush.bf16.msrb.mxu0 %v4892_v47  ;;  %v5721_v47 = vld [vmem:[#allocation2 + $0xcb0] sm:$0xf0]  ;;  %v6357_v53 = vld [vmem:[#allocation2 + $0xa84] sm:$0xf] }
  0xd5   :  { %3119 = vmatpush.bf16.msrb.mxu1 %v5020_v50  ;;  %3132 = vmatpush.bf16.msrb.mxu2 %v5148_v51  ;;  %v5849_v49 = vld [vmem:[#allocation2 + $0xdb0] sm:$0xf0]  ;;  %v5468_v50 = vor.u32 %v6361_v37, %v5465_v39  ;;  %v5596_v51 = vor.u32 %v6393_v40, %v5593_v45  ;;  %v5724_v52 = vor.u32 %v6425_v46, %v5721_v47  ;;  %v6421_v59 = vld [vmem:[#allocation2 + $0xc84] sm:$0xf] }
  0xd6   :  { %v5449_v54 = vld [vmem:[#allocation2 + $0xa90] sm:$0xf0]  ;;  %v5852_v57 = vor.u32 %v6457_v48, %v5849_v49  ;;  %v6453_v61 = vld [vmem:[#allocation2 + $0xd84] sm:$0xf] }
  0xd7   :  { %3145 = vmatpush.bf16.msrb.mxu3 %v5276_v56  ;;  %v6389_v56 = vld [vmem:[#allocation2 + $0xb84] sm:$0xf]  ;;  %v5577_v58 = vld [vmem:[#allocation2 + $0xb90] sm:$0xf0]  ;;  %v5452_v63 = vor.u32 %v6357_v53, %v5449_v54 }
  0xd8   :  { %3107 = vmatpush.bf16.msrb.mxu0 %v4876_v0  ;;  %v5705_v60 = vld [vmem:[#allocation2 + $0xc90] sm:$0xf0]  ;;  %v5580_v1 = vor.u32 %v6389_v56, %v5577_v58  ;;  %v6353_v3 = vld [vmem:[#allocation2 + $0xa64] sm:$0xf] }
  0xd9   :  { %3120 = vmatpush.bf16.msrb.mxu1 %v5004_v7  ;;  %3133 = vmatpush.bf16.msrb.mxu2 %v5132_v8  ;;  %v5833_v62 = vld [vmem:[#allocation2 + $0xd90] sm:$0xf0]  ;;  %v2901_v0 = vpop.f32.mrf.mxu0  ;;  %v5708_v2 = vor.u32 %v6421_v59, %v5705_v60  ;;  %v6385_v7 = vld [vmem:[#allocation2 + $0xb64] sm:$0xf] }
  0xda   :  { %v5433_v5 = vld [vmem:[#allocation2 + $0xa70] sm:$0xf0]  ;;  %v2902_v8 = vadd.f32 %v2901_v0, %v6805_v55  ;;  %v5836_v10 = vor.u32 %v6453_v61, %v5833_v62  ;;  %v6449_v14 = vld [vmem:[#allocation2 + $0xd64] sm:$0xf] }
  0xdb   :  { %3146 = vmatpush.bf16.msrb.mxu3 %v5260_v12  ;;  %3108 = vmatmul.bf16.vlgmr.msrb.gmra.mxu0 %v6760_v38  ;;  %v2914_v9 = vpop.f32.mrf.mxu1  ;;  %v5561_v11 = vld [vmem:[#allocation2 + $0xb70] sm:$0xf0]  ;;  %v6417_v12 = vld [vmem:[#allocation2 + $0xc64] sm:$0xf]  ;;  %v5436_v17 = vor.u32 %v6353_v3, %v5433_v5 }
  0xdc   :  { %3152 = vmatpush.bf16.msra.mxu0 %v5500_v13  ;;  %3134 = vmatmul.bf16.vlgmr.msrb.gmra.mxu2 %v6778_v25  ;;  %v5689_v13 = vld [vmem:[#allocation2 + $0xc70] sm:$0xf0]  ;;  %v5564_v19 = vor.u32 %v6385_v7, %v5561_v11  ;;  %v6381_v27 = vld [vmem:[#allocation2 + $0xb44] sm:$0xf]  ;;  %v4223_v11 = vld [vmem:[#allocation2 + $0xe8] sm:$0xf] }
  0xdd   :  { %3165 = vmatpush.bf16.msra.mxu1 %v5628_v15  ;;  %3178 = vmatpush.bf16.msra.mxu2 %v5756_v16  ;;  %v5817_v15 = vld [vmem:[#allocation2 + $0xd70] sm:$0xf0]  ;;  %v2915_v16 = vadd.f32 %v2914_v9, %v2902_v8  ;;  %v5692_v22 = vor.u32 %v6417_v12, %v5689_v13  ;;  %v6413_v32 = vld [vmem:[#allocation2 + $0xc44] sm:$0xf]  ;;  %v6052_v12 = vld [vmem:[#allocation2 + $0xf4] sm:$0xf0] }
  0xde   :  { %3121 = vmatmul.bf16.vlgmr.msrb.gmra.mxu1 %v6764_v42  ;;  %3147 = vmatmul.bf16.vlgmr.msrb.gmra.mxu3 %v6782_v30  ;;  %v5417_v26 = vld [vmem:[#allocation2 + $0xa50] sm:$0xf0]  ;;  %v5820_v55 = vor.u32 %v6449_v14, %v5817_v15  ;;  %v6445_v37 = vld [vmem:[#allocation2 + $0xd44] sm:$0xf]  ;;  %v4351_v13 = vld [vmem:[#allocation2 + $0x1e8] sm:$0xf] }
  0xdf   :  { %3191 = vmatpush.bf16.msra.mxu3 %v5884_v23  ;;  %v6349_v23 = vld [vmem:[#allocation2 + $0xa44] sm:$0xf]  ;;  %v2927_v28 = vpop.f32.mrf.mxu2  ;;  %v5545_v31 = vld [vmem:[#allocation2 + $0xb50] sm:$0xf0]  ;;  %v6084_v15 = vld [vmem:[#allocation2 + $0x1f4] sm:$0xf0] }
  0xe0   :  { %3153 = vmatpush.bf16.msra.mxu0 %v5484_v34  ;;  %v5673_v34 = vld [vmem:[#allocation2 + $0xc50] sm:$0xf0]  ;;  %v5420_v40 = vor.u32 %v6349_v23, %v5417_v26  ;;  %v5548_v46 = vor.u32 %v6381_v27, %v5545_v31  ;;  %v6345_v48 = vld [vmem:[#allocation2 + $0xa24] sm:$0xf]  ;;  %v4607_v23 = vld [vmem:[#allocation2 + $0x3e8] sm:$0xf] }
  0xe1   :  { %3166 = vmatpush.bf16.msra.mxu1 %v5612_v35  ;;  %3179 = vmatpush.bf16.msra.mxu2 %v5740_v36  ;;  %v2928_v35 = vadd.f32 %v2927_v28, %v2915_v16  ;;  %v5801_v39 = vld [vmem:[#allocation2 + $0xd50] sm:$0xf0]  ;;  %v2903_v45 = vpop.f32.mrf.mxu0  ;;  %v5676_v47 = vor.u32 %v6413_v32, %v5673_v34  ;;  %v6409_v54 = vld [vmem:[#allocation2 + $0xc24] sm:$0xf]  ;;  %v4479_v16 = vld [vmem:[#allocation2 + $0x2e8] sm:$0xf]  ;;  %v4224_v28 = vor.u32 %v6052_v12, %v4223_v11 }
  0xe2   :  { %v2940_v36 = vpop.f32.mrf.mxu3  ;;  %v5401_v49 = vld [vmem:[#allocation2 + $0xa30] sm:$0xf0]  ;;  %v6341_v60 = vld [vmem:[#allocation2 + $0xa04] sm:$0xf]  ;;  %v6148_v26 = vld [vmem:[#allocation2 + $0x3f4] sm:$0xf0] }
  0xe3   :  { %3192 = vmatpush.bf16.msra.mxu3 %v5868_v43  ;;  %v6812_v43 = vadd.f32 %v2940_v36, %v2928_v35  ;;  %v5529_v53 = vld [vmem:[#allocation2 + $0xb30] sm:$0xf0]  ;;  %v5404_v59 = vor.u32 %v6345_v48, %v5401_v49  ;;  %v6373_v0 = vld [vmem:[#allocation2 + $0xb04] sm:$0xf]  ;;  %v4207_v32 = vld [vmem:[#allocation2 + $0xc8] sm:$0xf]  ;;  %v4608_v36 = vor.u32 %v6148_v26, %v4607_v23 }
  0xe4   :  { %3154 = vmatpush.bf16.msra.mxu0 %v5468_v50  ;;  %v6377_v50 = vld [vmem:[#allocation2 + $0xb24] sm:$0xf]  ;;  %v5657_v56 = vld [vmem:[#allocation2 + $0xc30] sm:$0xf0]  ;;  %v6048_v34 = vld [vmem:[#allocation2 + $0xd4] sm:$0xf0] }
  0xe5   :  { %3167 = vmatpush.bf16.msra.mxu1 %v5596_v51  ;;  %3180 = vmatpush.bf16.msra.mxu2 %v5724_v52  ;;  %v2916_v51 = vpop.f32.mrf.mxu1  ;;  %v5804_v52 = vor.u32 %v6445_v37, %v5801_v39  ;;  %v5785_v58 = vld [vmem:[#allocation2 + $0xd30] sm:$0xf0]  ;;  %v5532_v62 = vor.u32 %v6377_v50, %v5529_v53  ;;  %v6437_v8 = vld [vmem:[#allocation2 + $0xd04] sm:$0xf]  ;;  %v4335_v35 = vld [vmem:[#allocation2 + $0x1c8] sm:$0xf] }
  0xe6   :  { %v5385_v61 = vld [vmem:[#allocation2 + $0xa10] sm:$0xf0]  ;;  %v6080_v37 = vld [vmem:[#allocation2 + $0x1d4] sm:$0xf0]  ;;  %v4463_v39 = vld [vmem:[#allocation2 + $0x2c8] sm:$0xf] }
  0xe7   :  { %3193 = vmatpush.bf16.msra.mxu3 %v5852_v57  ;;  %v6441_v57 = vld [vmem:[#allocation2 + $0xd24] sm:$0xf]  ;;  %v2929_v3 = vpop.f32.mrf.mxu2  ;;  %v5641_v7 = vld [vmem:[#allocation2 + $0xc10] sm:$0xf0]  ;;  %v5388_v14 = vor.u32 %v6341_v60, %v5385_v61  ;;  %v4591_v45 = vld [vmem:[#allocation2 + $0x3c8] sm:$0xf]  ;;  %v4336_v48 = vor.u32 %v6080_v37, %v4335_v35 }
  0xe8   :  { %3155 = vmatpush.bf16.msra.mxu0 %v5452_v63  ;;  %v5660_v63 = vor.u32 %v6409_v54, %v5657_v56  ;;  %v5788_v5 = vor.u32 %v6441_v57, %v5785_v58  ;;  %v5769_v9 = vld [vmem:[#allocation2 + $0xd10] sm:$0xf0]  ;;  %v4191_v50 = vld [vmem:[#allocation2 + $0xa8] sm:$0xf]  ;;  %v6044_v51 = vld [vmem:[#allocation2 + $0xb4] sm:$0xf0] }
  0xe9   :  { %3168 = vmatpush.bf16.msra.mxu1 %v5580_v1  ;;  %3181 = vmatpush.bf16.msra.mxu2 %v5708_v2  ;;  %v5513_v1 = vld [vmem:[#allocation2 + $0xb10] sm:$0xf0]  ;;  %v6405_v2 = vld [vmem:[#allocation2 + $0xc04] sm:$0xf]  ;;  %v5772_v27 = vor.u32 %v6437_v8, %v5769_v9  ;;  %v6076_v54 = vld [vmem:[#allocation2 + $0x1b4] sm:$0xf0]  ;;  %v4192_v60 = vor.u32 %v6044_v51, %v4191_v50 }
  0xea   :  { %v4447_v56 = vld [vmem:[#allocation2 + $0x2a8] sm:$0xf]  ;;  %v6108_v57 = vld [vmem:[#allocation2 + $0x2b4] sm:$0xf0] }
  0xeb   :  { %3194 = vmatpush.bf16.msra.mxu3 %v5836_v10  ;;  %v2942_v10 = vpop.f32.mrf.mxu3  ;;  %v4575_v58 = vld [vmem:[#allocation2 + $0x3a8] sm:$0xf]  ;;  %v6072_v3 = vld [vmem:[#allocation2 + $0x194] sm:$0xf0] }
  0xec   :  { %3156 = vmatpush.bf16.msra.mxu0 %v5436_v17  ;;  %v6116_v17 = vld [vmem:[#allocation2 + $0x2f4] sm:$0xf0]  ;;  %v4559_v9 = vld [vmem:[#allocation2 + $0x388] sm:$0xf] }
  0xed   :  { %3169 = vmatpush.bf16.msra.mxu1 %v5564_v19  ;;  %3182 = vmatpush.bf16.msra.mxu2 %v5692_v22  ;;  %v5516_v19 = vor.u32 %v6373_v0, %v5513_v1  ;;  %v5644_v22 = vor.u32 %v6405_v2, %v5641_v7  ;;  %v4480_v31 = vor.u32 %v6116_v17, %v4479_v16  ;;  %v6040_v0 = vld [vmem:[#allocation2 + $0x94] sm:$0xf0]  ;;  %v4303_v1 = vld [vmem:[#allocation2 + $0x188] sm:$0xf] }
  0xee   :  { %v6104_v7 = vld [vmem:[#allocation2 + $0x294] sm:$0xf0]  ;;  %v4159_v16 = vld [vmem:[#allocation2 + $0x68] sm:$0xf] }
  0xef   :  { %3195 = vmatpush.bf16.msra.mxu3 %v5820_v55  ;;  %v4352_v55 = vor.u32 %v6084_v15, %v4351_v13  ;;  %v6136_v10 = vld [vmem:[#allocation2 + $0x394] sm:$0xf0]  ;;  %v4143_v35 = vld [vmem:[#allocation2 + $0x48] sm:$0xf] }
  0xf0   :  { %3157 = vmatpush.bf16.msra.mxu0 %v5420_v40  ;;  %v6112_v40 = vld [vmem:[#allocation2 + $0x2d4] sm:$0xf0]  ;;  %v4271_v37 = vld [vmem:[#allocation2 + $0x148] sm:$0xf] }
  0xf1   :  { %3170 = vmatpush.bf16.msra.mxu1 %v5548_v46  ;;  %3183 = vmatpush.bf16.msra.mxu2 %v5676_v47  ;;  %v6144_v46 = vld [vmem:[#allocation2 + $0x3d4] sm:$0xf0]  ;;  %v4208_v47 = vor.u32 %v6048_v34, %v4207_v32  ;;  %v4464_v49 = vor.u32 %v6112_v40, %v4463_v39  ;;  %v4527_v50 = vld [vmem:[#allocation2 + $0x348] sm:$0xf] }
  0xf2   :  { %v4592_v53 = vor.u32 %v6144_v46, %v4591_v45  ;;  %v6036_v17 = vld [vmem:[#allocation2 + $0x74] sm:$0xf0]  ;;  %v4399_v46 = vld [vmem:[#allocation2 + $0x248] sm:$0xf] }
  0xf3   :  { %3196 = vmatpush.bf16.msra.mxu3 %v5804_v52  ;;  %v4319_v52 = vld [vmem:[#allocation2 + $0x1a8] sm:$0xf]  ;;  %v6068_v26 = vld [vmem:[#allocation2 + $0x174] sm:$0xf0]  ;;  %v4160_v32 = vor.u32 %v6036_v17, %v4159_v16 }
  0xf4   :  { %3158 = vmatpush.bf16.msra.mxu0 %v5404_v59  ;;  %v6140_v59 = vld [vmem:[#allocation2 + $0x3b4] sm:$0xf0]  ;;  %v4320_v61 = vor.u32 %v6076_v54, %v4319_v52  ;;  %v4495_v16 = vld [vmem:[#allocation2 + $0x308] sm:$0xf] }
  0xf5   :  { %3171 = vmatpush.bf16.msra.mxu1 %v5532_v62  ;;  %3184 = vmatpush.bf16.msra.mxu2 %v5660_v63  ;;  %v4448_v62 = vor.u32 %v6108_v57, %v4447_v56  ;;  %v4175_v63 = vld [vmem:[#allocation2 + $0x88] sm:$0xf]  ;;  %v4576_v2 = vor.u32 %v6140_v59, %v4575_v58  ;;  %v6064_v45 = vld [vmem:[#allocation2 + $0x154] sm:$0xf0] }
  0xf6   :  { %v4176_v12 = vor.u32 %v6040_v0, %v4175_v63  ;;  %v6128_v51 = vld [vmem:[#allocation2 + $0x354] sm:$0xf0]  ;;  %v4272_v57 = vor.u32 %v6064_v45, %v4271_v37  ;;  %v4127_v59 = vld [vmem:[#allocation2 + $0x28] sm:$0xf] }
  0xf7   :  { %3197 = vmatpush.bf16.msra.mxu3 %v5788_v5  ;;  %v4431_v5 = vld [vmem:[#allocation2 + $0x288] sm:$0xf]  ;;  %v6060_v63 = vld [vmem:[#allocation2 + $0x134] sm:$0xf0] }
  0xf8   :  { %3159 = vmatpush.bf16.msra.mxu0 %v5388_v14  ;;  %v4304_v14 = vor.u32 %v6072_v3, %v4303_v1  ;;  %v4432_v15 = vor.u32 %v6104_v7, %v4431_v5  ;;  %v4383_v0 = vld [vmem:[#allocation2 + $0x228] sm:$0xf]  ;;  %v6092_v1 = vld [vmem:[#allocation2 + $0x234] sm:$0xf0] }
  0xf9   :  { %3172 = vmatpush.bf16.msra.mxu1 %v5516_v19  ;;  %3185 = vmatpush.bf16.msra.mxu2 %v5644_v22  ;;  %v4287_v19 = vld [vmem:[#allocation2 + $0x168] sm:$0xf]  ;;  %v4560_v22 = vor.u32 %v6136_v10, %v4559_v9  ;;  %v6124_v3 = vld [vmem:[#allocation2 + $0x334] sm:$0xf0]  ;;  %v4384_v10 = vor.u32 %v6092_v1, %v4383_v0 }
  0xfa   :  { %v4111_v7 = vld [vmem:[#allocation2 + $0x8] sm:$0xf]  ;;  %v6120_v17 = vld [vmem:[#allocation2 + $0x314] sm:$0xf0] }
  0xfb   :  { %3198 = vmatpush.bf16.msra.mxu3 %v5772_v27  ;;  %3160 = vmatmul.bf16.vlgmr.msra.gmra.mxu0 %v6780_v29  ;;  %v2953_v8 = vpop.f32.mrf.mxu0  ;;  %v2966_v13 = vpop.f32.mrf.mxu1  ;;  %v4415_v27 = vld [vmem:[#allocation2 + $0x268] sm:$0xf]  ;;  %v4496_v37 = vor.u32 %v6120_v17, %v4495_v16  ;;  %v6204_v0 = vld [vmem:[#allocation2 + $0x5b4] sm:$0xf0] }
  0xfc   :  { %3204 = vmatpush.bf16.msrb.mxu0 %v4224_v28  ;;  %3186 = vmatmul.bf16.vlgmr.msra.gmra.mxu2 %v6793_v18  ;;  %v2954_v11 = vadd.f32 %v2953_v8, %v6812_v43  ;;  %v6100_v28 = vld [vmem:[#allocation2 + $0x274] sm:$0xf0]  ;;  %v4288_v43 = vor.u32 %v6068_v26, %v4287_v19  ;;  %v4863_v26 = vld [vmem:[#allocation2 + $0x5e8] sm:$0xf] }
  0xfd   :  { %3217 = vmatpush.bf16.msrb.mxu1 %v4352_v55  ;;  %3230 = vmatpush.bf16.msrb.mxu2 %v4480_v31  ;;  %v4543_v55 = vld [vmem:[#allocation2 + $0x368] sm:$0xf]  ;;  %v6132_v31 = vld [vmem:[#allocation2 + $0x374] sm:$0xf0]  ;;  %v4416_v34 = vor.u32 %v6100_v28, %v4415_v27 }
  0xfe   :  { %3173 = vmatmul.bf16.vlgmr.msra.gmra.mxu1 %v6784_v33  ;;  %3199 = vmatmul.bf16.vlgmr.msra.gmra.mxu3 %v6795_v24  ;;  %v2967_v23 = vadd.f32 %v2966_v13, %v2954_v11  ;;  %v4544_v39 = vor.u32 %v6132_v31, %v4543_v55  ;;  %v6024_v8 = vld [vmem:[#allocation2 + $0x14] sm:$0xf0]  ;;  %v4239_v11 = vld [vmem:[#allocation2 + $0x108] sm:$0xf] }
  0xff   :  { %3243 = vmatpush.bf16.msrb.mxu3 %v4608_v36  ;;  %v6032_v36 = vld [vmem:[#allocation2 + $0x54] sm:$0xf0]  ;;  %v2979_v40 = vpop.f32.mrf.mxu2  ;;  %v4367_v13 = vld [vmem:[#allocation2 + $0x208] sm:$0xf]  ;;  %v4112_v28 = vor.u32 %v6024_v8, %v4111_v7 }
 0x100   :  { %3205 = vmatpush.bf16.msrb.mxu0 %v4208_v47  ;;  %v6096_v47 = vld [vmem:[#allocation2 + $0x254] sm:$0xf0]  ;;  %v4991_v31 = vld [vmem:[#allocation2 + $0x6e8] sm:$0xf] }
 0x101   :  { %3218 = vmatpush.bf16.msrb.mxu1 %v4336_v48  ;;  %3231 = vmatpush.bf16.msrb.mxu2 %v4464_v49  ;;  %v2980_v48 = vadd.f32 %v2979_v40, %v2967_v23  ;;  %v4400_v58 = vor.u32 %v6096_v47, %v4399_v46  ;;  %v6180_v23 = vld [vmem:[#allocation2 + $0x4f4] sm:$0xf0]  ;;  %v4719_v46 = vld [vmem:[#allocation2 + $0x4c8] sm:$0xf] }
 0x102   :  { %v6212_v55 = vld [vmem:[#allocation2 + $0x5f4] sm:$0xf0]  ;;  %v4959_v1 = vld [vmem:[#allocation2 + $0x6a8] sm:$0xf] }
 0x103   :  { %3244 = vmatpush.bf16.msrb.mxu3 %v4592_v53  ;;  %v2992_v49 = vpop.f32.mrf.mxu3  ;;  %v2955_v52 = vpop.f32.mrf.mxu0  ;;  %v4144_v53 = vor.u32 %v6032_v36, %v4143_v35  ;;  %v5119_v35 = vld [vmem:[#allocation2 + $0x7e8] sm:$0xf]  ;;  %v6276_v36 = vld [vmem:[#allocation2 + $0x7f4] sm:$0xf0]  ;;  %v4864_v40 = vor.u32 %v6212_v55, %v4863_v26 }
 0x104   :  { %3206 = vmatpush.bf16.msrb.mxu0 %v4192_v60  ;;  %v2968_v54 = vpop.f32.mrf.mxu1  ;;  %v6819_v56 = vadd.f32 %v2992_v49, %v2980_v48  ;;  %v6028_v60 = vld [vmem:[#allocation2 + $0x34] sm:$0xf0]  ;;  %v4847_v48 = vld [vmem:[#allocation2 + $0x5c8] sm:$0xf]  ;;  %v5120_v49 = vor.u32 %v6276_v36, %v5119_v35 }
 0x105   :  { %3219 = vmatpush.bf16.msrb.mxu1 %v4320_v61  ;;  %3232 = vmatpush.bf16.msrb.mxu2 %v4448_v62  ;;  %v4255_v61 = vld [vmem:[#allocation2 + $0x128] sm:$0xf]  ;;  %v4528_v62 = vor.u32 %v6128_v51, %v4527_v50  ;;  %v4128_v5 = vor.u32 %v6028_v60, %v4127_v59  ;;  %v6176_v47 = vld [vmem:[#allocation2 + $0x4d4] sm:$0xf0] }
 0x106   :  { %v4256_v9 = vor.u32 %v6060_v63, %v4255_v61  ;;  %v6208_v50 = vld [vmem:[#allocation2 + $0x5d4] sm:$0xf0]  ;;  %v4975_v51 = vld [vmem:[#allocation2 + $0x6c8] sm:$0xf] }
 0x107   :  { %3245 = vmatpush.bf16.msrb.mxu3 %v4576_v2  ;;  %v4511_v2 = vld [vmem:[#allocation2 + $0x328] sm:$0xf]  ;;  %v2981_v19 = vpop.f32.mrf.mxu2  ;;  %v6240_v52 = vld [vmem:[#allocation2 + $0x6d4] sm:$0xf0] }
 0x108   :  { %3207 = vmatpush.bf16.msrb.mxu0 %v4176_v12  ;;  %v6056_v12 = vld [vmem:[#allocation2 + $0x114] sm:$0xf0]  ;;  %v4976_v59 = vor.u32 %v6240_v52, %v4975_v51  ;;  %v4703_v60 = vld [vmem:[#allocation2 + $0x4a8] sm:$0xf] }
 0x109   :  { %3220 = vmatpush.bf16.msrb.mxu1 %v4304_v14  ;;  %3233 = vmatpush.bf16.msrb.mxu2 %v4432_v15  ;;  %v4512_v14 = vor.u32 %v6124_v3, %v4511_v2  ;;  %v6088_v15 = vld [vmem:[#allocation2 + $0x214] sm:$0xf0]  ;;  %v5087_v3 = vld [vmem:[#allocation2 + $0x7a8] sm:$0xf] }
 0x10a   :  { %v6272_v54 = vld [vmem:[#allocation2 + $0x7d4] sm:$0xf0]  ;;  %v5071_v19 = vld [vmem:[#allocation2 + $0x788] sm:$0xf] }
 0x10b   :  { %3246 = vmatpush.bf16.msrb.mxu3 %v4560_v22  ;;  %v4735_v22 = vld [vmem:[#allocation2 + $0x4e8] sm:$0xf]  ;;  %v2994_v27 = vpop.f32.mrf.mxu3  ;;  %v6172_v61 = vld [vmem:[#allocation2 + $0x4b4] sm:$0xf0] }
 0x10c   :  { %3208 = vmatpush.bf16.msrb.mxu0 %v4160_v32  ;;  %v6244_v32 = vld [vmem:[#allocation2 + $0x6f4] sm:$0xf0]  ;;  %v4704_v7 = vor.u32 %v6172_v61, %v4703_v60 }
 0x10d   :  { %3221 = vmatpush.bf16.msrb.mxu1 %v4288_v43  ;;  %3234 = vmatpush.bf16.msrb.mxu2 %v4416_v34  ;;  %v4240_v43 = vor.u32 %v6056_v12, %v4239_v11  ;;  %v4368_v34 = vor.u32 %v6088_v15, %v4367_v13  ;;  %v4992_v45 = vor.u32 %v6244_v32, %v4991_v31  ;;  %v6236_v2 = vld [vmem:[#allocation2 + $0x6b4] sm:$0xf0]  ;;  %v4815_v12 = vld [vmem:[#allocation2 + $0x588] sm:$0xf] }
 0x10e   :  { %v6168_v11 = vld [vmem:[#allocation2 + $0x494] sm:$0xf0]  ;;  %v4943_v15 = vld [vmem:[#allocation2 + $0x688] sm:$0xf] }
 0x10f   :  { %3247 = vmatpush.bf16.msrb.mxu3 %v4544_v39  ;;  %v4736_v39 = vor.u32 %v6180_v23, %v4735_v22  ;;  %v6232_v16 = vld [vmem:[#allocation2 + $0x694] sm:$0xf0]  ;;  %v4671_v31 = vld [vmem:[#allocation2 + $0x468] sm:$0xf] }
 0x110   :  { %3209 = vmatpush.bf16.msrb.mxu0 %v4144_v53  ;;  %v5103_v53 = vld [vmem:[#allocation2 + $0x7c8] sm:$0xf]  ;;  %v6264_v22 = vld [vmem:[#allocation2 + $0x794] sm:$0xf0]  ;;  %v4944_v55 = vor.u32 %v6232_v16, %v4943_v15 }
 0x111   :  { %3222 = vmatpush.bf16.msrb.mxu1 %v4272_v57  ;;  %3235 = vmatpush.bf16.msrb.mxu2 %v4400_v58  ;;  %v4720_v57 = vor.u32 %v6176_v47, %v4719_v46  ;;  %v4848_v58 = vor.u32 %v6208_v50, %v4847_v48  ;;  %v5104_v63 = vor.u32 %v6272_v54, %v5103_v53  ;;  %v6164_v32 = vld [vmem:[#allocation2 + $0x474] sm:$0xf0]  ;;  %v4655_v48 = vld [vmem:[#allocation2 + $0x448] sm:$0xf] }
 0x112   :  { %v6196_v36 = vld [vmem:[#allocation2 + $0x574] sm:$0xf0]  ;;  %v4783_v50 = vld [vmem:[#allocation2 + $0x548] sm:$0xf] }
 0x113   :  { %3248 = vmatpush.bf16.msrb.mxu3 %v4528_v62  ;;  %v4831_v62 = vld [vmem:[#allocation2 + $0x5a8] sm:$0xf]  ;;  %v6192_v52 = vld [vmem:[#allocation2 + $0x554] sm:$0xf0] }
 0x114   :  { %3210 = vmatpush.bf16.msrb.mxu0 %v4128_v5  ;;  %v6268_v5 = vld [vmem:[#allocation2 + $0x7b4] sm:$0xf0]  ;;  %v4832_v8 = vor.u32 %v6204_v0, %v4831_v62  ;;  %v4911_v53 = vld [vmem:[#allocation2 + $0x648] sm:$0xf] }
 0x115   :  { %3223 = vmatpush.bf16.msrb.mxu1 %v4256_v9  ;;  %3236 = vmatpush.bf16.msrb.mxu2 %v4384_v10  ;;  %v4960_v9 = vor.u32 %v6236_v2, %v4959_v1  ;;  %v4687_v10 = vld [vmem:[#allocation2 + $0x488] sm:$0xf]  ;;  %v5088_v13 = vor.u32 %v6268_v5, %v5087_v3  ;;  %v6224_v54 = vld [vmem:[#allocation2 + $0x654] sm:$0xf0]  ;;  %v4784_v1 = vor.u32 %v6192_v52, %v4783_v50 }
 0x116   :  { %v4688_v26 = vor.u32 %v6168_v11, %v4687_v10  ;;  %v4912_v2 = vor.u32 %v6224_v54, %v4911_v53  ;;  %v4639_v3 = vld [vmem:[#allocation2 + $0x428] sm:$0xf]  ;;  %v6156_v5 = vld [vmem:[#allocation2 + $0x434] sm:$0xf0] }
 0x117   :  { %3249 = vmatpush.bf16.msrb.mxu3 %v4512_v14  ;;  %v6200_v14 = vld [vmem:[#allocation2 + $0x594] sm:$0xf0]  ;;  %v4895_v10 = vld [vmem:[#allocation2 + $0x628] sm:$0xf] }
 0x118   :  { %3211 = vmatpush.bf16.msrb.mxu0 %v4112_v28  ;;  %v3005_v17 = vpop.f32.mrf.mxu0  ;;  %v4816_v28 = vor.u32 %v6200_v14, %v4815_v12  ;;  %v6220_v11 = vld [vmem:[#allocation2 + $0x634] sm:$0xf0]  ;;  %v5023_v12 = vld [vmem:[#allocation2 + $0x728] sm:$0xf]  ;;  %v4640_v14 = vor.u32 %v6156_v5, %v4639_v3 }
 0x119   :  { %3224 = vmatpush.bf16.msrb.mxu1 %v4240_v43  ;;  %3237 = vmatpush.bf16.msrb.mxu2 %v4368_v34  ;;  %v3006_v23 = vadd.f32 %v3005_v17, %v6819_v56  ;;  %v3018_v27 = vpop.f32.mrf.mxu1  ;;  %v4799_v43 = vld [vmem:[#allocation2 + $0x568] sm:$0xf]  ;;  %v5072_v34 = vor.u32 %v6264_v22, %v5071_v19  ;;  %v4672_v56 = vor.u32 %v6164_v32, %v4671_v31  ;;  %v6152_v16 = vld [vmem:[#allocation2 + $0x414] sm:$0xf0] }
 0x11a   :  { %v4800_v46 = vor.u32 %v6196_v36, %v4799_v43  ;;  %v4623_v15 = vld [vmem:[#allocation2 + $0x408] sm:$0xf]  ;;  %v4896_v19 = vor.u32 %v6220_v11, %v4895_v10  ;;  %v6248_v31 = vld [vmem:[#allocation2 + $0x714] sm:$0xf0] }
 0x11b   :  { %3250 = vmatpush.bf16.msrb.mxu3 %v4496_v37  ;;  %3212 = vmatmul.bf16.vlgmr.msrb.gmra.mxu0 %v6747_v20  ;;  %v6826_v35 = vadd.f32 %v3018_v27, %v3006_v23  ;;  %v4927_v37 = vld [vmem:[#allocation2 + $0x668] sm:$0xf]  ;;  %v6184_v23 = vld [vmem:[#allocation2 + $0x514] sm:$0xf0] }
 0x11c   :  { %3256 = vmatpush.bf16.msra.mxu0 %v4736_v39  ;;  %3238 = vmatmul.bf16.vlgmr.msrb.gmra.mxu2 %v6739_v4  ;;  %v6228_v39 = vld [vmem:[#allocation2 + $0x674] sm:$0xf0]  ;;  %v4751_v22 = vld [vmem:[#allocation2 + $0x508] sm:$0xf] }
 0x11d   :  { %3269 = vmatpush.bf16.msra.mxu1 %v4864_v40  ;;  %3282 = vmatpush.bf16.msra.mxu2 %v4992_v45  ;;  %v5055_v40 = vld [vmem:[#allocation2 + $0x768] sm:$0xf]  ;;  %v6260_v45 = vld [vmem:[#allocation2 + $0x774] sm:$0xf0]  ;;  %v4928_v47 = vor.u32 %v6228_v39, %v4927_v37  ;;  %v4624_v39 = vor.u32 %v6152_v16, %v4623_v15 }
 0x11e   :  { %3251 = vmatmul.bf16.vlgmr.msrb.gmra.mxu3 %v6744_v6  ;;  %3225 = vmatmul.bf16.vlgmr.msrb.gmra.mxu1 %v6750_v21  ;;  %v5056_v51 = vor.u32 %v6260_v45, %v5055_v40  ;;  %v5247_v43 = vld [vmem:[#allocation2 + $0x8e8] sm:$0xf]  ;;  %v6340_v40 = vld [vmem:[#allocation2 + $0x9f4] sm:$0xf0] }
 0x11f   :  { %3295 = vmatpush.bf16.msra.mxu3 %v5120_v49  ;;  %v6160_v49 = vld [vmem:[#allocation2 + $0x454] sm:$0xf0]  ;;  %v5375_v36 = vld [vmem:[#allocation2 + $0x9e8] sm:$0xf] }
 0x120   :  { %3257 = vmatpush.bf16.msra.mxu0 %v4720_v57  ;;  %v3007_v61 = vpop.f32.mrf.mxu0  ;;  %v4656_v62 = vor.u32 %v6160_v49, %v4655_v48  ;;  %v5503_v45 = vld [vmem:[#allocation2 + $0xae8] sm:$0xf]  ;;  %v6404_v49 = vld [vmem:[#allocation2 + $0xbf4] sm:$0xf0]  ;;  %v5376_v52 = vor.u32 %v6340_v40, %v5375_v36 }
 0x121   :  { %3270 = vmatpush.bf16.msra.mxu1 %v4848_v58  ;;  %3283 = vmatpush.bf16.msra.mxu2 %v4976_v59  ;;  %v3031_v57 = vpop.f32.mrf.mxu2  ;;  %v5039_v58 = vld [vmem:[#allocation2 + $0x748] sm:$0xf]  ;;  %v6256_v59 = vld [vmem:[#allocation2 + $0x754] sm:$0xf0]  ;;  %v3044_v60 = vpop.f32.mrf.mxu3 }
 0x122   :  { %v3020_v0 = vpop.f32.mrf.mxu1  ;;  %v5631_v48 = vld [vmem:[#allocation2 + $0xbe8] sm:$0xf]  ;;  %v6332_v11 = vld [vmem:[#allocation2 + $0x9b4] sm:$0xf0] }
 0x123   :  { %3296 = vmatpush.bf16.msra.mxu3 %v5104_v63  ;;  %v6828_v63 = vadd.f32 %v3044_v60, %v3031_v57  ;;  %v5231_v54 = vld [vmem:[#allocation2 + $0x8c8] sm:$0xf]  ;;  %v6304_v57 = vld [vmem:[#allocation2 + $0x8d4] sm:$0xf0] }
 0x124   :  { %3258 = vmatpush.bf16.msra.mxu0 %v4704_v7  ;;  %v4767_v7 = vld [vmem:[#allocation2 + $0x528] sm:$0xf]  ;;  %v6336_v60 = vld [vmem:[#allocation2 + $0x9d4] sm:$0xf0] }
 0x125   :  { %3271 = vmatpush.bf16.msra.mxu1 %v4832_v8  ;;  %3284 = vmatpush.bf16.msra.mxu2 %v4960_v9  ;;  %v5040_v8 = vor.u32 %v6256_v59, %v5039_v58  ;;  %v6188_v9 = vld [vmem:[#allocation2 + $0x534] sm:$0xf0]  ;;  %v5359_v58 = vld [vmem:[#allocation2 + $0x9c8] sm:$0xf]  ;;  %v5632_v59 = vor.u32 %v6404_v49, %v5631_v48 }
 0x126   :  { %v4768_v17 = vor.u32 %v6188_v9, %v4767_v7  ;;  %v5487_v61 = vld [vmem:[#allocation2 + $0xac8] sm:$0xf]  ;;  %v5360_v3 = vor.u32 %v6336_v60, %v5359_v58  ;;  %v6396_v15 = vld [vmem:[#allocation2 + $0xbb4] sm:$0xf0] }
 0x127   :  { %3297 = vmatpush.bf16.msra.mxu3 %v5088_v13  ;;  %v6252_v13 = vld [vmem:[#allocation2 + $0x734] sm:$0xf0]  ;;  %v5615_v0 = vld [vmem:[#allocation2 + $0xbc8] sm:$0xf] }
 0x128   :  { %3259 = vmatpush.bf16.msra.mxu0 %v4688_v26  ;;  %v4879_v26 = vld [vmem:[#allocation2 + $0x608] sm:$0xf]  ;;  %v5024_v27 = vor.u32 %v6252_v13, %v5023_v12  ;;  %v6364_v13 = vld [vmem:[#allocation2 + $0xab4] sm:$0xf0] }
 0x129   :  { %3272 = vmatpush.bf16.msra.mxu1 %v4816_v28  ;;  %3285 = vmatpush.bf16.msra.mxu2 %v4944_v55  ;;  %v6216_v28 = vld [vmem:[#allocation2 + $0x614] sm:$0xf0]  ;;  %v5007_v55 = vld [vmem:[#allocation2 + $0x708] sm:$0xf]  ;;  %v3033_v32 = vpop.f32.mrf.mxu2  ;;  %v3046_v37 = vpop.f32.mrf.mxu3 }
 0x12a   :  { %v5008_v50 = vor.u32 %v6248_v31, %v5007_v55  ;;  %v5215_v7 = vld [vmem:[#allocation2 + $0x8a8] sm:$0xf]  ;;  %v6360_v31 = vld [vmem:[#allocation2 + $0xa94] sm:$0xf0] }
 0x12b   :  { %3298 = vmatpush.bf16.msra.mxu3 %v5072_v34  ;;  %v6308_v34 = vld [vmem:[#allocation2 + $0x8f4] sm:$0xf0]  ;;  %v5343_v9 = vld [vmem:[#allocation2 + $0x9a8] sm:$0xf] }
 0x12c   :  { %3260 = vmatpush.bf16.msra.mxu0 %v4672_v56  ;;  %v6372_v56 = vld [vmem:[#allocation2 + $0xaf4] sm:$0xf0]  ;;  %v5471_v12 = vld [vmem:[#allocation2 + $0xaa8] sm:$0xf] }
 0x12d   :  { %3273 = vmatpush.bf16.msra.mxu1 %v4800_v46  ;;  %3286 = vmatpush.bf16.msra.mxu2 %v4928_v47  ;;  %v4752_v46 = vor.u32 %v6184_v23, %v4751_v22  ;;  %v4880_v47 = vor.u32 %v6216_v28, %v4879_v26  ;;  %v5504_v53 = vor.u32 %v6372_v56, %v5503_v45  ;;  %v5199_v22 = vld [vmem:[#allocation2 + $0x888] sm:$0xf]  ;;  %v6296_v23 = vld [vmem:[#allocation2 + $0x894] sm:$0xf0] }
 0x12e   :  { %v5327_v26 = vld [vmem:[#allocation2 + $0x988] sm:$0xf]  ;;  %v6328_v28 = vld [vmem:[#allocation2 + $0x994] sm:$0xf0] }
 0x12f   :  { %3299 = vmatpush.bf16.msra.mxu3 %v5056_v51  ;;  %v5248_v51 = vor.u32 %v6308_v34, %v5247_v43  ;;  %v5455_v55 = vld [vmem:[#allocation2 + $0xa88] sm:$0xf]  ;;  %v6392_v43 = vld [vmem:[#allocation2 + $0xb94] sm:$0xf0]  ;;  %v5200_v34 = vor.u32 %v6296_v23, %v5199_v22  ;;  %v5328_v37 = vor.u32 %v6328_v28, %v5327_v26 }
 0x130   :  { %3261 = vmatpush.bf16.msra.mxu0 %v4656_v62  ;;  %v6368_v62 = vld [vmem:[#allocation2 + $0xad4] sm:$0xf0]  ;;  %v5583_v32 = vld [vmem:[#allocation2 + $0xb88] sm:$0xf] }
 0x131   :  { %3274 = vmatpush.bf16.msra.mxu1 %v4784_v1  ;;  %3287 = vmatpush.bf16.msra.mxu2 %v4912_v2  ;;  %v6400_v1 = vld [vmem:[#allocation2 + $0xbd4] sm:$0xf0]  ;;  %v5232_v2 = vor.u32 %v6304_v57, %v5231_v54  ;;  %v5488_v5 = vor.u32 %v6368_v62, %v5487_v61  ;;  %v5183_v40 = vld [vmem:[#allocation2 + $0x868] sm:$0xf]  ;;  %v5584_v48 = vor.u32 %v6392_v43, %v5583_v32 }
 0x132   :  { %v5616_v10 = vor.u32 %v6400_v1, %v5615_v0  ;;  %v6292_v45 = vld [vmem:[#allocation2 + $0x874] sm:$0xf0]  ;;  %v5311_v56 = vld [vmem:[#allocation2 + $0x968] sm:$0xf] }
 0x133   :  { %3300 = vmatpush.bf16.msra.mxu3 %v5040_v8  ;;  %v6300_v8 = vld [vmem:[#allocation2 + $0x8b4] sm:$0xf0]  ;;  %v5184_v57 = vor.u32 %v6292_v45, %v5183_v40  ;;  %v5167_v60 = vld [vmem:[#allocation2 + $0x848] sm:$0xf] }
 0x134   :  { %3262 = vmatpush.bf16.msra.mxu0 %v4640_v14  ;;  %v5599_v14 = vld [vmem:[#allocation2 + $0xba8] sm:$0xf]  ;;  %v5216_v16 = vor.u32 %v6300_v8, %v5215_v7  ;;  %v6324_v49 = vld [vmem:[#allocation2 + $0x974] sm:$0xf0] }
 0x135   :  { %3275 = vmatpush.bf16.msra.mxu1 %v4768_v17  ;;  %3288 = vmatpush.bf16.msra.mxu2 %v4896_v19  ;;  %v5344_v17 = vor.u32 %v6332_v11, %v5343_v9  ;;  %v5472_v19 = vor.u32 %v6364_v13, %v5471_v12  ;;  %v5312_v58 = vor.u32 %v6324_v49, %v5311_v56  ;;  %v6288_v61 = vld [vmem:[#allocation2 + $0x854] sm:$0xf0]  ;;  %v5295_v62 = vld [vmem:[#allocation2 + $0x948] sm:$0xf] }
 0x136   :  { %v6320_v1 = vld [vmem:[#allocation2 + $0x954] sm:$0xf0]  ;;  %v5551_v8 = vld [vmem:[#allocation2 + $0xb48] sm:$0xf] }
 0x137   :  { %3301 = vmatpush.bf16.msra.mxu3 %v5024_v27  ;;  %v5600_v27 = vor.u32 %v6396_v15, %v5599_v14  ;;  %v6384_v9 = vld [vmem:[#allocation2 + $0xb54] sm:$0xf0]  ;;  %v5296_v13 = vor.u32 %v6320_v1, %v5295_v62  ;;  %v5151_v15 = vld [vmem:[#allocation2 + $0x828] sm:$0xf]  ;;  %v4353_v62 = vld [vmem:[#allocation2 + $0x1f8] sm:$0xf0] }
 0x138   :  { %3263 = vmatpush.bf16.msra.mxu0 %v4624_v39  ;;  %v3057_v36 = vpop.f32.mrf.mxu0  ;;  %v5456_v39 = vor.u32 %v6360_v31, %v5455_v55  ;;  %v5552_v22 = vor.u32 %v6384_v9, %v5551_v8  ;;  %v6316_v23 = vld [vmem:[#allocation2 + $0x934] sm:$0xf0]  ;;  %v5407_v26 = vld [vmem:[#allocation2 + $0xa28] sm:$0xf] }
 0x139   :  { %3276 = vmatpush.bf16.msra.mxu1 %v4752_v46  ;;  %3289 = vmatpush.bf16.msra.mxu2 %v4880_v47  ;;  %v3058_v46 = vadd.f32 %v3057_v36, %v6828_v63  ;;  %v5535_v28 = vld [vmem:[#allocation2 + $0xb28] sm:$0xf]  ;;  %v6380_v55 = vld [vmem:[#allocation2 + $0xb34] sm:$0xf0] }
 0x13a   :  { %v5135_v32 = vld [vmem:[#allocation2 + $0x808] sm:$0xf]  ;;  %v6280_v43 = vld [vmem:[#allocation2 + $0x814] sm:$0xf0]  ;;  %v5536_v56 = vor.u32 %v6380_v55, %v5535_v28  ;;  %v6042_v28 = vld [vmem:[#allocation2 + $0xac] sm:$0xf] }
 0x13b   :  { %3302 = vmatpush.bf16.msra.mxu3 %v5008_v50  ;;  %3264 = vmatmul.bf16.vlgmr.msra.gmra.mxu0 %v6762_v41  ;;  %v3070_v47 = vpop.f32.mrf.mxu1  ;;  %v5439_v50 = vld [vmem:[#allocation2 + $0xa68] sm:$0xf]  ;;  %v6464_v9 = vld [vmem:[#allocation2 + $0xdd4] sm:$0xf0]  ;;  %v4193_v55 = vld [vmem:[#allocation2 + $0xb8] sm:$0xf0] }
 0x13c   :  { %3308 = vmatpush.bf16.msrb.mxu0 %v5248_v51  ;;  %3290 = vmatmul.bf16.vlgmr.msra.gmra.mxu2 %v6760_v38  ;;  %v6356_v51 = vld [vmem:[#allocation2 + $0xa74] sm:$0xf0]  ;;  %v3071_v54 = vadd.f32 %v3070_v47, %v3058_v46  ;;  %v5391_v40 = vld [vmem:[#allocation2 + $0xa08] sm:$0xf] }
 0x13d   :  { %3321 = vmatpush.bf16.msrb.mxu1 %v5376_v52  ;;  %3334 = vmatpush.bf16.msrb.mxu2 %v5504_v53  ;;  %v5567_v52 = vld [vmem:[#allocation2 + $0xb68] sm:$0xf]  ;;  %v6388_v53 = vld [vmem:[#allocation2 + $0xb74] sm:$0xf0] }
 0x13e   :  { %3303 = vmatmul.bf16.vlgmr.msra.gmra.mxu3 %v6764_v42  ;;  %3277 = vmatmul.bf16.vlgmr.msra.gmra.mxu1 %v6766_v44  ;;  %v5568_v63 = vor.u32 %v6388_v53, %v5567_v52  ;;  %v6344_v46 = vld [vmem:[#allocation2 + $0xa14] sm:$0xf0]  ;;  %v5519_v47 = vld [vmem:[#allocation2 + $0xb08] sm:$0xf]  ;;  %v5136_v53 = vor.u32 %v6280_v43, %v5135_v32  ;;  %v4321_v32 = vld [vmem:[#allocation2 + $0x1b8] sm:$0xf0] }
 0x13f   :  { %3347 = vmatpush.bf16.msrb.mxu3 %v5632_v59  ;;  %v5440_v59 = vor.u32 %v6356_v51, %v5439_v50  ;;  %v3083_v0 = vpop.f32.mrf.mxu2  ;;  %v5759_v50 = vld [vmem:[#allocation2 + $0xce8] sm:$0xf]  ;;  %v6436_v51 = vld [vmem:[#allocation2 + $0xcf4] sm:$0xf0] }
 0x140   :  { %3309 = vmatpush.bf16.msrb.mxu0 %v5232_v2  ;;  %v5423_v2 = vld [vmem:[#allocation2 + $0xa48] sm:$0xf]  ;;  %v3059_v12 = vpop.f32.mrf.mxu0 }
 0x141   :  { %3322 = vmatpush.bf16.msrb.mxu1 %v5360_v3  ;;  %3335 = vmatpush.bf16.msrb.mxu2 %v5488_v5  ;;  %v6352_v3 = vld [vmem:[#allocation2 + $0xa54] sm:$0xf0]  ;;  %v3084_v5 = vadd.f32 %v3083_v0, %v3071_v54  ;;  %v3096_v7 = vpop.f32.mrf.mxu3  ;;  %v5887_v52 = vld [vmem:[#allocation2 + $0xde8] sm:$0xf]  ;;  %v4209_v12 = vld [vmem:[#allocation2 + $0xd8] sm:$0xf0] }
 0x142   :  { %v5424_v14 = vor.u32 %v6352_v3, %v5423_v2  ;;  %v6468_v54 = vld [vmem:[#allocation2 + $0xdf4] sm:$0xf0]  ;;  %v5743_v3 = vld [vmem:[#allocation2 + $0xcc8] sm:$0xf] }
 0x143   :  { %3348 = vmatpush.bf16.msrb.mxu3 %v5616_v10  ;;  %v5168_v10 = vor.u32 %v6288_v61, %v5167_v60  ;;  %v6835_v11 = vadd.f32 %v3096_v7, %v3084_v5  ;;  %v5392_v60 = vor.u32 %v6344_v46, %v5391_v40  ;;  %v6082_v61 = vld [vmem:[#allocation2 + $0x1ec] sm:$0xf]  ;;  %v5888_v1 = vor.u32 %v6468_v54, %v5887_v52  ;;  %v6432_v5 = vld [vmem:[#allocation2 + $0xcd4] sm:$0xf0]  ;;  %v5871_v7 = vld [vmem:[#allocation2 + $0xdc8] sm:$0xf] }
 0x144   :  { %3310 = vmatpush.bf16.msrb.mxu0 %v5216_v16  ;;  %v6284_v16 = vld [vmem:[#allocation2 + $0x834] sm:$0xf0]  ;;  %v4356_v8 = vor.u32 %v6082_v61, %v4353_v62  ;;  %v5839_v40 = vld [vmem:[#allocation2 + $0xd88] sm:$0xf]  ;;  %v6038_v46 = vld [vmem:[#allocation2 + $0x8c] sm:$0xf]  ;;  %v3596_v52 = vmul.f32 %v6826_v35, %v6826_v35 }
 0x145   :  { %3323 = vmatpush.bf16.msrb.mxu1 %v5344_v17  ;;  %3336 = vmatpush.bf16.msrb.mxu2 %v5472_v19  ;;  %v5279_v17 = vld [vmem:[#allocation2 + $0x928] sm:$0xf]  ;;  %v3072_v19 = vpop.f32.mrf.mxu1  ;;  %v5152_v31 = vor.u32 %v6284_v16, %v5151_v15  ;;  %v5744_v15 = vor.u32 %v6432_v5, %v5743_v3  ;;  %v5872_v16 = vor.u32 %v6464_v9, %v5871_v7  ;;  %v6420_v61 = vld [vmem:[#allocation2 + $0xc74] sm:$0xf0]  ;;  %v4161_v3 = vld [vmem:[#allocation2 + $0x78] sm:$0xf0] }
 0x146   :  { %v5727_v19 = vld [vmem:[#allocation2 + $0xca8] sm:$0xf]  ;;  %v6066_v5 = vld [vmem:[#allocation2 + $0x16c] sm:$0xf]  ;;  %v4289_v7 = vld [vmem:[#allocation2 + $0x178] sm:$0xf0] }
 0x147   :  { %3349 = vmatpush.bf16.msrb.mxu3 %v5600_v27  ;;  %v6348_v27 = vld [vmem:[#allocation2 + $0xa34] sm:$0xf0]  ;;  %v3085_v45 = vpop.f32.mrf.mxu2  ;;  %v5823_v62 = vld [vmem:[#allocation2 + $0xd68] sm:$0xf] }
 0x148   :  { %3311 = vmatpush.bf16.msrb.mxu0 %v5200_v34  ;;  %v5280_v34 = vor.u32 %v6316_v23, %v5279_v17  ;;  %v5408_v36 = vor.u32 %v6348_v27, %v5407_v26  ;;  %v5855_v23 = vld [vmem:[#allocation2 + $0xda8] sm:$0xf]  ;;  %v6460_v27 = vld [vmem:[#allocation2 + $0xdb4] sm:$0xf0] }
 0x149   :  { %3324 = vmatpush.bf16.msrb.mxu1 %v5328_v37  ;;  %3337 = vmatpush.bf16.msrb.mxu2 %v5456_v39  ;;  %v5263_v37 = vld [vmem:[#allocation2 + $0x908] sm:$0xf]  ;;  %v6312_v39 = vld [vmem:[#allocation2 + $0x914] sm:$0xf0]  ;;  %v3098_v49 = vpop.f32.mrf.mxu3 }
 0x14a   :  { %v6070_v49 = vld [vmem:[#allocation2 + $0x18c] sm:$0xf] }
 0x14b   :  { %3350 = vmatpush.bf16.msrb.mxu3 %v5584_v48  ;;  %v6376_v48 = vld [vmem:[#allocation2 + $0xb14] sm:$0xf0] }
 0x14c   :  { %3312 = vmatpush.bf16.msrb.mxu0 %v5184_v57  ;;  %v6050_v57 = vld [vmem:[#allocation2 + $0xec] sm:$0xf]  ;;  %v5520_v0 = vor.u32 %v6376_v48, %v5519_v47  ;;  %v4177_v47 = vld [vmem:[#allocation2 + $0x98] sm:$0xf0] }
 0x14d   :  { %3325 = vmatpush.bf16.msrb.mxu1 %v5312_v58  ;;  %3338 = vmatpush.bf16.msrb.mxu2 %v5440_v59  ;;  %v4225_v58 = vld [vmem:[#allocation2 + $0xf8] sm:$0xf0]  ;;  %v5264_v59 = vor.u32 %v6312_v39, %v5263_v37  ;;  %v5711_v37 = vld [vmem:[#allocation2 + $0xc88] sm:$0xf]  ;;  %v6424_v39 = vld [vmem:[#allocation2 + $0xc94] sm:$0xf0] }
 0x14e   :  { %v4228_v2 = vor.u32 %v6050_v57, %v4225_v58  ;;  %v5712_v54 = vor.u32 %v6424_v39, %v5711_v37 }
 0x14f   :  { %3351 = vmatpush.bf16.msrb.mxu3 %v5568_v63  ;;  %v5760_v63 = vor.u32 %v6436_v51, %v5759_v50  ;;  %v4305_v50 = vld [vmem:[#allocation2 + $0x198] sm:$0xf0]  ;;  %v3568_v51 = vrot.slane %v6826_v35, 4 }
 0x150   :  { %3313 = vmatpush.bf16.msrb.mxu0 %v5168_v10  ;;  %v6046_v10 = vld [vmem:[#allocation2 + $0xcc] sm:$0xf] }
 0x151   :  { %3326 = vmatpush.bf16.msrb.mxu1 %v5296_v13  ;;  %3339 = vmatpush.bf16.msrb.mxu2 %v5424_v14  ;;  %v6078_v13 = vld [vmem:[#allocation2 + $0x1cc] sm:$0xf]  ;;  %v4337_v14 = vld [vmem:[#allocation2 + $0x1d8] sm:$0xf0]  ;;  %v4212_v17 = vor.u32 %v6046_v10, %v4209_v12 }
 0x152   :  { %v4340_v26 = vor.u32 %v6078_v13, %v4337_v14  ;;  %v5679_v13 = vld [vmem:[#allocation2 + $0xc48] sm:$0xf]  ;;  %v6416_v14 = vld [vmem:[#allocation2 + $0xc54] sm:$0xf0] }
 0x153   :  { %3352 = vmatpush.bf16.msrb.mxu3 %v5552_v22  ;;  %v6428_v22 = vld [vmem:[#allocation2 + $0xcb4] sm:$0xf0] }
 0x154   :  { %3314 = vmatpush.bf16.msrb.mxu0 %v5152_v31  ;;  %v6074_v31 = vld [vmem:[#allocation2 + $0x1ac] sm:$0xf]  ;;  %v5728_v43 = vor.u32 %v6428_v22, %v5727_v19  ;;  %v6448_v19 = vld [vmem:[#allocation2 + $0xd54] sm:$0xf0] }
 0x155   :  { %3327 = vmatpush.bf16.msrb.mxu1 %v5280_v34  ;;  %3340 = vmatpush.bf16.msrb.mxu2 %v5408_v36  ;;  %v5856_v34 = vor.u32 %v6460_v27, %v5855_v23  ;;  %v4196_v36 = vor.u32 %v6042_v28, %v4193_v55  ;;  %v4324_v45 = vor.u32 %v6074_v31, %v4321_v32  ;;  %v6030_v22 = vld [vmem:[#allocation2 + $0x4c] sm:$0xf]  ;;  %v4145_v23 = vld [vmem:[#allocation2 + $0x58] sm:$0xf0] }
 0x156   :  { %v6062_v28 = vld [vmem:[#allocation2 + $0x14c] sm:$0xf]  ;;  %v4273_v55 = vld [vmem:[#allocation2 + $0x158] sm:$0xf0] }
 0x157   :  { %3353 = vmatpush.bf16.msrb.mxu3 %v5536_v56  ;;  %v6456_v56 = vld [vmem:[#allocation2 + $0xd94] sm:$0xf0] }
 0x158   :  { %3315 = vmatpush.bf16.msrb.mxu0 %v5136_v53  ;;  %v3109_v48 = vpop.f32.mrf.mxu0  ;;  %v5840_v58 = vor.u32 %v6456_v56, %v5839_v40  ;;  %v4148_v40 = vor.u32 %v6030_v22, %v4145_v23  ;;  %v6412_v56 = vld [vmem:[#allocation2 + $0xc34] sm:$0xf0]  ;;  %v4865_v22 = vld [vmem:[#allocation2 + $0x5f8] sm:$0xf0] }
 0x159   :  { %3328 = vmatpush.bf16.msrb.mxu1 %v5264_v59  ;;  %3341 = vmatpush.bf16.msrb.mxu2 %v5392_v60  ;;  %v3110_v53 = vadd.f32 %v3109_v48, %v6835_v11  ;;  %v4180_v59 = vor.u32 %v6038_v46, %v4177_v47  ;;  %v5695_v60 = vld [vmem:[#allocation2 + $0xc68] sm:$0xf]  ;;  %v3600_v11 = vrot.slane %v3596_v52, 4  ;;  %v4276_v47 = vor.u32 %v6062_v28, %v4273_v55  ;;  %v6444_v48 = vld [vmem:[#allocation2 + $0xd34] sm:$0xf0] }
 0x15a   :  { %v5696_v9 = vor.u32 %v6420_v61, %v5695_v60  ;;  %v5791_v46 = vld [vmem:[#allocation2 + $0xd28] sm:$0xf] }
 0x15b   :  { %3354 = vmatpush.bf16.msrb.mxu3 %v5520_v0  ;;  %3316 = vmatmul.bf16.vlgmr.msrb.gmra.mxu0 %v6778_v25  ;;  %v3122_v57 = vpop.f32.mrf.mxu1  ;;  %v4308_v0 = vor.u32 %v6070_v49, %v4305_v50  ;;  %v6026_v49 = vld [vmem:[#allocation2 + $0x2c] sm:$0xf]  ;;  %v4129_v50 = vld [vmem:[#allocation2 + $0x38] sm:$0xf0]  ;;  %v5775_v61 = vld [vmem:[#allocation2 + $0xd08] sm:$0xf] }
 0x15c   :  { %3360 = vmatpush.bf16.msra.mxu0 %v5760_v63  ;;  %3342 = vmatmul.bf16.vlgmr.msrb.gmra.mxu2 %v6780_v29  ;;  %v3123_v63 = vadd.f32 %v3122_v57, %v3110_v53  ;;  %v4257_v53 = vld [vmem:[#allocation2 + $0x138] sm:$0xf0]  ;;  %v5647_v57 = vld [vmem:[#allocation2 + $0xc08] sm:$0xf]  ;;  %v4132_v60 = vor.u32 %v6026_v49, %v4129_v50 }
 0x15d   :  { %3373 = vmatpush.bf16.msra.mxu1 %v5888_v1  ;;  %3386 = vmatpush.bf16.msra.mxu2 %v4228_v2  ;;  %v6452_v1 = vld [vmem:[#allocation2 + $0xd74] sm:$0xf0]  ;;  %v6034_v2 = vld [vmem:[#allocation2 + $0x6c] sm:$0xf] }
 0x15e   :  { %3329 = vmatmul.bf16.vlgmr.msrb.gmra.mxu1 %v6782_v30  ;;  %3355 = vmatmul.bf16.vlgmr.msrb.gmra.mxu3 %v6784_v33  ;;  %v5824_v10 = vor.u32 %v6452_v1, %v5823_v62  ;;  %v4164_v12 = vor.u32 %v6034_v2, %v4161_v3  ;;  %v6440_v62 = vld [vmem:[#allocation2 + $0xd14] sm:$0xf0]  ;;  %v4113_v2 = vld [vmem:[#allocation2 + $0x18] sm:$0xf0]  ;;  %v6054_v3 = vld [vmem:[#allocation2 + $0x10c] sm:$0xf] }
 0x15f   :  { %3399 = vmatpush.bf16.msra.mxu3 %v4356_v8  ;;  %v3569_v8 = vadd.f32 %v3568_v51, %v6826_v35  ;;  %v6058_v51 = vld [vmem:[#allocation2 + $0x12c] sm:$0xf] }
 0x160   :  { %3361 = vmatpush.bf16.msra.mxu0 %v5744_v15  ;;  %v5807_v15 = vld [vmem:[#allocation2 + $0xd48] sm:$0xf]  ;;  %v3111_v31 = vpop.f32.mrf.mxu0  ;;  %v4260_v1 = vor.u32 %v6058_v51, %v4257_v53  ;;  %v6106_v53 = vld [vmem:[#allocation2 + $0x2ac] sm:$0xf] }
 0x161   :  { %3374 = vmatpush.bf16.msra.mxu1 %v5872_v16  ;;  %3387 = vmatpush.bf16.msra.mxu2 %v4212_v17  ;;  %v4292_v16 = vor.u32 %v6066_v5, %v4289_v7  ;;  %v3135_v17 = vpop.f32.mrf.mxu2  ;;  %v3148_v27 = vpop.f32.mrf.mxu3  ;;  %v3570_v32 = vrot.slane %v3569_v8, 2  ;;  %v5808_v39 = vor.u32 %v6448_v19, %v5807_v15  ;;  %v4241_v5 = vld [vmem:[#allocation2 + $0x118] sm:$0xf0]  ;;  %v6178_v15 = vld [vmem:[#allocation2 + $0x4ec] sm:$0xf] }
 0x163   :  { %3400 = vmatpush.bf16.msra.mxu3 %v4340_v26  ;;  %v3136_v26 = vadd.f32 %v3135_v17, %v3123_v63  ;;  %v3571_v63 = vadd.f32 %v3570_v32, %v3569_v8  ;;  %v5776_v17 = vor.u32 %v6440_v62, %v5775_v61  ;;  %v6210_v8 = vld [vmem:[#allocation2 + $0x5ec] sm:$0xf]  ;;  %v4833_v62 = vld [vmem:[#allocation2 + $0x5b8] sm:$0xf0] }
 0x164   :  { %3362 = vmatpush.bf16.msra.mxu0 %v5728_v43  ;;  %v3601_v43 = vadd.f32 %v3600_v11, %v3596_v52  ;;  %v6114_v11 = vld [vmem:[#allocation2 + $0x2ec] sm:$0xf] }
 0x165   :  { %3375 = vmatpush.bf16.msra.mxu1 %v5856_v34  ;;  %3388 = vmatpush.bf16.msra.mxu2 %v4196_v36  ;;  %v5680_v34 = vor.u32 %v6416_v14, %v5679_v13  ;;  %v3124_v36 = vpop.f32.mrf.mxu1  ;;  %v6846_v37 = vadd.f32 %v3148_v27, %v3136_v26  ;;  %v4609_v14 = vld [vmem:[#allocation2 + $0x3f8] sm:$0xf0]  ;;  %v3572_v23 = vrot.slane %v3571_v63, 1  ;;  %v4244_v27 = vor.u32 %v6054_v3, %v4241_v5  ;;  %v6110_v32 = vld [vmem:[#allocation2 + $0x2cc] sm:$0xf] }
 0x166   :  { %v3602_v52 = vrot.slane %v3601_v43, 2  ;;  %v6142_v36 = vld [vmem:[#allocation2 + $0x3cc] sm:$0xf] }
 0x167   :  { %3401 = vmatpush.bf16.msra.mxu3 %v4324_v45  ;;  %v5663_v45 = vld [vmem:[#allocation2 + $0xc28] sm:$0xf]  ;;  %v6202_v61 = vld [vmem:[#allocation2 + $0x5ac] sm:$0xf] }
 0x168   :  { %3363 = vmatpush.bf16.msra.mxu0 %v5712_v54  ;;  %v5664_v54 = vor.u32 %v6412_v56, %v5663_v45  ;;  %v3603_v26 = vadd.f32 %v3602_v52, %v3601_v43  ;;  %v6174_v45 = vld [vmem:[#allocation2 + $0x4cc] sm:$0xf]  ;;  %v4721_v56 = vld [vmem:[#allocation2 + $0x4d8] sm:$0xf0] }
 0x169   :  { %3376 = vmatpush.bf16.msra.mxu1 %v5840_v58  ;;  %3389 = vmatpush.bf16.msra.mxu2 %v4180_v59  ;;  %v6408_v58 = vld [vmem:[#allocation2 + $0xc14] sm:$0xf0]  ;;  %v5792_v59 = vor.u32 %v6444_v48, %v5791_v46  ;;  %v3137_v7 = vpop.f32.mrf.mxu2  ;;  %v6206_v46 = vld [vmem:[#allocation2 + $0x5cc] sm:$0xf]  ;;  %v3573_v48 = vadd.f32 %v3572_v23, %v3571_v63  ;;  %v4724_v51 = vor.u32 %v6174_v45, %v4721_v56  ;;  %v4449_v52 = vld [vmem:[#allocation2 + $0x2b8] sm:$0xf0] }
 0x16a   :  { %v5648_v13 = vor.u32 %v6408_v58, %v5647_v57  ;;  %v3604_v49 = vrot.slane %v3603_v26, 1  ;;  %v4577_v58 = vld [vmem:[#allocation2 + $0x3b8] sm:$0xf0]  ;;  %v6102_v5 = vld [vmem:[#allocation2 + $0x28c] sm:$0xf] }
 0x16b   :  { %3402 = vmatpush.bf16.msra.mxu3 %v4308_v0  ;;  %v6022_v0 = vld [vmem:[#allocation2 + $0xc] sm:$0xf]  ;;  %v4433_v7 = vld [vmem:[#allocation2 + $0x298] sm:$0xf0] }
 0x16c   :  { %3364 = vmatpush.bf16.msra.mxu0 %v5696_v9  ;;  %v4481_v9 = vld [vmem:[#allocation2 + $0x2f8] sm:$0xf0]  ;;  %v4116_v19 = vor.u32 %v6022_v0, %v4113_v2  ;;  %v6851_v0 = vmul.f32 0.125, %v3573_v48  ;;  %v3605_v63 = vadd.f32 %v3604_v49, %v3603_v26  ;;  %v6098_v26 = vld [vmem:[#allocation2 + $0x26c] sm:$0xf] }
 0x16d   :  { %3377 = vmatpush.bf16.msra.mxu1 %v5824_v10  ;;  %3390 = vmatpush.bf16.msra.mxu2 %v4164_v12  ;;  %v6146_v10 = vld [vmem:[#allocation2 + $0x3ec] sm:$0xf]  ;;  %v3150_v12 = vpop.f32.mrf.mxu3  ;;  %v4484_v28 = vor.u32 %v6114_v11, %v4481_v9  ;;  %v4836_v9 = vor.u32 %v6202_v61, %v4833_v62  ;;  %v4401_v48 = vld [vmem:[#allocation2 + $0x258] sm:$0xf0] }
 0x16e   :  { %v4612_v55 = vor.u32 %v6146_v10, %v4609_v14  ;;  %v6134_v11 = vld [vmem:[#allocation2 + $0x38c] sm:$0xf]  ;;  %v4561_v10 = vld [vmem:[#allocation2 + $0x398] sm:$0xf0] }
 0x16f   :  { %3403 = vmatpush.bf16.msra.mxu3 %v4292_v16  ;;  %v4737_v16 = vld [vmem:[#allocation2 + $0x4f8] sm:$0xf0]  ;;  %v6166_v12 = vld [vmem:[#allocation2 + $0x48c] sm:$0xf] }
 0x170   :  { %3365 = vmatpush.bf16.msra.mxu0 %v5680_v34  ;;  %v4740_v31 = vor.u32 %v6178_v15, %v4737_v16  ;;  %v4465_v34 = vld [vmem:[#allocation2 + $0x2d8] sm:$0xf0]  ;;  %v6198_v14 = vld [vmem:[#allocation2 + $0x58c] sm:$0xf]  ;;  %v3624_v16 = vmul.f32 0.125, %v3605_v63 }
 0x171   :  { %3378 = vmatpush.bf16.msra.mxu1 %v5808_v39  ;;  %3391 = vmatpush.bf16.msra.mxu2 %v4148_v40  ;;  %v4868_v39 = vor.u32 %v6210_v8, %v4865_v22  ;;  %v4593_v40 = vld [vmem:[#allocation2 + $0x3d8] sm:$0xf0]  ;;  %v4468_v43 = vor.u32 %v6110_v32, %v4465_v34  ;;  %v4564_v22 = vor.u32 %v6134_v11, %v4561_v10  ;;  %v6162_v34 = vld [vmem:[#allocation2 + $0x46c] sm:$0xf] }
 0x172   :  { %v4596_v50 = vor.u32 %v6142_v36, %v4593_v40  ;;  %v4817_v15 = vld [vmem:[#allocation2 + $0x598] sm:$0xf0]  ;;  %v6126_v49 = vld [vmem:[#allocation2 + $0x34c] sm:$0xf] }
 0x173   :  { %3404 = vmatpush.bf16.msra.mxu3 %v4276_v47  ;;  %v4849_v47 = vld [vmem:[#allocation2 + $0x5d8] sm:$0xf0]  ;;  %v6090_v63 = vld [vmem:[#allocation2 + $0x22c] sm:$0xf] }
 0x174   :  { %3366 = vmatpush.bf16.msra.mxu0 %v5664_v54  ;;  %v6138_v54 = vld [vmem:[#allocation2 + $0x3ac] sm:$0xf]  ;;  %v4852_v57 = vor.u32 %v6206_v46, %v4849_v47  ;;  %v4545_v32 = vld [vmem:[#allocation2 + $0x378] sm:$0xf0] }
 0x175   :  { %3379 = vmatpush.bf16.msra.mxu1 %v5792_v59  ;;  %3392 = vmatpush.bf16.msra.mxu2 %v4132_v60  ;;  %v6170_v59 = vld [vmem:[#allocation2 + $0x4ac] sm:$0xf]  ;;  %v4705_v60 = vld [vmem:[#allocation2 + $0x4b8] sm:$0xf0]  ;;  %v4580_v2 = vor.u32 %v6138_v54, %v4577_v58 }
 0x176   :  { %v4708_v3 = vor.u32 %v6170_v59, %v4705_v60  ;;  %v4673_v36 = vld [vmem:[#allocation2 + $0x478] sm:$0xf0]  ;;  %v6094_v47 = vld [vmem:[#allocation2 + $0x24c] sm:$0xf] }
 0x177   :  { %3405 = vmatpush.bf16.msra.mxu3 %v4260_v1  ;;  %v4452_v1 = vor.u32 %v6106_v53, %v4449_v52  ;;  %v4801_v40 = vld [vmem:[#allocation2 + $0x578] sm:$0xf0]  ;;  %v4676_v46 = vor.u32 %v6162_v34, %v4673_v36  ;;  %v6158_v53 = vld [vmem:[#allocation2 + $0x44c] sm:$0xf]  ;;  %v4404_v62 = vor.u32 %v6094_v47, %v4401_v48 }
 0x178   :  { %3367 = vmatpush.bf16.msra.mxu0 %v5648_v13  ;;  %v4689_v13 = vld [vmem:[#allocation2 + $0x498] sm:$0xf0]  ;;  %v6190_v58 = vld [vmem:[#allocation2 + $0x54c] sm:$0xf] }
 0x179   :  { %3380 = vmatpush.bf16.msra.mxu1 %v5776_v17  ;;  %3393 = vmatpush.bf16.msra.mxu2 %v4116_v19  ;;  %v3628_v17 = vmul.f32 %v6851_v0, %v6851_v0  ;;  %v4436_v19 = vor.u32 %v6102_v5, %v4433_v7  ;;  %v4692_v23 = vor.u32 %v6166_v12, %v4689_v13  ;;  %v4657_v52 = vld [vmem:[#allocation2 + $0x458] sm:$0xf0]  ;;  %v6122_v11 = vld [vmem:[#allocation2 + $0x32c] sm:$0xf] }
 0x17a   :  { %v4785_v59 = vld [vmem:[#allocation2 + $0x558] sm:$0xf0]  ;;  %v4660_v5 = vor.u32 %v6158_v53, %v4657_v52  ;;  %v6154_v12 = vld [vmem:[#allocation2 + $0x42c] sm:$0xf] }
 0x17b   :  { %3406 = vmatpush.bf16.msra.mxu3 %v4244_v27  ;;  %3368 = vmatmul.bf16.vlgmr.msra.gmra.mxu0 %v6793_v18  ;;  %v3174_v8 = vpop.f32.mrf.mxu1  ;;  %v4417_v27 = vld [vmem:[#allocation2 + $0x278] sm:$0xf0]  ;;  %v3632_v45 = vsub.f32 %v3624_v16, %v3628_v17  ;;  %v4788_v10 = vor.u32 %v6190_v58, %v4785_v59  ;;  %v6086_v17 = vld [vmem:[#allocation2 + $0x20c] sm:$0xf] }
 0x17c   :  { %3412 = vmatpush.bf16.msrb.mxu0 %v4484_v28  ;;  %3381 = vmatmul.bf16.vlgmr.msra.gmra.mxu1 %v6795_v24  ;;  %v6130_v28 = vld [vmem:[#allocation2 + $0x36c] sm:$0xf]  ;;  %v4385_v7 = vld [vmem:[#allocation2 + $0x238] sm:$0xf0] }
 0x17d   :  { %3425 = vmatpush.bf16.msrb.mxu1 %v4612_v55  ;;  %3438 = vmatpush.bf16.msrb.mxu2 %v4740_v31  ;;  %v4820_v55 = vor.u32 %v6198_v14, %v4817_v15  ;;  %v4548_v56 = vor.u32 %v6130_v28, %v4545_v32  ;;  %v6857_v61 = vadd.f32 1e-05, %v3632_v45  ;;  %v4641_v13 = vld [vmem:[#allocation2 + $0x438] sm:$0xf0]  ;;  %v6182_v34 = vld [vmem:[#allocation2 + $0x50c] sm:$0xf] }
 0x17e   :  { %3394 = vmatmul.bf16.vlgmr.msra.gmra.mxu2 %v6747_v20  ;;  %3407 = vmatmul.bf16.vlgmr.msra.gmra.mxu3 %v6750_v21  ;;  %v3161_v20 = vpop.f32.mrf.mxu0  ;;  %v4769_v16 = vld [vmem:[#allocation2 + $0x538] sm:$0xf0]  ;;  %v4644_v28 = vor.u32 %v6154_v12, %v4641_v13  ;;  %v6302_v12 = vld [vmem:[#allocation2 + $0x8cc] sm:$0xf] }
 0x17f   :  { %3451 = vmatpush.bf16.msrb.mxu3 %v4868_v39  ;;  %v3162_v21 = vadd.f32 %v3161_v20, %v6846_v37  ;;  %v6194_v39 = vld [vmem:[#allocation2 + $0x56c] sm:$0xf]  ;;  %v4420_v37 = vor.u32 %v6098_v26, %v4417_v27  ;;  %v4753_v36 = vld [vmem:[#allocation2 + $0x518] sm:$0xf0]  ;;  %6512 = vrsqrt.f32 %v6857_v61  ;;  %vm3647_vm3 = vweird.f32 %v6857_v61 }
 0x180   :  { %3413 = vmatpush.bf16.msrb.mxu0 %v4468_v43  ;;  %v4804_v43 = vor.u32 %v6194_v39, %v4801_v40  ;;  %v6186_v20 = vld [vmem:[#allocation2 + $0x52c] sm:$0xf]  ;;  %v5377_v58 = vld [vmem:[#allocation2 + $0x9f8] sm:$0xf0]  ;;  %v4756_v59 = vor.u32 %v6182_v34, %v4753_v36 }
 0x181   :  { %3426 = vmatpush.bf16.msrb.mxu1 %v4596_v50  ;;  %3439 = vmatpush.bf16.msrb.mxu2 %v4724_v51  ;;  %v3175_v31 = vadd.f32 %v3174_v8, %v3162_v21  ;;  %v3187_v50 = vpop.f32.mrf.mxu2  ;;  %v4529_v51 = vld [vmem:[#allocation2 + $0x358] sm:$0xf0]  ;;  %v4388_v21 = vor.u32 %v6090_v63, %v4385_v7  ;;  %v6118_v8 = vld [vmem:[#allocation2 + $0x30c] sm:$0xf]  ;;  %v4772_v32 = vor.u32 %v6186_v20, %v4769_v16 }
 0x182   :  { %v6242_v39 = vld [vmem:[#allocation2 + $0x6ec] sm:$0xf]  ;;  %v4977_v7 = vld [vmem:[#allocation2 + $0x6d8] sm:$0xf0] }
 0x183   :  { %3452 = vmatpush.bf16.msrb.mxu3 %v4852_v57  ;;  %v3188_v54 = vadd.f32 %v3187_v50, %v3175_v31  ;;  %v3200_v57 = vpop.f32.mrf.mxu3  ;;  %v4625_v31 = vld [vmem:[#allocation2 + $0x418] sm:$0xf0] }
 0x184   :  { %3414 = vmatpush.bf16.msrb.mxu0 %v4452_v1  ;;  %v3176_v1 = vpop.f32.mrf.mxu1  ;;  %v5249_v50 = vld [vmem:[#allocation2 + $0x8f8] sm:$0xf0] }
 0x185   :  { %3427 = vmatpush.bf16.msrb.mxu1 %v4580_v2  ;;  %3440 = vmatpush.bf16.msrb.mxu2 %v4708_v3  ;;  %v6859_v2 = vadd.f32 %v3200_v57, %v3188_v54  ;;  %v4532_v3 = vor.u32 %v6126_v49, %v4529_v51  ;;  %v5121_v49 = vld [vmem:[#allocation2 + $0x7f8] sm:$0xf0]  ;;  %v6338_v57 = vld [vmem:[#allocation2 + $0x9ec] sm:$0xf] }
 0x186   :  { %v3163_v60 = vpop.f32.mrf.mxu0  ;;  %v5233_v13 = vld [vmem:[#allocation2 + $0x8d8] sm:$0xf0] }
 0x187   :  { %3453 = vmatpush.bf16.msrb.mxu3 %v4836_v9  ;;  %v4513_v9 = vld [vmem:[#allocation2 + $0x338] sm:$0xf0]  ;;  %v3574_v14 = vrot.slane %v6859_v2, 4  ;;  %v3597_v15 = vmul.f32 %v6859_v2, %v6859_v2 }
 0x188   :  { %3415 = vmatpush.bf16.msrb.mxu0 %v4436_v19  ;;  %v4369_v19 = vld [vmem:[#allocation2 + $0x218] sm:$0xf0]  ;;  %v4516_v27 = vor.u32 %v6122_v11, %v4513_v9  ;;  %v6270_v11 = vld [vmem:[#allocation2 + $0x7cc] sm:$0xf]  ;;  %v5380_v9 = vor.u32 %v6338_v57, %v5377_v58 }
 0x189   :  { %3428 = vmatpush.bf16.msrb.mxu1 %v4564_v22  ;;  %3441 = vmatpush.bf16.msrb.mxu2 %v4692_v23  ;;  %v4497_v22 = vld [vmem:[#allocation2 + $0x318] sm:$0xf0]  ;;  %v3575_v23 = vadd.f32 %v3574_v14, %v6859_v2  ;;  %v3606_v26 = vrot.slane %v3597_v15, 4  ;;  %v3189_v40 = vpop.f32.mrf.mxu2  ;;  %v4372_v48 = vor.u32 %v6086_v17, %v4369_v19 }
 0x18a   :  { %v4500_v52 = vor.u32 %v6118_v8, %v4497_v22  ;;  %v5361_v16 = vld [vmem:[#allocation2 + $0x9d8] sm:$0xf0] }
 0x18b   :  { %3454 = vmatpush.bf16.msrb.mxu3 %v4820_v55  ;;  %v6150_v55 = vld [vmem:[#allocation2 + $0x40c] sm:$0xf]  ;;  %v3576_v45 = vrot.slane %v3575_v23, 2  ;;  %v3202_v47 = vpop.f32.mrf.mxu3  ;;  %v5345_v40 = vld [vmem:[#allocation2 + $0x9b8] sm:$0xf0] }
 0x18c   :  { %3416 = vmatpush.bf16.msrb.mxu0 %v4420_v37  ;;  %v3607_v37 = vadd.f32 %v3606_v26, %v3597_v15  ;;  %v4628_v54 = vor.u32 %v6150_v55, %v4625_v31  ;;  %v6334_v15 = vld [vmem:[#allocation2 + $0x9cc] sm:$0xf]  ;;  %v4961_v26 = vld [vmem:[#allocation2 + $0x6b8] sm:$0xf0] }
 0x18d   :  { %3429 = vmatpush.bf16.msrb.mxu1 %v4548_v56  ;;  %3442 = vmatpush.bf16.msrb.mxu2 %v4676_v46  ;;  %v4993_v56 = vld [vmem:[#allocation2 + $0x6f8] sm:$0xf0]  ;;  %v6274_v46 = vld [vmem:[#allocation2 + $0x7ec] sm:$0xf]  ;;  %v3577_v51 = vadd.f32 %v3576_v45, %v3575_v23  ;;  %v5236_v23 = vor.u32 %v6302_v12, %v5233_v13 }
 0x18e   :  { %v3608_v53 = vrot.slane %v3607_v37, 2  ;;  %v4996_v60 = vor.u32 %v6242_v39, %v4993_v56  ;;  %v5089_v55 = vld [vmem:[#allocation2 + $0x7b8] sm:$0xf0]  ;;  %v6298_v31 = vld [vmem:[#allocation2 + $0x8ac] sm:$0xf] }
 0x18f   :  { %3455 = vmatpush.bf16.msrb.mxu3 %v4804_v43  ;;  %v6306_v43 = vld [vmem:[#allocation2 + $0x8ec] sm:$0xf]  ;;  %v3578_v63 = vrot.slane %v3577_v51, 1  ;;  %v5313_v12 = vld [vmem:[#allocation2 + $0x978] sm:$0xf0] }
 0x190   :  { %3417 = vmatpush.bf16.msrb.mxu0 %v4404_v62  ;;  %v6238_v62 = vld [vmem:[#allocation2 + $0x6cc] sm:$0xf]  ;;  %v3609_v1 = vadd.f32 %v3608_v53, %v3607_v37  ;;  %v6874_v37 = vpop.eup %6512 }
 0x191   :  { %3430 = vmatpush.bf16.msrb.mxu1 %v4532_v3  ;;  %3443 = vmatpush.bf16.msrb.mxu2 %v4660_v5  ;;  %v5124_v3 = vor.u32 %v6274_v46, %v5121_v49  ;;  %v5252_v5 = vor.u32 %v6306_v43, %v5249_v50  ;;  %v3579_v20 = vadd.f32 %v3578_v63, %v3577_v51  ;;  %v6330_v39 = vld [vmem:[#allocation2 + $0x9ac] sm:$0xf]  ;;  %v5073_v43 = vld [vmem:[#allocation2 + $0x798] sm:$0xf0]  ;;  %vm3648_vm1 = vweird.f32 %v6874_v37 }
 0x192   :  { %v3610_v14 = vrot.slane %v3609_v1, 1  ;;  %v4980_v17 = vor.u32 %v6238_v62, %v4977_v7  ;;  %v6230_v47 = vld [vmem:[#allocation2 + $0x68c] sm:$0xf]  ;;  %v5201_v50 = vld [vmem:[#allocation2 + $0x898] sm:$0xf0]  ;;  %vm6900_vm6 = vmor %vm3647_vm3, %vm3648_vm1 }
 0x193   :  { %3456 = vmatpush.bf16.msrb.mxu3 %v4788_v10  ;;  %v5105_v10 = vld [vmem:[#allocation2 + $0x7d8] sm:$0xf0]  ;;  %v6866_v19 = vmul.f32 0.125, %v3579_v20  ;;  %v6262_v49 = vld [vmem:[#allocation2 + $0x78c] sm:$0xf] }
 0x194   :  { %3418 = vmatpush.bf16.msrb.mxu0 %v4388_v21  ;;  %v6234_v21 = vld [vmem:[#allocation2 + $0x6ac] sm:$0xf]  ;;  %v3611_v8 = vadd.f32 %v3610_v14, %v3609_v1  ;;  %v5108_v22 = vor.u32 %v6270_v11, %v5105_v10  ;;  %v5076_v58 = vor.u32 %v6262_v49, %v5073_v43  ;;  %v4929_v62 = vld [vmem:[#allocation2 + $0x678] sm:$0xf0] }
 0x195   :  { %3431 = vmatpush.bf16.msrb.mxu1 %v4516_v27  ;;  %3444 = vmatpush.bf16.msrb.mxu2 %v4644_v28  ;;  %v6266_v27 = vld [vmem:[#allocation2 + $0x7ac] sm:$0xf]  ;;  %v5364_v28 = vor.u32 %v6334_v15, %v5361_v16  ;;  %v3629_v36 = vmul.f32 %v6866_v19, %v6866_v19  ;;  %v4964_v45 = vor.u32 %v6234_v21, %v4961_v26  ;;  %v5185_v11 = vld [vmem:[#allocation2 + $0x878] sm:$0xf0] }
 0x196   :  { %v3625_v34 = vmul.f32 0.125, %v3611_v8  ;;  %v5092_v56 = vor.u32 %v6266_v27, %v5089_v55  ;;  %v6326_v53 = vld [vmem:[#allocation2 + $0x98c] sm:$0xf]  ;;  %v5169_v27 = vld [vmem:[#allocation2 + $0x858] sm:$0xf0] }
 0x197   :  { %3457 = vmatpush.bf16.msrb.mxu3 %v4772_v32  ;;  %v5217_v32 = vld [vmem:[#allocation2 + $0x8b8] sm:$0xf0]  ;;  %v6258_v63 = vld [vmem:[#allocation2 + $0x76c] sm:$0xf] }
 0x198   :  { %3419 = vmatpush.bf16.msrb.mxu0 %v4372_v48  ;;  %v5220_v46 = vor.u32 %v6298_v31, %v5217_v32  ;;  %v4945_v48 = vld [vmem:[#allocation2 + $0x698] sm:$0xf0]  ;;  %v3213_v57 = vpop.f32.mrf.mxu0  ;;  %v6290_v7 = vld [vmem:[#allocation2 + $0x86c] sm:$0xf] }
 0x199   :  { %3432 = vmatpush.bf16.msrb.mxu1 %v4500_v52  ;;  %3445 = vmatpush.bf16.msrb.mxu2 %v4628_v54  ;;  %v5329_v52 = vld [vmem:[#allocation2 + $0x998] sm:$0xf0]  ;;  %v4948_v54 = vor.u32 %v6230_v47, %v4945_v48  ;;  %v6322_v10 = vld [vmem:[#allocation2 + $0x96c] sm:$0xf]  ;;  %v5188_v15 = vor.u32 %v6290_v7, %v5185_v11 }
 0x19a   :  { %v6222_v16 = vld [vmem:[#allocation2 + $0x64c] sm:$0xf]  ;;  %v4897_v48 = vld [vmem:[#allocation2 + $0x638] sm:$0xf0] }
 0x19b   :  { %3458 = vmatpush.bf16.msrb.mxu3 %v4756_v59  ;;  %3420 = vmatmul.bf16.vlgmr.msrb.gmra.mxu0 %v6739_v4  ;;  %v5348_v4 = vor.u32 %v6330_v39, %v5345_v40  ;;  %v3226_v1 = vpop.f32.mrf.mxu1  ;;  %v6254_v21 = vld [vmem:[#allocation2 + $0x74c] sm:$0xf]  ;;  %v5137_v11 = vld [vmem:[#allocation2 + $0x818] sm:$0xf0] }
 0x19c   :  { %3464 = vmatpush.bf16.msra.mxu0 %v4996_v60  ;;  %3446 = vmatmul.bf16.vlgmr.msrb.gmra.mxu2 %v6762_v41  ;;  %v3633_v41 = vsub.f32 %v3625_v34, %v3629_v36  ;;  %v6226_v60 = vld [vmem:[#allocation2 + $0x66c] sm:$0xf]  ;;  %v5297_v34 = vld [vmem:[#allocation2 + $0x958] sm:$0xf0] }
 0x19d   :  { %3477 = vmatpush.bf16.msra.mxu1 %v5124_v3  ;;  %3490 = vmatpush.bf16.msra.mxu2 %v5252_v5  ;;  %v5332_v3 = vor.u32 %v6326_v53, %v5329_v52  ;;  %v5057_v5 = vld [vmem:[#allocation2 + $0x778] sm:$0xf0]  ;;  %v4932_v20 = vor.u32 %v6226_v60, %v4929_v62  ;;  %v6286_v26 = vld [vmem:[#allocation2 + $0x84c] sm:$0xf] }
 0x19e   :  { %3459 = vmatmul.bf16.vlgmr.msrb.gmra.mxu3 %v6766_v44  ;;  %3433 = vmatmul.bf16.vlgmr.msrb.gmra.mxu1 %v6744_v6  ;;  %v6294_v44 = vld [vmem:[#allocation2 + $0x88c] sm:$0xf]  ;;  %v6876_v51 = vadd.f32 1e-05, %v3633_v41  ;;  %v3642_v6 = vmul.f32 %v6874_v37, %v6857_v61  ;;  %v5060_v14 = vor.u32 %v6258_v63, %v5057_v5  ;;  %v5153_v52 = vld [vmem:[#allocation2 + $0x838] sm:$0xf0] }
 0x19f   :  { %3503 = vmatpush.bf16.msra.mxu3 %v5380_v9  ;;  %v5204_v59 = vor.u32 %v6294_v44, %v5201_v50  ;;  %v3227_v9 = vadd.f32 %v3226_v1, %v3213_v57  ;;  %v3239_v8 = vpop.f32.mrf.mxu2  ;;  %v6318_v32 = vld [vmem:[#allocation2 + $0x94c] sm:$0xf]  ;;  %v5025_v50 = vld [vmem:[#allocation2 + $0x738] sm:$0xf0] }
 0x1a0   :  { %3465 = vmatpush.bf16.msra.mxu0 %v4980_v17  ;;  %6514 = vrsqrt.f32 %v6876_v51  ;;  %v3643_v13 = vmul.f32 %v6874_v37, %v3642_v6  ;;  %v4913_v17 = vld [vmem:[#allocation2 + $0x658] sm:$0xf0]  ;;  %v3215_v41 = vpop.f32.mrf.mxu0  ;;  %v6218_v47 = vld [vmem:[#allocation2 + $0x62c] sm:$0xf]  ;;  %v5300_v44 = vor.u32 %v6318_v32, %v5297_v34  ;;  %vm3657_vm2 = vweird.f32 %v6876_v51 }
 0x1a1   :  { %3478 = vmatpush.bf16.msra.mxu1 %v5108_v22  ;;  %3491 = vmatpush.bf16.msra.mxu2 %v5236_v23  ;;  %v5316_v22 = vor.u32 %v6322_v10, %v5313_v12  ;;  %v5041_v23 = vld [vmem:[#allocation2 + $0x758] sm:$0xf0]  ;;  %v3252_v55 = vpop.f32.mrf.mxu3  ;;  %v4916_v40 = vor.u32 %v6222_v16, %v4913_v17  ;;  %v6250_v49 = vld [vmem:[#allocation2 + $0x72c] sm:$0xf]  ;;  %v4900_v60 = vor.u32 %v6218_v47, %v4897_v48 }
 0x1a2   :  { %v3644_v36 = vmul.f32 0.5, %v3643_v13  ;;  %v6282_v53 = vld [vmem:[#allocation2 + $0x82c] sm:$0xf]  ;;  %v4881_v62 = vld [vmem:[#allocation2 + $0x618] sm:$0xf0]  ;;  %v5028_v1 = vor.u32 %v6250_v49, %v5025_v50 }
 0x1a3   :  { %3504 = vmatpush.bf16.msra.mxu3 %v5364_v28  ;;  %v3240_v28 = vadd.f32 %v3239_v8, %v3227_v9  ;;  %v6314_v6 = vld [vmem:[#allocation2 + $0x92c] sm:$0xf]  ;;  %v5009_v5 = vld [vmem:[#allocation2 + $0x718] sm:$0xf0] }
 0x1a4   :  { %3466 = vmatpush.bf16.msra.mxu0 %v4964_v45  ;;  %v6214_v57 = vld [vmem:[#allocation2 + $0x60c] sm:$0xf]  ;;  %v5505_v16 = vld [vmem:[#allocation2 + $0xaf8] sm:$0xf0] }
 0x1a5   :  { %3479 = vmatpush.bf16.msra.mxu1 %v5092_v56  ;;  %3492 = vmatpush.bf16.msra.mxu2 %v5220_v46  ;;  %v6886_v45 = vadd.f32 %v3252_v55, %v3240_v28  ;;  %v5044_v56 = vor.u32 %v6254_v21, %v5041_v23  ;;  %v5172_v46 = vor.u32 %v6286_v26, %v5169_v27  ;;  %v6246_v63 = vld [vmem:[#allocation2 + $0x70c] sm:$0xf]  ;;  %v5633_v23 = vld [vmem:[#allocation2 + $0xbf8] sm:$0xf0] }
 0x1a6   :  { %v6882_v31 = vpop.eup %6514  ;;  %v6278_v7 = vld [vmem:[#allocation2 + $0x80c] sm:$0xf]  ;;  %v5761_v27 = vld [vmem:[#allocation2 + $0xcf8] sm:$0xf0]  ;;  %v5012_v28 = vor.u32 %v6246_v63, %v5009_v5 }
 0x1a7   :  { %3505 = vmatpush.bf16.msra.mxu3 %v5348_v4  ;;  %v3652_v39 = vmul.f32 %v6882_v31, %v6876_v51  ;;  %v3228_v4 = vpop.f32.mrf.mxu1  ;;  %v3241_v9 = vpop.f32.mrf.mxu2  ;;  %vm3658_vm0 = vweird.f32 %v6882_v31  ;;  %v6310_v13 = vld [vmem:[#allocation2 + $0x90c] sm:$0xf]  ;;  %v5140_v55 = vor.u32 %v6278_v7, %v5137_v11  ;;  %v5889_v34 = vld [vmem:[#allocation2 + $0xdf8] sm:$0xf0] }
 0x1a8   :  { %3467 = vmatpush.bf16.msra.mxu0 %v4948_v54  ;;  %v5281_v54 = vld [vmem:[#allocation2 + $0x938] sm:$0xf0]  ;;  %v6402_v17 = vld [vmem:[#allocation2 + $0xbec] sm:$0xf]  ;;  %vm3659_vm4 = vmor %vm3657_vm2, %vm3658_vm0 }
 0x1a9   :  { %3480 = vmatpush.bf16.msra.mxu1 %v5076_v58  ;;  %3493 = vmatpush.bf16.msra.mxu2 %v5204_v59  ;;  %v3653_v43 = vmul.f32 %v6882_v31, %v3652_v39  ;;  %v3645_v58 = vsub.f32 1.5, %v3644_v36  ;;  %v5284_v12 = vor.u32 %v6314_v6, %v5281_v54  ;;  %v6434_v26 = vld [vmem:[#allocation2 + $0xcec] sm:$0xf]  ;;  %v5489_v47 = vld [vmem:[#allocation2 + $0xad8] sm:$0xf0] }
 0x1aa   :  { %v6466_v32 = vld [vmem:[#allocation2 + $0xdec] sm:$0xf]  ;;  %v5617_v4 = vld [vmem:[#allocation2 + $0xbd8] sm:$0xf0] }
 0x1ab   :  { %3506 = vmatpush.bf16.msra.mxu3 %v5332_v3  ;;  %v3654_v59 = vmul.f32 0.5, %v3653_v43  ;;  %v5156_v3 = vor.u32 %v6282_v53, %v5153_v52  ;;  %v3646_v21 = vmul.f32 %v6874_v37, %v3645_v58  ;;  %v6398_v48 = vld [vmem:[#allocation2 + $0xbcc] sm:$0xf]  ;;  %v5892_v49 = vor.u32 %v6466_v32, %v5889_v34  ;;  %v5745_v43 = vld [vmem:[#allocation2 + $0xcd8] sm:$0xf0] }
 0x1ac   :  { %3468 = vmatpush.bf16.msra.mxu0 %v4932_v20  ;;  %v5265_v20 = vld [vmem:[#allocation2 + $0x918] sm:$0xf0]  ;;  %v6462_v50 = vld [vmem:[#allocation2 + $0xdcc] sm:$0xf]  ;;  %v5620_v54 = vor.u32 %v6398_v48, %v5617_v4 }
 0x1ad   :  { %3481 = vmatpush.bf16.msra.mxu1 %v5060_v14  ;;  %3494 = vmatpush.bf16.msra.mxu2 %v5188_v15  ;;  %v3655_v10 = vsub.f32 1.5, %v3654_v59  ;;  %v3254_v14 = vpop.f32.mrf.mxu3  ;;  %v6370_v15 = vld [vmem:[#allocation2 + $0xaec] sm:$0xf]  ;;  %v5268_v51 = vor.u32 %v6310_v13, %v5265_v20  ;;  %v5873_v53 = vld [vmem:[#allocation2 + $0xdd8] sm:$0xf0] }
 0x1ae   :  { %v5508_v39 = vor.u32 %v6370_v15, %v5505_v16  ;;  %v6362_v58 = vld [vmem:[#allocation2 + $0xaac] sm:$0xf]  ;;  %v5473_v59 = vld [vmem:[#allocation2 + $0xab8] sm:$0xf0] }
 0x1af   :  { %3507 = vmatpush.bf16.msra.mxu3 %v5316_v22  ;;  %v3656_v8 = vmul.f32 %v6882_v31, %v3655_v10  ;;  %v4884_v22 = vor.u32 %v6214_v57, %v4881_v62  ;;  %v5601_v62 = vld [vmem:[#allocation2 + $0xbb8] sm:$0xf0]  ;;  %v6426_v63 = vld [vmem:[#allocation2 + $0xcac] sm:$0xf]  ;;  %v5476_v7 = vor.u32 %v6362_v58, %v5473_v59 }
 0x1b0   :  { %3469 = vmatpush.bf16.msra.mxu0 %v4916_v40  ;;  %v6366_v40 = vld [vmem:[#allocation2 + $0xacc] sm:$0xf]  ;;  %v5857_v5 = vld [vmem:[#allocation2 + $0xdb8] sm:$0xf0] }
 0x1b1   :  { %3482 = vmatpush.bf16.msra.mxu1 %v5044_v56  ;;  %3495 = vmatpush.bf16.msra.mxu2 %v5172_v46  ;;  %v3660_v36 = vsel %vm3659_vm4, %v6882_v31, %v3656_v8  ;;  %v5636_v56 = vor.u32 %v6402_v17, %v5633_v23  ;;  %v5764_v46 = vor.u32 %v6434_v26, %v5761_v27  ;;  %v6430_v31 = vld [vmem:[#allocation2 + $0xccc] sm:$0xf]  ;;  %v5585_v20 = vld [vmem:[#allocation2 + $0xb98] sm:$0xf0] }
 0x1b2   :  { %v3685_v41 = vrot.slane %v3660_v36, 7  ;;  %v5492_v6 = vor.u32 %v6366_v40, %v5489_v47  ;;  %v5748_v57 = vor.u32 %v6430_v31, %v5745_v43  ;;  %v6358_v10 = vld [vmem:[#allocation2 + $0xa8c] sm:$0xf]  ;;  %v5697_v34 = vld [vmem:[#allocation2 + $0xc78] sm:$0xf0] }
 0x1b3   :  { %3508 = vmatpush.bf16.msra.mxu3 %v5300_v44  ;;  %v3650_v44 = vsel %vm6900_vm6, %v6874_v37, %v3646_v21  ;;  %v5876_v37 = vor.u32 %v6462_v50, %v5873_v53  ;;  %v6422_v14 = vld [vmem:[#allocation2 + $0xc8c] sm:$0xf]  ;;  %v5681_v31 = vld [vmem:[#allocation2 + $0xc58] sm:$0xf0] }
 0x1b4   :  { %3470 = vmatpush.bf16.msra.mxu0 %v4900_v60  ;;  %v6908_v52 = vsel %vm3688_vm5, %v3650_v44, %v3685_v41  ;;  %v6394_v60 = vld [vmem:[#allocation2 + $0xbac] sm:$0xf]  ;;  %v5809_v53 = vld [vmem:[#allocation2 + $0xd58] sm:$0xf0] }
 0x1b5   :  { %3483 = vmatpush.bf16.msra.mxu1 %v5028_v1  ;;  %3496 = vmatpush.bf16.msra.mxu2 %v5156_v3  ;;  %v5729_v1 = vld [vmem:[#allocation2 + $0xcb8] sm:$0xf0]  ;;  %v6458_v3 = vld [vmem:[#allocation2 + $0xdac] sm:$0xf]  ;;  %v5604_v11 = vor.u32 %v6394_v60, %v5601_v62 }
 0x1b6   :  { %v5732_v9 = vor.u32 %v6426_v63, %v5729_v1  ;;  %v5860_v13 = vor.u32 %v6458_v3, %v5857_v5  ;;  %v6454_v15 = vld [vmem:[#allocation2 + $0xd8c] sm:$0xf]  ;;  %v5537_v3 = vld [vmem:[#allocation2 + $0xb38] sm:$0xf0] }
 0x1b7   :  { %3509 = vmatpush.bf16.msra.mxu3 %v5284_v12  ;;  %v6390_v12 = vld [vmem:[#allocation2 + $0xb8c] sm:$0xf] }
 0x1b8   :  { %3471 = vmatpush.bf16.msra.mxu0 %v4884_v22  ;;  %v3265_v17 = vpop.f32.mrf.mxu0  ;;  %v6354_v8 = vld [vmem:[#allocation2 + $0xa6c] sm:$0xf]  ;;  %v5441_v22 = vld [vmem:[#allocation2 + $0xa78] sm:$0xf0] }
 0x1b9   :  { %3484 = vmatpush.bf16.msra.mxu1 %v5012_v28  ;;  %3497 = vmatpush.bf16.msra.mxu2 %v5140_v55  ;;  %v6386_v23 = vld [vmem:[#allocation2 + $0xb6c] sm:$0xf]  ;;  %v3266_v26 = vadd.f32 %v3265_v17, %v6886_v45  ;;  %v5569_v55 = vld [vmem:[#allocation2 + $0xb78] sm:$0xf0]  ;;  %v5444_v40 = vor.u32 %v6354_v8, %v5441_v22 }
 0x1ba   :  { %v6418_v32 = vld [vmem:[#allocation2 + $0xc6c] sm:$0xf]  ;;  %v5572_v61 = vor.u32 %v6386_v23, %v5569_v55  ;;  %v5649_v17 = vld [vmem:[#allocation2 + $0xc18] sm:$0xf0] }
 0x1bb   :  { %3510 = vmatpush.bf16.msra.mxu3 %v5268_v51  ;;  %3472 = vmatmul.bf16.vlgmr.msra.gmra.mxu0 %v6760_v38  ;;  %v5457_v38 = vld [vmem:[#allocation2 + $0xa98] sm:$0xf0]  ;;  %v3278_v27 = vpop.f32.mrf.mxu1  ;;  %v6450_v36 = vld [vmem:[#allocation2 + $0xd6c] sm:$0xf]  ;;  %v5700_v41 = vor.u32 %v6418_v32, %v5697_v34 }
 0x1bc   :  { %3516 = vmatpush.bf16.msrb.mxu0 %v5508_v39  ;;  %3498 = vmatmul.bf16.vlgmr.msra.gmra.mxu2 %v6778_v25  ;;  %v5713_v25 = vld [vmem:[#allocation2 + $0xc98] sm:$0xf0]  ;;  %v5460_v16 = vor.u32 %v6358_v10, %v5457_v38  ;;  %v3279_v39 = vadd.f32 %v3278_v27, %v3266_v26  ;;  %v6382_v47 = vld [vmem:[#allocation2 + $0xb4c] sm:$0xf] }
 0x1bd   :  { %3529 = vmatpush.bf16.msrb.mxu1 %v5636_v56  ;;  %3542 = vmatpush.bf16.msrb.mxu2 %v5764_v46  ;;  %v5716_v21 = vor.u32 %v6422_v14, %v5713_v25  ;;  %v5825_v51 = vld [vmem:[#allocation2 + $0xd78] sm:$0xf0]  ;;  %v6350_v56 = vld [vmem:[#allocation2 + $0xa4c] sm:$0xf] }
 0x1be   :  { %3485 = vmatmul.bf16.vlgmr.msra.gmra.mxu1 %v6764_v42  ;;  %3511 = vmatmul.bf16.vlgmr.msra.gmra.mxu3 %v6782_v30  ;;  %v5841_v42 = vld [vmem:[#allocation2 + $0xd98] sm:$0xf0]  ;;  %v5588_v30 = vor.u32 %v6390_v12, %v5585_v20  ;;  %v5828_v45 = vor.u32 %v6450_v36, %v5825_v51  ;;  %v6414_v4 = vld [vmem:[#allocation2 + $0xc4c] sm:$0xf] }
 0x1bf   :  { %3555 = vmatpush.bf16.msrb.mxu3 %v5892_v49  ;;  %v5844_v28 = vor.u32 %v6454_v15, %v5841_v42  ;;  %v5425_v46 = vld [vmem:[#allocation2 + $0xa58] sm:$0xf0]  ;;  %v3291_v48 = vpop.f32.mrf.mxu2  ;;  %v6446_v50 = vld [vmem:[#allocation2 + $0xd4c] sm:$0xf]  ;;  %v5684_v59 = vor.u32 %v6414_v4, %v5681_v31 }
 0x1c0   :  { %3517 = vmatpush.bf16.msrb.mxu0 %v5492_v6  ;;  %v5553_v49 = vld [vmem:[#allocation2 + $0xb58] sm:$0xf0]  ;;  %v3292_v43 = vadd.f32 %v3291_v48, %v3279_v39  ;;  %v5428_v6 = vor.u32 %v6350_v56, %v5425_v46  ;;  %v6346_v60 = vld [vmem:[#allocation2 + $0xa2c] sm:$0xf]  ;;  %v5812_v1 = vor.u32 %v6446_v50, %v5809_v53 }
 0x1c1   :  { %3530 = vmatpush.bf16.msrb.mxu1 %v5620_v54  ;;  %3543 = vmatpush.bf16.msrb.mxu2 %v5748_v57  ;;  %v3304_v44 = vpop.f32.mrf.mxu3  ;;  %v3267_v57 = vpop.f32.mrf.mxu0  ;;  %v5556_v58 = vor.u32 %v6382_v47, %v5553_v49  ;;  %v6378_v62 = vld [vmem:[#allocation2 + $0xb2c] sm:$0xf]  ;;  %v5393_v20 = vld [vmem:[#allocation2 + $0xa18] sm:$0xf0] }
 0x1c2   :  { %v3305_v54 = vadd.f32 %v3304_v44, %v3292_v43  ;;  %v6410_v5 = vld [vmem:[#allocation2 + $0xc2c] sm:$0xf]  ;;  %v5540_v38 = vor.u32 %v6378_v62, %v5537_v3  ;;  %v5521_v42 = vld [vmem:[#allocation2 + $0xb18] sm:$0xf0] }
 0x1c3   :  { %3556 = vmatpush.bf16.msrb.mxu3 %v5876_v37  ;;  %v5409_v37 = vld [vmem:[#allocation2 + $0xa38] sm:$0xf0]  ;;  %v3280_v63 = vpop.f32.mrf.mxu1  ;;  %v6374_v14 = vld [vmem:[#allocation2 + $0xb0c] sm:$0xf] }
 0x1c4   :  { %3518 = vmatpush.bf16.msrb.mxu0 %v5476_v7  ;;  %v5665_v7 = vld [vmem:[#allocation2 + $0xc38] sm:$0xf0]  ;;  %v5412_v10 = vor.u32 %v6346_v60, %v5409_v37  ;;  %v5524_v23 = vor.u32 %v6374_v14, %v5521_v42 }
 0x1c5   :  { %3531 = vmatpush.bf16.msrb.mxu1 %v5604_v11  ;;  %3544 = vmatpush.bf16.msrb.mxu2 %v5732_v9  ;;  %v6442_v11 = vld [vmem:[#allocation2 + $0xd2c] sm:$0xf]  ;;  %v5793_v9 = vld [vmem:[#allocation2 + $0xd38] sm:$0xf0]  ;;  %v5668_v12 = vor.u32 %v6410_v5, %v5665_v7 }
 0x1c6   :  { %v5796_v15 = vor.u32 %v6442_v11, %v5793_v9  ;;  %v5777_v8 = vld [vmem:[#allocation2 + $0xd18] sm:$0xf0] }
 0x1c7   :  { %3557 = vmatpush.bf16.msrb.mxu3 %v5860_v13  ;;  %v6342_v13 = vld [vmem:[#allocation2 + $0xa0c] sm:$0xf]  ;;  %v3293_v25 = vpop.f32.mrf.mxu2 }
 0x1c8   :  { %3519 = vmatpush.bf16.msrb.mxu0 %v5460_v16  ;;  %v6406_v16 = vld [vmem:[#allocation2 + $0xc0c] sm:$0xf]  ;;  %v5396_v22 = vor.u32 %v6342_v13, %v5393_v20 }
 0x1c9   :  { %3532 = vmatpush.bf16.msrb.mxu1 %v5588_v30  ;;  %3545 = vmatpush.bf16.msrb.mxu2 %v5716_v21  ;;  %v3306_v30 = vpop.f32.mrf.mxu3  ;;  %v6438_v21 = vld [vmem:[#allocation2 + $0xd0c] sm:$0xf]  ;;  %v5652_v26 = vor.u32 %v6406_v16, %v5649_v17 }
 0x1ca   :  { %v5780_v27 = vor.u32 %v6438_v21, %v5777_v8 }
 0x1cb   :  { %3558 = vmatpush.bf16.msrb.mxu3 %v5844_v28 }
 0x1cc   :  { %3520 = vmatpush.bf16.msrb.mxu0 %v5444_v40 }
 0x1cd   :  { %3533 = vmatpush.bf16.msrb.mxu1 %v5572_v61  ;;  %3546 = vmatpush.bf16.msrb.mxu2 %v5700_v41 }
 0x1cf   :  { %3559 = vmatpush.bf16.msrb.mxu3 %v5828_v45 }
 0x1d0   :  { %3521 = vmatpush.bf16.msrb.mxu0 %v5428_v6 }
 0x1d1   :  { %3534 = vmatpush.bf16.msrb.mxu1 %v5556_v58  ;;  %3547 = vmatpush.bf16.msrb.mxu2 %v5684_v59 }
 0x1d3   :  { %3560 = vmatpush.bf16.msrb.mxu3 %v5812_v1 }
 0x1d4   :  { %3522 = vmatpush.bf16.msrb.mxu0 %v5412_v10 }
 0x1d5   :  { %3535 = vmatpush.bf16.msrb.mxu1 %v5540_v38  ;;  %3548 = vmatpush.bf16.msrb.mxu2 %v5668_v12 }
 0x1d7   :  { %3561 = vmatpush.bf16.msrb.mxu3 %v5796_v15 }
 0x1d8   :  { %3523 = vmatpush.bf16.msrb.mxu0 %v5396_v22  ;;  %v3317_v28 = vpop.f32.mrf.mxu0 }
 0x1d9   :  { %3536 = vmatpush.bf16.msrb.mxu1 %v5524_v23  ;;  %3549 = vmatpush.bf16.msrb.mxu2 %v5652_v26  ;;  %v3318_v55 = vadd.f32 %v3317_v28, %v3305_v54 }
 0x1db   :  { %3562 = vmatpush.bf16.msrb.mxu3 %v5780_v27  ;;  %3524 = vmatmul.bf16.vlgmr.msrb.gmra.mxu0 %v6780_v29  ;;  %v3330_v32 = vpop.f32.mrf.mxu1 }
 0x1dc   :  { %3537 = vmatmul.bf16.vlgmr.msrb.gmra.mxu1 %v6784_v33  ;;  %3550 = vmatmul.bf16.vlgmr.msrb.gmra.mxu2 %v6793_v18  ;;  %v3331_v34 = vadd.f32 %v3330_v32, %v3318_v55 }
 0x1de   :  { %3563 = vmatmul.bf16.vlgmr.msrb.gmra.mxu3 %v6795_v24 }
 0x1df   :  { %v3343_v36 = vpop.f32.mrf.mxu2 }
 0x1e0   :  { %v3344_v51 = vadd.f32 %v3343_v36, %v3331_v34  ;;  %v3319_v40 = vpop.f32.mrf.mxu0 }
 0x1e1   :  { %v3356_v39 = vpop.f32.mrf.mxu3 }
 0x1e2   :  { %v3357_v41 = vadd.f32 %v3356_v39, %v3344_v51 }
 0x1e3   :  { %v3332_v61 = vpop.f32.mrf.mxu1 }
 0x1e7   :  { %v3345_v56 = vpop.f32.mrf.mxu2 }
 0x1e9   :  { %v3358_v46 = vpop.f32.mrf.mxu3 }
 0x1f8   :  { %v3369_v47 = vpop.f32.mrf.mxu0 }
 0x1f9   :  { %v3370_v29 = vadd.f32 %v3369_v47, %v3357_v41  ;;  %v3382_v48 = vpop.f32.mrf.mxu1 }
 0x1fb   :  { %v6919_v33 = vadd.f32 %v3382_v48, %v3370_v29 }
 0x1fd   :  { %v3580_v63 = vrot.slane %v6919_v33, 4  ;;  %v3598_v1 = vmul.f32 %v6919_v33, %v6919_v33 }
 0x1ff   :  { %v3581_v10 = vadd.f32 %v3580_v63, %v6919_v33  ;;  %v3612_v38 = vrot.slane %v3598_v1, 4 }
 0x200   :  { %v3371_v24 = vpop.f32.mrf.mxu0 }
 0x201   :  { %v3395_v18 = vpop.f32.mrf.mxu2  ;;  %v3408_v45 = vpop.f32.mrf.mxu3  ;;  %v3582_v13 = vrot.slane %v3581_v10, 2  ;;  %v3613_v20 = vadd.f32 %v3612_v38, %v3598_v1  ;;  %v6492_v24 = vld [vmem:[#allocation8 + $0xb8] sm:$0xff]  ;;  %v6474_v1 = vld [vmem:[#allocation8 + $0x28] sm:$0xff] }
 0x202   :  { %v3409_v49 = vadd.f32 %v3408_v45, %v3395_v18  ;;  %v3384_v4 = vpop.f32.mrf.mxu1  ;;  %v6476_v18 = vld [vmem:[#allocation8 + $0x38] sm:$0xff]  ;;  %4033 = vmatpush.bf16.msra.mxu2 %v6492_v24 }
 0x203   :  { %v3583_v42 = vadd.f32 %v3582_v13, %v3581_v10  ;;  %v3614_v16 = vrot.slane %v3613_v20, 2  ;;  %v6484_v45 = vld [vmem:[#allocation8 + $0x78] sm:$0xff]  ;;  %4007 = vmatpush.bf16.msra.mxu0 %v6476_v18  ;;  %v6481_v13 = vld [vmem:[#allocation8 + $0x60] sm:$0xff] }
 0x204   :  { %4020 = vmatpush.bf16.msra.mxu1 %v6484_v45  ;;  %v6485_v18 = vld [vmem:[#allocation8 + $0x80] sm:$0xff] }
 0x205   :  { %v3584_v30 = vrot.slane %v3583_v42, 1  ;;  %v3615_v21 = vadd.f32 %v3614_v16, %v3613_v20  ;;  %v6489_v20 = vld [vmem:[#allocation8 + $0xa0] sm:$0xff] }
 0x207   :  { %v3585_v23 = vadd.f32 %v3584_v30, %v3583_v42  ;;  %v3616_v26 = vrot.slane %v3615_v21, 1  ;;  %v6472_v30 = vld [vmem:[#allocation8 + $0x18] sm:$0xff] }
 0x209   :  { %v3397_v31 = vpop.f32.mrf.mxu2  ;;  %v3410_v43 = vpop.f32.mrf.mxu3  ;;  %v6925_v32 = vmul.f32 0.125, %v3585_v23  ;;  %v3617_v34 = vadd.f32 %v3616_v26, %v3615_v21  ;;  %v6480_v21 = vld [vmem:[#allocation8 + $0x58] sm:$0xff] }
 0x20a   :  { %v6496_v23 = vld [vmem:[#allocation8 + $0xd8] sm:$0xff] }
 0x20b   :  { %v3626_v51 = vmul.f32 0.125, %v3617_v34  ;;  %v3630_v39 = vmul.f32 %v6925_v32, %v6925_v32  ;;  %v6487_v34 = vld [vmem:[#allocation8 + $0x90] sm:$0xff] }
 0x20d   :  { %v3634_v29 = vsub.f32 %v3626_v51, %v3630_v39  ;;  %v6495_v51 = vld [vmem:[#allocation8 + $0xd0] sm:$0xff]  ;;  %v6470_v39 = vld [vmem:[#allocation8 + $0x8] sm:$0xff] }
 0x20f   :  { %v6934_v43 = vadd.f32 1e-05, %v3634_v29  ;;  %v6477_v29 = vld [vmem:[#allocation8 + $0x40] sm:$0xff] }
 0x211   :  { %6516 = vrsqrt.f32 %v6934_v43  ;;  %vm3667_vm8 = vweird.f32 %v6934_v43 }
 0x218   :  { %v3421_v44 = vpop.f32.mrf.mxu0 }
 0x219   :  { %v3422_v62 = vadd.f32 %v3421_v44, %v3409_v49  ;;  %v6500_v49 = vld [vmem:[#allocation8 + $0xf8] sm:$0xff] }
 0x21a   :  { %4046 = vmatpush.bf16.msra.mxu3 %v6500_v49  ;;  %v6493_v49 = vld [vmem:[#allocation8 + $0xc0] sm:$0xff] }
 0x21b   :  { %v3434_v50 = vpop.f32.mrf.mxu1 }
 0x21c   :  { %v3435_v11 = vadd.f32 %v3434_v50, %v3422_v62 }
 0x21f   :  { %v3447_v53 = vpop.f32.mrf.mxu2 }
 0x220   :  { %v3423_v54 = vpop.f32.mrf.mxu0  ;;  %v3448_v12 = vadd.f32 %v3447_v53, %v3435_v11  ;;  %v6475_v53 = vld [vmem:[#allocation8 + $0x30] sm:$0xff] }
 0x221   :  { %v3460_v6 = vpop.f32.mrf.mxu3  ;;  %v6491_v54 = vld [vmem:[#allocation8 + $0xb0] sm:$0xff]  ;;  %4008 = vmatpush.bf16.msra.mxu0 %v6475_v53 }
 0x222   :  { %v3461_v15 = vadd.f32 %v3460_v6, %v3448_v12  ;;  %v6483_v6 = vld [vmem:[#allocation8 + $0x70] sm:$0xff]  ;;  %4034 = vmatpush.bf16.msra.mxu2 %v6491_v54  ;;  %v6473_v12 = vld [vmem:[#allocation8 + $0x20] sm:$0xff] }
 0x223   :  { %v3436_v57 = vpop.f32.mrf.mxu1  ;;  %4021 = vmatpush.bf16.msra.mxu1 %v6483_v6 }
 0x225   :  { %4009 = vmatpush.bf16.msra.mxu0 %v6474_v1 }
 0x227   :  { %v3449_v58 = vpop.f32.mrf.mxu2 }
 0x228   :  { %v6499_v58 = vld [vmem:[#allocation8 + $0xf0] sm:$0xff] }
 0x229   :  { %v3462_v59 = vpop.f32.mrf.mxu3  ;;  %4047 = vmatpush.bf16.msra.mxu3 %v6499_v58  ;;  %4010 = vmatpush.bf16.msra.mxu0 %v6473_v12 }
 0x22d   :  { %4011 = vmatpush.bf16.msra.mxu0 %v6472_v30 }
 0x238   :  { %v3473_v60 = vpop.f32.mrf.mxu0 }
 0x239   :  { %v3474_v17 = vadd.f32 %v3473_v60, %v3461_v15 }
 0x23b   :  { %v3486_v37 = vpop.f32.mrf.mxu1 }
 0x23c   :  { %v3487_v8 = vadd.f32 %v3486_v37, %v3474_v17 }
 0x23f   :  { %v3499_v3 = vpop.f32.mrf.mxu2 }
 0x240   :  { %v3475_v7 = vpop.f32.mrf.mxu0  ;;  %v3500_v22 = vadd.f32 %v3499_v3, %v3487_v8  ;;  %v6482_v3 = vld [vmem:[#allocation8 + $0x68] sm:$0xff]  ;;  %v6488_v8 = vld [vmem:[#allocation8 + $0x98] sm:$0xff] }
 0x241   :  { %v3512_v5 = vpop.f32.mrf.mxu3  ;;  %v6498_v7 = vld [vmem:[#allocation8 + $0xe8] sm:$0xff]  ;;  %4022 = vmatpush.bf16.msra.mxu1 %v6482_v3 }
 0x242   :  { %v3513_v27 = vadd.f32 %v3512_v5, %v3500_v22  ;;  %v6490_v5 = vld [vmem:[#allocation8 + $0xa8] sm:$0xff]  ;;  %4048 = vmatpush.bf16.msra.mxu3 %v6498_v7 }
 0x243   :  { %v3488_v9 = vpop.f32.mrf.mxu1  ;;  %4035 = vmatpush.bf16.msra.mxu2 %v6490_v5 }
 0x245   :  { %4023 = vmatpush.bf16.msra.mxu1 %v6481_v13 }
 0x247   :  { %v3501_v14 = vpop.f32.mrf.mxu2  ;;  %4036 = vmatpush.bf16.msra.mxu2 %v6489_v20 }
 0x248   :  { %v6497_v14 = vld [vmem:[#allocation8 + $0xe0] sm:$0xff] }
 0x249   :  { %v3514_v25 = vpop.f32.mrf.mxu3  ;;  %4049 = vmatpush.bf16.msra.mxu3 %v6497_v14  ;;  %4024 = vmatpush.bf16.msra.mxu1 %v6480_v21 }
 0x24a   :  { %v6938_v25 = vpop.eup %6516 }
 0x24b   :  { %v3662_v22 = vmul.f32 %v6938_v25, %v6934_v43  ;;  %4037 = vmatpush.bf16.msra.mxu2 %v6488_v8  ;;  %vm3668_vm7 = vweird.f32 %v6938_v25 }
 0x24c   :  { %vm3669_vm10 = vmor %vm3667_vm8, %vm3668_vm7 }
 0x24d   :  { %4050 = vmatpush.bf16.msra.mxu3 %v6496_v23 }
 0x24f   :  { %4038 = vmatpush.bf16.msra.mxu2 %v6487_v34  ;;  %v6511_v34 = vld [vmem:[#allocation10] ss:$0 sm:$0xff] }
 0x251   :  { %4051 = vmatpush.bf16.msra.mxu3 %v6495_v51 }
 0x258   :  { %v3525_v28 = vpop.f32.mrf.mxu0 }
 0x259   :  { %v3538_v55 = vpop.f32.mrf.mxu1  ;;  %v3526_v36 = vadd.f32 %v3525_v28, %v3513_v27  ;;  %v6471_v28 = vld [vmem:[#allocation8 + $0x10] sm:$0xff] }
 0x25a   :  { %4012 = vmatpush.bf16.msra.mxu0 %v6471_v28 }
 0x25b   :  { %v3539_v40 = vadd.f32 %v3538_v55, %v3526_v36  ;;  %v6479_v55 = vld [vmem:[#allocation8 + $0x50] sm:$0xff]  ;;  %v3663_v36 = vmul.f32 %v6938_v25, %v3662_v22 }
 0x25c   :  { %4025 = vmatpush.bf16.msra.mxu1 %v6479_v55 }
 0x25e   :  { %4013 = vmatpush.bf16.msra.mxu0 %v6470_v39 }
 0x25f   :  { %v3551_v61 = vpop.f32.mrf.mxu2 }
 0x260   :  { %v3552_v41 = vadd.f32 %v3551_v61, %v3539_v40  ;;  %v3527_v46 = vpop.f32.mrf.mxu0  ;;  %v6478_v40 = vld [vmem:[#allocation8 + $0x48] sm:$0xff] }
 0x261   :  { %v3564_v56 = vpop.f32.mrf.mxu3  ;;  %v3540_v47 = vpop.f32.mrf.mxu1  ;;  %v6486_v61 = vld [vmem:[#allocation8 + $0x88] sm:$0xff]  ;;  %4026 = vmatpush.bf16.msra.mxu1 %v6478_v40 }
 0x262   :  { %v6929_v48 = vadd.f32 %v3564_v56, %v3552_v41  ;;  %v3664_v41 = vmul.f32 0.5, %v3663_v36  ;;  %v6494_v56 = vld [vmem:[#allocation8 + $0xc8] sm:$0xff]  ;;  %4039 = vmatpush.bf16.msra.mxu2 %v6486_v61  ;;  %v6469_v47 = vld [vmem:[#allocation8] sm:$0xff] }
 0x263   :  { %4052 = vmatpush.bf16.msra.mxu3 %v6494_v56  ;;  %4014 = vmatpush.bf16.msra.mxu0 %v6469_v47 }
 0x264   :  { %v3586_v4 = vrot.slane %v6929_v48, 4  ;;  %v3599_v31 = vmul.f32 %v6929_v48, %v6929_v48  ;;  %v3665_v45 = vsub.f32 1.5, %v3664_v41 }
 0x265   :  { %4027 = vmatpush.bf16.msra.mxu1 %v6477_v29 }
 0x266   :  { %v3587_v44 = vadd.f32 %v3586_v4, %v6929_v48  ;;  %v3618_v50 = vrot.slane %v3599_v31, 4  ;;  %4040 = vmatpush.bf16.msra.mxu2 %v6485_v18 }
 0x267   :  { %v3553_v57 = vpop.f32.mrf.mxu2  ;;  %4053 = vmatpush.bf16.msra.mxu3 %v6493_v49 }
 0x268   :  { %v3588_v59 = vrot.slane %v3587_v44, 2  ;;  %v3619_v60 = vadd.f32 %v3618_v50, %v3599_v31  ;;  %v3666_v31 = vmul.f32 %v6938_v25, %v3665_v45 }
 0x269   :  { %v3566_v37 = vpop.f32.mrf.mxu3 }
 0x26a   :  { %v3589_v62 = vadd.f32 %v3588_v59, %v3587_v44  ;;  %v3620_v63 = vrot.slane %v3619_v60, 2  ;;  %v3670_v53 = vsel %vm3669_vm10, %v6938_v25, %v3666_v31  ;;  %v3636_v59 = vld [vmem:[#allocation5] sm:$0xf]  ;;  %v3696_v25 = vld [vmem:[#allocation7] sm:$0xf] }
 0x26b   :  { %v3686_v57 = vrot.slane %v3670_v53, 6 }
 0x26c   :  { %v3590_v11 = vrot.slane %v3589_v62, 1  ;;  %v3621_v9 = vadd.f32 %v3620_v63, %v3619_v60 }
 0x26e   :  { %v3591_v10 = vadd.f32 %v3590_v11, %v3589_v62  ;;  %v3622_v38 = vrot.slane %v3621_v9, 1 }
 0x270   :  { %v6940_v15 = vmul.f32 0.125, %v3591_v10  ;;  %v3623_v42 = vadd.f32 %v3622_v38, %v3621_v9 }
 0x272   :  { %v3627_v16 = vmul.f32 0.125, %v3623_v42  ;;  %v3631_v17 = vmul.f32 %v6940_v15, %v6940_v15 }
 0x274   :  { %v3635_v26 = vsub.f32 %v3627_v16, %v3631_v17 }
 0x276   :  { %v3640_v27 = vadd.f32 1e-05, %v3635_v26 }
 0x278   :  { %6518 = vrsqrt.f32 %v3640_v27  ;;  %vm3677_vm11 = vweird.f32 %v3640_v27 }
 0x27e   :  { %v6519_v46 = vpop.eup %6518 }
 0x27f   :  { %v3672_v24 = vmul.f32 %v6519_v46, %v3640_v27  ;;  %vm3678_vm9 = vweird.f32 %v6519_v46 }
 0x280   :  { %vm3679_vm12 = vmor %vm3677_vm11, %vm3678_vm9 }
 0x281   :  { %v3673_v4 = vmul.f32 %v6519_v46, %v3672_v24 }
 0x283   :  { %v3674_v44 = vmul.f32 0.5, %v3673_v4 }
 0x285   :  { %v3675_v50 = vsub.f32 1.5, %v3674_v44 }
 0x287   :  { %v3676_v6 = vmul.f32 %v6519_v46, %v3675_v50 }
 0x289   :  { %v3680_v54 = vsel %vm3679_vm12, %v6519_v46, %v3676_v6 }
 0x28a   :  { %v3687_v58 = vrot.slane %v3680_v54, 5 }
 0x28c   :  { %v3691_v60 = vsel %vm3690_vm13, %v3686_v57, %v3687_v58 }
 0x28d   :  { %v3693_v37 = vsel %vm3692_vm14, %v6908_v52, %v3691_v60 }
 0x28e   :  { %v3695_v43 = vmul.f32 %v3693_v37, %v3636_v59 }
 0x290   :  { %v3698_v62 = vperm.slane %v3695_v43, 0  ;;  %v3699_v63 = vperm.slane %v3695_v43, 1  ;;  %v3700_v1 = vperm.slane %v3695_v43, 2  ;;  %v3701_v3 = vperm.slane %v3695_v43, 3 }
 0x292   :  { %v3706_v5 = vmul.f32 %v3698_v62, %v6851_v0  ;;  %v3707_v7 = vmul.f32 %v3699_v63, %v6866_v19  ;;  %v3708_v11 = vmul.f32 %v3700_v1, %v6925_v32  ;;  %v3709_v9 = vmul.f32 %v3701_v3, %v6940_v15 }
 0x293   :  { %v3725_v10 = vmul.f32 %v3701_v3, %v6929_v48  ;;  %v3722_v38 = vmul.f32 %v3698_v62, %v6826_v35  ;;  %v3723_v12 = vmul.f32 %v3699_v63, %v6859_v2  ;;  %v3724_v52 = vmul.f32 %v3700_v1, %v6919_v33 }
 0x294   :  { %v3714_v13 = vrot.slane %v3707_v7, 7  ;;  %v3715_v20 = vrot.slane %v3708_v11, 6  ;;  %v3716_v14 = vrot.slane %v3709_v9, 5 }
 0x296   :  { %v3717_v0 = vsel %vm3688_vm5, %v3706_v5, %v3714_v13  ;;  %v3718_v19 = vsel %vm3690_vm13, %v3715_v20, %v3716_v14 }
 0x297   :  { %v3719_v32 = vsel %vm3692_vm14, %v3717_v0, %v3718_v19 }
 0x298   :  { %v3721_v42 = vsub.f32 %v3696_v25, %v3719_v32 }
 0x29a   :  { %v3730_v15 = vperm.slane %v3721_v42, 3  ;;  %v3727_v16 = vperm.slane %v3721_v42, 0  ;;  %v3728_v48 = vperm.slane %v3721_v42, 1  ;;  %v3729_v17 = vperm.slane %v3721_v42, 2 }
 0x29c   :  { %v3738_v35 = vadd.f32 %v3730_v15, %v3725_v10  ;;  %v3735_v30 = vadd.f32 %v3727_v16, %v3722_v38  ;;  %v3736_v2 = vadd.f32 %v3728_v48, %v3723_v12  ;;  %v3737_v21 = vadd.f32 %v3729_v17, %v3724_v52 }
 0x29e   :  { %v3742_v33 = vmax.f32 %v3738_v35, 0.0  ;;  %v3739_v8 = vmax.f32 %v3735_v30, 0.0  ;;  %v3740_v22 = vmax.f32 %v3736_v2, 0.0  ;;  %v3741_v23 = vmax.f32 %v3737_v21, 0.0 }
 0x2a0   :  { %v3746_v26 = vpack.c.bf16 %v3742_v33, %v3742_v33  ;;  %v3743_v27 = vpack.c.bf16 %v3739_v8, %v3739_v8  ;;  %v3744_v28 = vpack.c.bf16 %v3740_v22, %v3740_v22  ;;  %v3745_v55 = vpack.c.bf16 %v3741_v23, %v3741_v23 }
 0x2a2   :  { %4015 = vmatmul.bf16.vlgmr.msra.gmra.mxu0 %v3743_v27  ;;  %4028 = vmatmul.bf16.vlgmr.msra.gmra.mxu1 %v3744_v28 }
 0x2a3   :  { %4041 = vmatmul.bf16.vlgmr.msra.gmra.mxu2 %v3745_v55  ;;  %4054 = vmatmul.bf16.vlgmr.msra.gmra.mxu3 %v3746_v26 }
 0x31f   :  { %v4016_v36 = vpop.f32.mrf.mxu0  ;;  %v4029_v51 = vpop.f32.mrf.mxu1 }
 0x320   :  { %v4017_v39 = vadd.f32 %v6511_v34, %v4016_v36 }
 0x322   :  { %v4030_v40 = vadd.f32 %v4029_v51, %v4017_v39 }
 0x326   :  { %v4042_v61 = vpop.f32.mrf.mxu2  ;;  %v4055_v41 = vpop.f32.mrf.mxu3 }
 0x327   :  { %v4043_v56 = vadd.f32 %v4042_v61, %v4030_v40  ;;  %v4018_v46 = vpop.f32.mrf.mxu0  ;;  %v4031_v47 = vpop.f32.mrf.mxu1 }
 0x329   :  { %v4056_v29 = vadd.f32 %v4055_v41, %v4043_v56 }
 0x32b   :  { %4059 = vmax.xlane.f32.xlu0 %v4056_v29 }
 0x32e   :  { %v4044_v18 = vpop.f32.mrf.mxu2  ;;  %v4057_v45 = vpop.f32.mrf.mxu3 }
 0x39e   :  { %v4060_v24 = vpop.xlane.xlu0 %4059 }
 0x39f   :  { %v4061_v49 = vsub.f32 %v4056_v29, %v4060_v24 }
 0x3a1   :  { %v4062_v4 = vmul.f32 1.442695, %v4061_v49 }
 0x3a3   :  { %6520 = vpow2.f32 %v4062_v4 }
 0x3a9   :  { %v6521_v31 = vpop.eup %6520 }
 0x3aa   :  { %4064 = vadd.xlane.f32.xlu0 %v6521_v31 }
 0x41d   :  { %v4065_v44 = vpop.xlane.xlu0 %4064 }
 0x41e   :  { %6522 = vrcp.f32 %v4065_v44  ;;  %v4077_v54 = vand.u32 2147483648, %v4065_v44  ;;  %v4075_v58 = vand.u32 2147483647, %v4065_v44  ;;  %vm4071_vm0 = vweird.f32 %v4065_v44 }
 0x420   :  { %v4078_v60 = vor.u32 1.1754944e-38, %v4077_v54  ;;  %vm4076_vm2 = vcmp.eq.f32.partialorder %v4075_v58, 8.507059e+37 }
 0x424   :  { %v6523_v50 = vpop.eup %6522 }
 0x425   :  { %v4067_v53 = vmul.f32 %v6523_v50, %v4065_v44  ;;  %vm4072_vm15 = vweird.f32 %v6523_v50 }
 0x426   :  { %vm4073_vm1 = vmor %vm4071_vm0, %vm4072_vm15 }
 0x427   :  { %v4068_v6 = vsub.f32 1.0, %v4067_v53 }
 0x429   :  { %v4069_v57 = vmul.f32 %v6523_v50, %v4068_v6 }
 0x42b   :  { %v4070_v59 = vadd.f32 %v6523_v50, %v4069_v57 }
 0x42d   :  { %v4074_v37 = vsel %vm4073_vm1, %v6523_v50, %v4070_v59 }
 0x42e   :  { %v4079_v43 = vsel %vm4076_vm2, %v4078_v60, %v4074_v37 }
 0x42f   :  { %v4080_v62 = vmul.f32 %v6521_v31, %v4079_v43 }
 0x431   :  { %4081 = vst [vmem:[#allocation11] sm:$0xff] %v4080_v62 }
 0x432   :  { %4092 = dma.vmem_to_hbm [thread:$0]  %s4088_s2, 128, %s4090_s13, [#allocation4]  }
 0x433   :  { %6674 = dma.done.wait [#allocation4], 128  }
 0x434   :  { %6675 = vsyncadd [#allocation4], 4294967168 }
 0x435   :  { %4097 = vsyncpa [#allocation3], 1 }
 0x436   :  { %4098 = vsyncpa [#allocation6], 1 }
 0x437   :  { %4099 = vsyncpa [#allocation9], 1 }
 0x438   :  { %4100 = vsyncpa [#allocation4], 1 }

</bundles_post_ra>
